<compile_context>
chip_gen: v5e
topology: v5e:2x2
jax: 0.10.0
libtpu: 0.0.40
codegen_flags: <defaults>
</compile_context>

<pallas_src>
import functools

import numpy as np
import jax
import jax.numpy as jnp
from jax.experimental import pallas as pl
from jax.experimental.pallas import tpu as pltpu

EPS = 1e-5
_INV_SQRT2 = 0.7071067811865476
_SQRT_2_OVER_PI = 0.7978845608028654


def _round_up(x, m):
    return (x + m - 1) // m * m


def _vmem_limit_bytes():
    # v5e/v6e: 128 MiB physical VMEM/TC (scoped default only 16/32 MiB); v7x: 64 MiB/TC.
    # Use ~3/4 of physical capped at 96 MiB so larger blocks can double-buffer on
    # v5e/v6e while leaving headroom on v7x.
    try:
        phys = pltpu.get_tpu_info().vmem_capacity_bytes
        return int(min(96 * 1024 * 1024, phys * 3 // 4))
    except Exception:
        return 48 * 1024 * 1024


# ---------------- in-kernel math helpers ----------------

def _gelu(x):
    # tanh-form GELU (runs on the EUP); |err| vs exact erf GELU ~1e-3.
    return 0.5 * x * (1.0 + jnp.tanh(_SQRT_2_OVER_PI * (x + 0.044715 * x * x * x)))


def _stats_cols(y):
    # per-channel [sum ; sumsq] partials, one sublane-aligned store: (2*C, 1)
    return jnp.concatenate([jnp.sum(y, axis=1, keepdims=True),
                            jnp.sum(y * y, axis=1, keepdims=True)], axis=0)


# ---------------- Pallas kernels (grid over images) ----------------

def _stage_a_kernel(x_ref, w_ref, y_ref, st_ref, *, stride, ho, wo, cin):
    """conv1 (3x3, stride s, pad 1) [+ fused 1x1/stride-s downsample rows] as ONE
    (Cw, 9*Cin) @ (9*Cin, P) MXU matmul on an im2col tap matrix built in VMEM from the
    phase-split input, plus per-image BN partial stats."""
    s = stride
    p_out = ho * wo
    xf = x_ref[0].astype(jnp.float32)                     # (s*s*cin, Hq, Wq)
    taps = []
    for ky in range(3):
        for kx in range(3):
            ph = (ky % s) * s + (kx % s)                  # stride phase of this tap
            r0, c0 = ky // s, kx // s                     # offset inside the phase image
            t = xf[ph * cin:(ph + 1) * cin, r0:r0 + ho, c0:c0 + wo]
            taps.append(t.reshape(cin, p_out))
    tap_mat = jnp.concatenate(taps, axis=0).astype(jnp.bfloat16)   # (9*cin, P)
    y = jnp.dot(w_ref[...], tap_mat, preferred_element_type=jnp.float32)  # (Cw, P) f32
    y_ref[0] = y.astype(y_ref.dtype)
    st_ref[0] = _stats_cols(y)


def _stage_b_kernel(y1_ref, sc_ref, bi_ref, w_ref, y2_ref, st_ref, hpad_ref, *, ho, wo):
    """BN1 (pre-folded affine) + GELU + conv2 (3x3, stride 1, pad 1 via a VMEM halo
    scratch) as one MXU matmul, plus per-image BN2 partial stats."""
    cp = y1_ref.shape[1]
    p_out = ho * wo
    h = _gelu(y1_ref[0].astype(jnp.float32) * sc_ref[...] + bi_ref[...])   # (cp, P)
    # halo pad: zero only the 1-px border (4 thin stores), write the interior once;
    # redone each step so megacore sharding of the image axis stays correct.
    zrow = jnp.zeros((cp, 1, wo + 2), jnp.float32)
    zcol = jnp.zeros((cp, ho, 1), jnp.float32)
    hpad_ref[:, 0:1, :] = zrow
    hpad_ref[:, ho + 1:ho + 2, :] = zrow
    hpad_ref[:, 1:ho + 1, 0:1] = zcol
    hpad_ref[:, 1:ho + 1, wo + 1:wo + 2] = zcol
    hpad_ref[:, 1:ho + 1, 1:wo + 1] = h.reshape(cp, ho, wo)
    taps = [hpad_ref[:, ky:ky + ho, kx:kx + wo].reshape(cp, p_out)
            for ky in range(3) for kx in range(3)]
    tap_mat = jnp.concatenate(taps, axis=0).astype(jnp.bfloat16)           # (9*cp, P)
    y2 = jnp.dot(w_ref[...], tap_mat, preferred_element_type=jnp.float32)  # (cp, P)
    y2_ref[0] = y2.astype(y2_ref.dtype)
    st_ref[0] = _stats_cols(y2)


def _stage_c_kernel(y2_ref, r_ref, sc2_ref, bi2_ref, scr_ref, bir_ref, o_ref):
    """BN2 + (BN_ds(downsample) | identity) residual add + GELU."""
    pre = (y2_ref[0].astype(jnp.float32) * sc2_ref[...] + bi2_ref[...]
           + r_ref[0].astype(jnp.float32) * scr_ref[...] + bir_ref[...])
    o_ref[0] = _gelu(pre).astype(o_ref.dtype)


# ---------------- plain-JAX glue ----------------

def _phase_split(x, s):
    """Zero-pad spatially by 1 (conv pad=1) and split into s*s stride phases so every
    tap of a stride-s 3x3 conv is an UNstrided static slice in-kernel.
    out[n, (py*s+px)*C + c, i, j] == xpad[n, c, s*i + py, s*j + px]."""
    N, C, H, W = x.shape
    Hq = -(-(H + 2) // s)
    Wq = -(-(W + 2) // s)
    xpad = jnp.pad(x, ((0, 0), (0, 0), (1, Hq * s - H - 1), (1, Wq * s - W - 1)))
    xph = xpad.reshape(N, C, Hq, s, Wq, s).transpose(0, 3, 5, 1, 2, 4)
    return xph.reshape(N, s * s * C, Hq, Wq), Hq, Wq


def _w3x3_mat(w, cin_p, cout_p):
    # (O, I, 3, 3) -> (cout_p, 9*cin_p) bf16, columns ordered (tap, cin); zero pads.
    O, I, _, _ = w.shape
    wt = jnp.transpose(w, (0, 2, 3, 1))                            # (O, 3, 3, I)
    wt = jnp.pad(wt, ((0, cout_p - O), (0, 0), (0, 0), (0, cin_p - I)))
    return wt.reshape(cout_p, 9 * cin_p).astype(jnp.bfloat16)


def _w1x1_center(wd, cin_p, cout_p):
    # 1x1 downsample conv as extra rows of the stage-A matmul: it is exactly the
    # centre tap (ky=kx=1) of the padded window, so only those columns are non-zero.
    O, I = wd.shape[0], wd.shape[1]
    m = jnp.zeros((cout_p, 9 * cin_p), jnp.float32)
    m = m.at[:O, 4 * cin_p:4 * cin_p + I].set(wd[:, :, 0, 0])
    return m.astype(jnp.bfloat16)


def _bn_fold(s1, s2, gamma, beta, count, cp):
    """Finalize training-mode BN from per-image [sum, sumsq] partials and fold
    gamma/beta into one affine: bn(y) = y*scale + bias (batch stats, biased variance,
    eps=1e-5).  Padded channels carry gamma=0 so their scale/bias are exactly 0.
    TODO(synk): one-pass E[y^2]-mean^2 can cancel for very large activation magnitudes;
    switch to a shifted two-pass if inputs are not roughly standardized."""
    mean = jnp.sum(s1, axis=0) / count
    var = jnp.maximum(jnp.sum(s2, axis=0) / count - mean * mean, 0.0)
    g = jnp.pad(gamma, (0, cp - gamma.shape[0]))
    b = jnp.pad(beta, (0, cp - beta.shape[0]))
    scale = g * jax.lax.rsqrt(var + EPS)
    bias = b - mean * scale
    return (scale.reshape(cp, 1).astype(jnp.float32),
            bias.reshape(cp, 1).astype(jnp.float32))


def residual_block_forward(x_nchw, params, stride=1):
    N, Cin, H, W = x_nchw.shape
    Cout = params['w1'].shape[0]
    s = stride
    Cin_p = _round_up(Cin, 8)        # sublane-aligned tap blocks
    Cout_p = _round_up(Cout, 8)      # sublane-aligned intermediate channel dim
    Ho = (H + 2 - 3) // s + 1
    Wo = (W + 2 - 3) // s + 1
    P = Ho * Wo
    M = N * P
    has_ds = params['ds'] is not None
    Cw = 2 * Cout_p if has_ds else Cout_p      # stage-A rows: conv1 [+ downsample]

    # one small fused bf16 HBM pass: cast + channel pad (to 8) + spatial pad + phase split
    x_bf = x_nchw.astype(jnp.bfloat16)
    x_cp = jnp.pad(x_bf, ((0, 0), (0, Cin_p - Cin), (0, 0), (0, 0)))
    xph, Hq, Wq = _phase_split(x_cp, s)

    w1m = _w3x3_mat(params['w1'], Cin_p, Cout_p)
    if has_ds:
        wd, gd, bd = params['ds']
        wa = jnp.concatenate([w1m, _w1x1_center(wd, Cin_p, Cout_p)], axis=0)
    else:
        wa = w1m

    cparams = pltpu.CompilerParams(dimension_semantics=("parallel",),
                                   vmem_limit_bytes=_vmem_limit_bytes())
    img = lambda c: pl.BlockSpec((1, c, P), lambda n: (n, 0, 0))
    stat = lambda c: pl.BlockSpec((1, 2 * c, 1), lambda n: (n, 0, 0))
    vec = pl.BlockSpec((Cout_p, 1), lambda n: (0, 0))
    bpb, bpf = 2, 4

    # ---- stage A: conv1 (+ fused downsample) + BN partial stats ----
    flops_a = 2 * M * 9 * Cin_p * Cw
    bytes_a = xph.size * bpb + wa.size * bpb + N * Cw * P * bpb + N * 2 * Cw * bpf
    y_all, st_a = pl.pallas_call(
        functools.partial(_stage_a_kernel, stride=s, ho=Ho, wo=Wo, cin=Cin_p),
        grid=(N,),
        in_specs=[pl.BlockSpec((1, s * s * Cin_p, Hq, Wq), lambda n: (n, 0, 0, 0)),
                  pl.BlockSpec((Cw, 9 * Cin_p), lambda n: (0, 0))],   # resident weights
        out_specs=(img(Cw), stat(Cw)),
        out_shape=(jax.ShapeDtypeStruct((N, Cw, P), jnp.bfloat16),
                   jax.ShapeDtypeStruct((N, 2 * Cw, 1), jnp.float32)),
        compiler_params=cparams,
        cost_estimate=pl.CostEstimate(flops=flops_a, transcendentals=0,
                                      bytes_accessed=bytes_a),
    )(xph, wa)

    sum_a, ssq_a = st_a[:, :Cw, 0], st_a[:, Cw:, 0]
    scale1, bias1 = _bn_fold(sum_a[:, :Cout_p], ssq_a[:, :Cout_p],
                             params['g1'], params['b1'], M, Cout_p)

    # ---- stage B: BN1 + GELU + conv2 + BN2 partial stats ----
    w2m = _w3x3_mat(params['w2'], Cout_p, Cout_p)
    flops_b = 2 * M * 9 * Cout_p * Cout_p
    bytes_b = 2 * M * Cout_p * bpb + w2m.size * bpb + N * 2 * Cout_p * bpf
    y2, st_b = pl.pallas_call(
        functools.partial(_stage_b_kernel, ho=Ho, wo=Wo),
        grid=(N,),
        in_specs=[img(Cout_p), vec, vec,
                  pl.BlockSpec((Cout_p, 9 * Cout_p), lambda n: (0, 0))],
        out_specs=(img(Cout_p), stat(Cout_p)),
        out_shape=(jax.ShapeDtypeStruct((N, Cout_p, P), jnp.bfloat16),
                   jax.ShapeDtypeStruct((N, 2 * Cout_p, 1), jnp.float32)),
        scratch_shapes=[pltpu.VMEM((Cout_p, Ho + 2, Wo + 2), jnp.float32)],
        compiler_params=cparams,
        cost_estimate=pl.CostEstimate(flops=flops_b, transcendentals=M * Cout_p,
                                      bytes_accessed=bytes_b),
    )(y_all, scale1, bias1, w2m)

    scale2, bias2 = _bn_fold(st_b[:, :Cout_p, 0], st_b[:, Cout_p:, 0],
                             params['g2'], params['b2'], M, Cout_p)
    if has_ds:
        scale_r, bias_r = _bn_fold(sum_a[:, Cout_p:], ssq_a[:, Cout_p:],
                                   gd, bd, M, Cout_p)
        res = y_all
        res_spec = pl.BlockSpec((1, Cout_p, P), lambda n: (n, 1, 0))  # downsample rows
    else:
        # identity skip (stride==1, Cin==Cout): reuse the bf16 channels-first input
        # directly; no channel-inflated f32 residual stream is written to HBM.
        res = x_cp.reshape(N, Cin_p, H * W)
        res_spec = img(Cout_p)
        scale_r = jnp.ones((Cout_p, 1), jnp.float32)
        bias_r = jnp.zeros((Cout_p, 1), jnp.float32)

    # ---- stage C: BN2 + residual add + GELU ----
    flops_c = 10 * M * Cout_p
    bytes_c = M * Cout_p * (2 * bpb + bpf) + 4 * Cout_p * bpf
    out = pl.pallas_call(
        _stage_c_kernel,
        grid=(N,),
        in_specs=[img(Cout_p), res_spec, vec, vec, vec, vec],
        out_specs=img(Cout_p),
        out_shape=jax.ShapeDtypeStruct((N, Cout_p, P), jnp.float32),
        compiler_params=cparams,
        cost_estimate=pl.CostEstimate(flops=flops_c, transcendentals=M * Cout_p,
                                      bytes_accessed=bytes_c),
    )(y2, res, scale2, bias2, scale_r, bias_r)

    # channels-first output is already NCHW; just un-flatten pixels, drop channel pad.
    return out.reshape(N, Cout_p, Ho, Wo)[:, :Cout]


# ---------------- reference (pure JAX, PyTorch semantics) & params ----------------

def reference_forward(x, params, stride):
    def conv(x_, w, s, pad):
        return jax.lax.conv_general_dilated(
            x_, w, window_strides=(s, s), padding=((pad, pad), (pad, pad)),
            dimension_numbers=('NCHW', 'OIHW', 'NCHW'))

    def bn(x_, g, b):
        mean = jnp.mean(x_, axis=(0, 2, 3), keepdims=True)
        var = jnp.mean(jnp.square(x_ - mean), axis=(0, 2, 3), keepdims=True)
        return ((x_ - mean) * (g.reshape(1, -1, 1, 1) * jax.lax.rsqrt(var + EPS))
                + b.reshape(1, -1, 1, 1))

    def gelu(x_):
        return 0.5 * x_ * (1.0 + jax.lax.erf(x_ * _INV_SQRT2))

    out = gelu(bn(conv(x, params['w1'], stride, 1), params['g1'], params['b1']))
    out = bn(conv(out, params['w2'], 1, 1), params['g2'], params['b2'])
    if params['ds'] is None:
        idn = x
    else:
        wd, gd, bd = params['ds']
        idn = bn(conv(x, wd, stride, 0), gd, bd)
    return gelu(out + idn)


def init_params(key, cin, cout, stride):
    ks = jax.random.split(key, 9)

    def wconv(k, co, ci, kh, kw):
        return jax.random.normal(k, (co, ci, kh, kw), jnp.float32) * (2.0 / (ci * kh * kw)) ** 0.5

    params = dict(
        w1=wconv(ks[0], cout, cin, 3, 3),
        g1=1.0 + 0.1 * jax.random.normal(ks[1], (cout,), jnp.float32),
        b1=0.1 * jax.random.normal(ks[2], (cout,), jnp.float32),
        w2=wconv(ks[3], cout, cout, 3, 3),
        g2=1.0 + 0.1 * jax.random.normal(ks[4], (cout,), jnp.float32),
        b2=0.1 * jax.random.normal(ks[5], (cout,), jnp.float32),
    )
    if stride != 1 or cin != cout:
        params['ds'] = (wconv(ks[6], cout, cin, 1, 1),
                        1.0 + 0.1 * jax.random.normal(ks[7], (cout,), jnp.float32),
                        0.1 * jax.random.normal(ks[8], (cout,), jnp.float32))
    else:
        params['ds'] = None
    return params


if __name__ == "__main__":
    key = jax.random.PRNGKey(0)
    N, H, W = 2, 16, 16
    # (in_channels, out_channels, stride): exercises downsample, strided downsample,
    # and the identity-skip branch.
    configs = [(4, 8, 1), (4, 8, 2), (8, 8, 1)]

    for idx, (cin, cout, stride) in enumerate(configs):
        kp, kx = jax.random.split(jax.random.fold_in(key, idx))
        params = init_params(kp, cin, cout, stride)
        x = jax.random.normal(kx, (N, cin, H, W), jnp.float32)

        y = jax.block_until_ready(residual_block_forward(x, params, stride))
        y_ref = reference_forward(x, params, stride)
        assert y.shape == y_ref.shape, (y.shape, y_ref.shape)
        err = float(jnp.max(jnp.abs(y - y_ref)))
        # bf16 MXU operands + bf16 inter-stage streams + tanh-GELU introduce ~1e-2-scale
        # drift vs the all-f32 exact-erf reference; structural bugs would be O(1).
        if not np.isfinite(err) or err > 1e-1:
            raise RuntimeError(f"mismatch for config {(cin, cout, stride)}: max abs err {err}")

    print("KERNEL_OK")
</pallas_src>

<mosaic_0001>
module attributes {stable_mosaic.version = 11 : i64} {
  func.func @_stage_a_kernel(%arg0: i32, %arg1: memref<1x8x18x18xbf16, #tpu.memory_space<vmem>>, %arg2: memref<16x72xbf16, #tpu.memory_space<vmem>>, %arg3: memref<1x16x256xbf16, #tpu.memory_space<vmem>>, %arg4: memref<1x32x1xf32, #tpu.memory_space<vmem>>) attributes {dimension_semantics = [#tpu.dimension_semantics<parallel>], iteration_bounds = array<i64: 2>, scalar_prefetch = 0 : i64, scratch_operands = 0 : i64, tpu.core_type = #tpu.core_type<tc>, window_params = [{transform_indices = @transform_0, window_bounds = array<i64: 1, 8, 18, 18>}, {pipeline_mode = #tpu.pipeline_mode<synchronous>, transform_indices = @transform_1, window_bounds = array<i64: 16, 72>}, {transform_indices = @transform_2, window_bounds = array<i64: 1, 16, 256>}, {transform_indices = @transform_3, window_bounds = array<i64: 1, 32, 1>}]} {
    %c0 = arith.constant 0 : index
    %c0_0 = arith.constant 0 : index
    %c0_1 = arith.constant 0 : index
    %c0_2 = arith.constant 0 : index
    %0 = vector.load %arg1[%c0, %c0_0, %c0_1, %c0_2] : memref<1x8x18x18xbf16, #tpu.memory_space<vmem>>, vector<1x8x18x18xbf16>
    %1 = vector.shape_cast %0 : vector<1x8x18x18xbf16> to vector<8x18x18xbf16>
    %2 = arith.extf %1 : vector<8x18x18xbf16> to vector<8x18x18xf32>
    %3 = vector.extract_strided_slice %2 {offsets = [0, 0, 0], sizes = [8, 16, 16], strides = [1, 1, 1]} : vector<8x18x18xf32> to vector<8x16x16xf32>
    %4 = vector.shape_cast %3 : vector<8x16x16xf32> to vector<8x256xf32>
    %5 = vector.extract_strided_slice %2 {offsets = [0, 0, 1], sizes = [8, 16, 16], strides = [1, 1, 1]} : vector<8x18x18xf32> to vector<8x16x16xf32>
    %6 = vector.shape_cast %5 : vector<8x16x16xf32> to vector<8x256xf32>
    %7 = vector.extract_strided_slice %2 {offsets = [0, 0, 2], sizes = [8, 16, 16], strides = [1, 1, 1]} : vector<8x18x18xf32> to vector<8x16x16xf32>
    %8 = vector.shape_cast %7 : vector<8x16x16xf32> to vector<8x256xf32>
    %9 = vector.extract_strided_slice %2 {offsets = [0, 1, 0], sizes = [8, 16, 16], strides = [1, 1, 1]} : vector<8x18x18xf32> to vector<8x16x16xf32>
    %10 = vector.shape_cast %9 : vector<8x16x16xf32> to vector<8x256xf32>
    %11 = vector.extract_strided_slice %2 {offsets = [0, 1, 1], sizes = [8, 16, 16], strides = [1, 1, 1]} : vector<8x18x18xf32> to vector<8x16x16xf32>
    %12 = vector.shape_cast %11 : vector<8x16x16xf32> to vector<8x256xf32>
    %13 = vector.extract_strided_slice %2 {offsets = [0, 1, 2], sizes = [8, 16, 16], strides = [1, 1, 1]} : vector<8x18x18xf32> to vector<8x16x16xf32>
    %14 = vector.shape_cast %13 : vector<8x16x16xf32> to vector<8x256xf32>
    %15 = vector.extract_strided_slice %2 {offsets = [0, 2, 0], sizes = [8, 16, 16], strides = [1, 1, 1]} : vector<8x18x18xf32> to vector<8x16x16xf32>
    %16 = vector.shape_cast %15 : vector<8x16x16xf32> to vector<8x256xf32>
    %17 = vector.extract_strided_slice %2 {offsets = [0, 2, 1], sizes = [8, 16, 16], strides = [1, 1, 1]} : vector<8x18x18xf32> to vector<8x16x16xf32>
    %18 = vector.shape_cast %17 : vector<8x16x16xf32> to vector<8x256xf32>
    %19 = vector.extract_strided_slice %2 {offsets = [0, 2, 2], sizes = [8, 16, 16], strides = [1, 1, 1]} : vector<8x18x18xf32> to vector<8x16x16xf32>
    %20 = vector.shape_cast %19 : vector<8x16x16xf32> to vector<8x256xf32>
    %21 = tpu.concatenate %4, %6, %8, %10, %12, %14, %16, %18, %20 in 0 : vector<8x256xf32>, vector<8x256xf32>, vector<8x256xf32>, vector<8x256xf32>, vector<8x256xf32>, vector<8x256xf32>, vector<8x256xf32>, vector<8x256xf32>, vector<8x256xf32> -> vector<72x256xf32>
    %22 = arith.truncf %21 : vector<72x256xf32> to vector<72x256xbf16>
    %c0_3 = arith.constant 0 : index
    %c0_4 = arith.constant 0 : index
    %23 = vector.load %arg2[%c0_3, %c0_4] : memref<16x72xbf16, #tpu.memory_space<vmem>>, vector<16x72xbf16>
    %cst = arith.constant dense<0.000000e+00> : vector<16x256xf32>
    %24 = tpu.matmul %23, %22, %cst {dimension_numbers = #tpu.dot_dimension_numbers<[1], [0], [0], [1], [0, 0, 1, 1], [], []>} : vector<16x72xbf16>, vector<72x256xbf16>, vector<16x256xf32> -> vector<16x256xf32>
    %25 = arith.truncf %24 : vector<16x256xf32> to vector<16x256xbf16>
    %c0_5 = arith.constant 0 : index
    %c0_6 = arith.constant 0 : index
    %c0_7 = arith.constant 0 : index
    %26 = vector.load %arg3[%c0_5, %c0_6, %c0_7] : memref<1x16x256xbf16, #tpu.memory_space<vmem>>, vector<1x16x256xbf16>
    %27 = vector.shape_cast %26 : vector<1x16x256xbf16> to vector<16x256xbf16>
    %28 = vector.shape_cast %25 : vector<16x256xbf16> to vector<1x16x256xbf16>
    tpu.vector_store %arg3[%c0_5, %c0_6, %c0_7], %28 {strides = array<i32>} : memref<1x16x256xbf16, #tpu.memory_space<vmem>>, vector<1x16x256xbf16>,
    %cst_8 = arith.constant dense<0.000000e+00> : vector<16xf32>
    %29 = vector.multi_reduction <add>, %24, %cst_8 [1] : vector<16x256xf32> to vector<16xf32>
    %30 = vector.shape_cast %29 : vector<16xf32> to vector<16x1xf32>
    %31 = arith.mulf %24, %24 : vector<16x256xf32>
    %cst_9 = arith.constant dense<0.000000e+00> : vector<16xf32>
    %32 = vector.multi_reduction <add>, %31, %cst_9 [1] : vector<16x256xf32> to vector<16xf32>
    %33 = vector.shape_cast %32 : vector<16xf32> to vector<16x1xf32>
    %34 = tpu.concatenate %30, %33 in 0 : vector<16x1xf32>, vector<16x1xf32> -> vector<32x1xf32>
    %c0_10 = arith.constant 0 : index
    %c0_11 = arith.constant 0 : index
    %c0_12 = arith.constant 0 : index
    %35 = vector.load %arg4[%c0_10, %c0_11, %c0_12] : memref<1x32x1xf32, #tpu.memory_space<vmem>>, vector<1x32x1xf32>
    %36 = vector.shape_cast %35 : vector<1x32x1xf32> to vector<32x1xf32>
    %37 = vector.shape_cast %34 : vector<32x1xf32> to vector<1x32x1xf32>
    tpu.vector_store %arg4[%c0_10, %c0_11, %c0_12], %37 {strides = array<i32>} : memref<1x32x1xf32, #tpu.memory_space<vmem>>, vector<1x32x1xf32>,
    return
  }
  func.func @transform_0(%arg0: i32) -> (i32, i32, i32, i32) {
    %c0_i32 = arith.constant 0 : i32
    %c0_i32_0 = arith.constant 0 : i32
    %c0_i32_1 = arith.constant 0 : i32
    %c0_i32_2 = arith.constant 0 : i32
    return %arg0, %c0_i32, %c0_i32_0, %c0_i32_1 : i32, i32, i32, i32
  }
  func.func @transform_1(%arg0: i32) -> (i32, i32) {
    %c0_i32 = arith.constant 0 : i32
    %c0_i32_0 = arith.constant 0 : i32
    %c0_i32_1 = arith.constant 0 : i32
    return %c0_i32, %c0_i32_0 : i32, i32
  }
  func.func @transform_2(%arg0: i32) -> (i32, i32, i32) {
    %c0_i32 = arith.constant 0 : i32
    %c0_i32_0 = arith.constant 0 : i32
    %c0_i32_1 = arith.constant 0 : i32
    return %arg0, %c0_i32, %c0_i32_0 : i32, i32, i32
  }
  func.func @transform_3(%arg0: i32) -> (i32, i32, i32) {
    %c0_i32 = arith.constant 0 : i32
    %c0_i32_0 = arith.constant 0 : i32
    %c0_i32_1 = arith.constant 0 : i32
    return %arg0, %c0_i32, %c0_i32_0 : i32, i32, i32
  }
}

</mosaic_0001>

<bundles_post_ra>
// kernel: tpu_custom_call.1
= control target key start
LH: loop header
LB: loop body
LE: loop exit
PB: predicated region body
PF: predicated region fallthrough
CT: control target
= control target key end

     0   :  { %9 = vsyncpa [#allocation3], 0  ;;  %s7031_s0 = inlined_call_operand.vmem [shape: bf16[2,8,18,18], index: 0, kind: input, shape index: {}]   ;;  %s7032_s1 = inlined_call_operand.vmem [shape: bf16[16,72], index: 1, kind: input, shape index: {}]   ;;  %s7033_s2 = inlined_call_operand.hbm [shape: bf16[2,16,256], index: 2, kind: output, shape index: {0}]   ;;  %s7034_s3 = inlined_call_operand.vmem [shape: f32[2,32,1], index: 3, kind: output, shape index: {1}]  }
   0x1   :  { %11 = vsyncpa [#allocation3 + $0x1], 0  ;;  %s4249_s12 = smov 0   ;;  %s4251_s13 = smov 0  }
   0x2   :  { %s4253_s14 = smov 0   ;;  %s4255_s15 = smov 0  }
   0x3 LB: > { %s4270_s16 = sadd.s32 4294967295, %s4214_s15   ;;  %s3503_s17 = sadd.s32 4294967294, %s4214_s15   ;;  %s4214_s15 = sphi %s4255_s15, %s7416_s15   ;;  %s4210_s14 = sphi %s4253_s14, %s7415_s14   ;;  %s4206_s13 = sphi %s4251_s13, %s7414_s13   ;;  %s4202_s12 = sphi %s4249_s12, %s7413_s12  }
   0x4   : > { %s4274_s18 = sadd.s32 1, %s4214_s15   ;;  %s71_s19 = sadd.s32 1, %s4210_s14 }
   0x5   : > { %s68_s20 = ssub.s32 %s4214_s15, %s4274_s18  ;;  %p81_p0 = scmp.ne.s32.totalorder %s4210_s14, %s4206_s13 }
   0x6   : > { %p69_p1 = scmp.eq.s32.totalorder %s68_s20, 0  ;;  %p82_p2 = scmp.eq.s32.totalorder %s4270_s16, 1 }
   0x7   : > { %p87_p3 = scmp.ne.s32.totalorder %s4206_s13, %s4202_s12  ;;  %p88_p4 = scmp.eq.s32.totalorder %s3503_s17, 1 }
   0x8   : > { %s4285_s21 = scalar_select %p69_p1, %s4210_s14, %s71_s19  }
   0x9   : > { %p4287_p5 = por %p82_p2, %p81_p0  ;;  %p4291_p6 = por %p88_p4, %p87_p3 }
   0xa   : > { %p3506_p7 = scmp.ge.s32.totalorder %s4214_s15, 1  ;;  %p143_p8 = scmp.lt.s32.totalorder %s4214_s15, 3 }
   0xc   : > { %p144_p9 = pnand %p3506_p7, %p143_p8 }
   0xe   : > { %147 = sbr.rel (%p144_p9) target bundleno = 969 (0x3c9), region = 28 }
  0x13   : > { %p172_p10 = scmp.lt.s32.totalorder %s4270_s16, 1  ;;  %v4216_v0 = vmov 1983009808   ;;  %v4217_v2 = vmov 1934713408   ;;  %vm232_vm0 = vcmask 1047556  }
  0x14   : > { %v237_v1 = vunpack.c.l.s4 %v4216_v0  ;;  %v285_v3 = vunpack.c.l.s4 %v4217_v2  ;;  %s4218_s29 = smov 127   ;;  %s4219_s30 = smov 48   ;;  %vm1241_vm1 = vcmask 1046528   ;;  %vm512_vm2 = vcmask 130048  }
  0x15   : > { %s4299_s24 = scalar_select %p172_p10, %s4270_s16, 1  ;;  %vm514_vm3 = vcmask 261120   ;;  %vm516_vm4 = vcmask 392192   ;;  %vm518_vm5 = vcmask 523264   ;;  %vm2276_vm6 = vcmask 1045504  }
  0x16   : > { %v4310_v7 = vunpack.c.0.s8 %v237_v1  ;;  %v4312_v8 = vunpack.c.0.s8 %v285_v3  ;;  %s4220_s4 = smov 16   ;;  %s4221_s5 = smov 32   ;;  %vm520_vm7 = vcmask 654336   ;;  %vm522_vm8 = vcmask 785408  }
  0x17   : > { %s3544_s25 = smul.u32 96, %s4299_s24  ;;  %s4222_s6 = smov 80   ;;  %vm524_vm9 = vcmask 916480   ;;  %vm3332_vm10 = vcmask 1043456   ;;  %vm3328_vm11 = vcmask 588800  }
  0x18   : > { %s4223_s7 = smov 64   ;;  %s4224_s8 = smov 112  }
  0x19   : > { %s4305_s28 = scalar_lea.vmem %s7031_s0, %s3544_s25  ;;  %s4225_s9 = smov 96  }
  0x1a   : > { %v3526_v4 = vld [vmem:[%s4305_s28] sm:$0xff]   ;;  %v186_v5 = vld [vmem:[%s4305_s28 + $0xc] sm:$0xff]   ;;  %v3541_v6 = vld [vmem:[%s4305_s28 + $0x18] sm:$0xff]   ;;  %s4226_s10 = smov 126   ;;  %s162_s19 = sand.u32 1, %s4206_s13  }
  0x1b   : > { %v4314_v9 = vunpack.c.l.bf16 %v3526_v4  ;;  %v4316_v10 = vunpack.c.h.bf16 %v3526_v4  ;;  %v4318_v11 = vunpack.c.l.bf16 %v3541_v6  ;;  %v4320_v12 = vunpack.c.h.bf16 %v3541_v6  ;;  %v192_v13 = vld [vmem:[%s4305_s28 + $0x24] sm:$0xff]   ;;  %v3542_v14 = vld [vmem:[%s4305_s28 + $0x30] sm:$0xff]   ;;  %v198_v15 = vld [vmem:[%s4305_s28 + $0x3c] sm:$0xff]   ;;  %s3507_s20 = sshll.u32 %s162_s19, 4  ;;  %s3524_s25 = sshll.u32 %s4270_s16, 4 }
  0x1c   : > { %v4325_v16 = vunpack.c.l.bf16 %v3542_v14  ;;  %v4327_v17 = vunpack.c.h.bf16 %v3542_v14  ;;  %v3543_v18 = vld [vmem:[%s4305_s28 + $0x48] sm:$0xff]   ;;  %v204_v19 = vld [vmem:[%s4305_s28 + $0x54] sm:$0xff]   ;;  %v4331_v20 = vunpack.c.l.bf16 %v186_v5  ;;  %v4333_v21 = vunpack.c.h.bf16 %v186_v5  ;;  %s164_s26 = scalar_lea.vmem [#allocation2], %s3507_s20  ;;  %s3393_s16 = scalar_lea.sflag [#allocation3], %s162_s19 }
  0x1d   : > { %7134 = vst [vmem:[#allocation5_spill] sm:$0xff] %v4314_v9  ;;  %v4337_v22 = vpack.i.bf16 %v4316_v10, %v4314_v9  ;;  %v4339_v23 = vunpack.c.l.bf16 %v3543_v18  ;;  %v4341_v24 = vunpack.c.h.bf16 %v3543_v18  ;;  %v4343_v25 = vunpack.c.l.bf16 %v192_v13 }
  0x1e   : > { %7135 = vst [vmem:[#allocation6_spill] sm:$0xff] %v4316_v10  ;;  %v4345_v26 = vunpack.c.h.bf16 %v192_v13  ;;  %v4347_v27 = vunpack.c.l.bf16 %v198_v15  ;;  %v4349_v28 = vunpack.c.h.bf16 %v198_v15  ;;  %v4351_v29 = vunpack.c.l.bf16 %v204_v19 }
  0x1f   : > { %7136 = vst [vmem:[#allocation7_spill] sm:$0xff] %v4318_v11  ;;  %3598 = vrot.lane.b32.xlu1 %v4337_v22, %s4218_s29  ;;  %v4355_v30 = vunpack.c.h.bf16 %v204_v19  ;;  %v231_v31 = vrot.slane %v4318_v11, 4  ;;  %v244_v32 = vrot.slane %v4343_v25, 4  ;;  %v256_v33 = vrot.slane %v4339_v23, 4 }
  0x20   : > { %7137 = vst [vmem:[#allocation8_spill] sm:$0xff] %v4320_v12  ;;  %v268_v34 = vrot.slane %v4351_v29, 4  ;;  %v344_v35 = vrot.slane %v4320_v12, 4  ;;  %v356_v36 = vrot.slane %v4345_v26, 4  ;;  %v368_v37 = vrot.slane %v4341_v24, 4 }
  0x21   : > { %7138 = vst [vmem:[#allocation9_spill] sm:$0xff] %v4325_v16  ;;  %v233_v38 = vsel %vm232_vm0, %v231_v31, %v4314_v9  ;;  %v245_v39 = vsel %vm232_vm0, %v244_v32, %v4331_v20  ;;  %v257_v40 = vsel %vm232_vm0, %v256_v33, %v4325_v16  ;;  %v380_v41 = vrot.slane %v4355_v30, 4 }
  0x22   : > { %7139 = vst [vmem:[#allocation10_spill] sm:$0xff] %v4327_v17  ;;  %v239_v42 = vperm.slane %v233_v38, %v4310_v7  ;;  %v251_v43 = vperm.slane %v245_v39, %v4310_v7  ;;  %v263_v44 = vperm.slane %v257_v40, %v4310_v7  ;;  %v269_v45 = vsel %vm232_vm0, %v268_v34, %v4347_v27 }
  0x23   : > { %7140 = vst [vmem:[#allocation11_spill] sm:$0xff] %v4347_v27  ;;  %v275_v46 = vperm.slane %v269_v45, %v4310_v7  ;;  %v345_v47 = vsel %vm232_vm0, %v344_v35, %v4316_v10  ;;  %v357_v48 = vsel %vm232_vm0, %v356_v36, %v4333_v21  ;;  %v369_v49 = vsel %vm232_vm0, %v368_v37, %v4327_v17 }
  0x24   : > { %7141 = vst [vmem:[#allocation12_spill] sm:$0xff] %v4349_v28  ;;  %v282_v50 = vrot.slane %v239_v42, 4  ;;  %v306_v51 = vrot.slane %v263_v44, 4  ;;  %v351_v52 = vperm.slane %v345_v47, %v4310_v7  ;;  %v363_v53 = vperm.slane %v357_v48, %v4310_v7 }
  0x25   : > { %7142 = vst [vmem:[#allocation13_spill] sm:$0xff] %v4351_v29  ;;  %v375_v54 = vperm.slane %v369_v49, %v4310_v7  ;;  %v381_v55 = vsel %vm232_vm0, %v380_v41, %v4349_v28  ;;  %v280_v56 = vrot.slane %v251_v43, 4  ;;  %v304_v57 = vrot.slane %v275_v46, 4 }
  0x26   : > { %7143 = vst [vmem:[#allocation14_spill] sm:$0xff] %v4355_v30  ;;  %v283_v58 = vsel %vm232_vm0, %v251_v43, %v282_v50  ;;  %v307_v59 = vsel %vm232_vm0, %v275_v46, %v306_v51  ;;  %v387_v60 = vperm.slane %v381_v55, %v4310_v7  ;;  %v394_v61 = vrot.slane %v351_v52, 4 }
  0x27   : > { %v4392_v62 = vperm.slane %v283_v58, %v4312_v8  ;;  %v4395_v63 = vperm.slane %v307_v59, %v4312_v8  ;;  %v418_v0 = vrot.slane %v375_v54, 4  ;;  %v281_v1 = vsel %vm232_vm0, %v280_v56, %v239_v42 }
  0x28   : > { %v395_v2 = vsel %vm232_vm0, %v363_v53, %v394_v61  ;;  %v4400_v3 = vperm.slane %v281_v1, %v4312_v8  ;;  %v305_v4 = vsel %vm232_vm0, %v304_v57, %v263_v44  ;;  %v392_v5 = vrot.slane %v363_v53, 4 }
  0x29   : > { %v334_v6 = vrot.slane %v4392_v62, 4  ;;  %v403_v13 = vperm.slane %v395_v2, %v4312_v8  ;;  %v419_v14 = vsel %vm232_vm0, %v387_v60, %v418_v0  ;;  %v4407_v15 = vperm.slane %v305_v4, %v4312_v8 }
  0x2a   : > { %v427_v18 = vperm.slane %v419_v14, %v4312_v8  ;;  %v330_v19 = vrot.slane %v4400_v3, 4  ;;  %v393_v31 = vsel %vm232_vm0, %v392_v5, %v351_v52  ;;  %v416_v32 = vrot.slane %v387_v60, 4 }
  0x2b   : > { %v335_v33 = vsel %vm232_vm0, %v4395_v63, %v334_v6  ;;  %v446_v34 = vrot.slane %v403_v13, 4  ;;  %v4415_v35 = vperm.slane %v393_v31, %v4312_v8  ;;  %v4422_v38 = vpack.i.bf16 %v4333_v21, %v4331_v20 }
  0x2c   : > { %v331_v36 = vsel %vm232_vm0, %v4407_v15, %v330_v19  ;;  %v417_v37 = vsel %vm232_vm0, %v416_v32, %v375_v54  ;;  %v234_v39 = vrot.slane %v4314_v9, 4  ;;  %v246_v43 = vrot.slane %v4331_v20, 4 }
  0x2d   : > { %v447_v40 = vsel %vm232_vm0, %v427_v18, %v446_v34  ;;  %v4427_v41 = vperm.slane %v417_v37, %v4312_v8  ;;  %v442_v42 = vrot.slane %v4415_v35, 4  ;;  %3603 = vrot.lane.b32.xlu2 %v4422_v38, %s4218_s29  ;;  %v258_v46 = vrot.slane %v4325_v16, 4 }
  0x2e   : > { %v3617_v44 = vpack.i.bf16 %v447_v40, %v335_v33  ;;  %v235_v45 = vsel %vm232_vm0, %v4318_v11, %v234_v39  ;;  %v270_v47 = vrot.slane %v4347_v27, 4  ;;  %v247_v50 = vsel %vm232_vm0, %v4343_v25, %v246_v43 }
  0x2f   : > { %v443_v48 = vsel %vm232_vm0, %v4427_v41, %v442_v42  ;;  %v243_v49 = vperm.slane %v235_v45, %v4310_v7  ;;  %v255_v52 = vperm.slane %v247_v50, %v4310_v7  ;;  %v259_v53 = vsel %vm232_vm0, %v4339_v23, %v258_v46 }
  0x30   : > { %3618 = vrot.lane.b32.xlu1 %v3617_v44, %s4219_s30  ;;  %v3607_v51 = vpack.i.bf16 %v443_v48, %v331_v36  ;;  %v271_v54 = vsel %vm232_vm0, %v4351_v29, %v270_v47  ;;  %v267_v55 = vperm.slane %v259_v53, %v4310_v7  ;;  %v346_v57 = vrot.slane %v4316_v10, 4 }
  0x31   : > { %v279_v56 = vperm.slane %v271_v54, %v4310_v7  ;;  %v358_v58 = vrot.slane %v4333_v21, 4  ;;  %v292_v59 = vrot.slane %v255_v52, 4  ;;  %v370_v60 = vrot.slane %v4327_v17, 4 }
  0x32   : > { %3608 = vrot.lane.b32.xlu0 %v3607_v51, %s4220_s4  ;;  %v382_v61 = vrot.slane %v4349_v28, 4  ;;  %v332_v0 = vrot.slane %v4395_v63, 4  ;;  %v347_v2 = vsel %vm232_vm0, %v4320_v12, %v346_v57  ;;  %v444_v5 = vrot.slane %v427_v18, 4 }
  0x33   : > { %v316_v1 = vrot.slane %v279_v56, 4  ;;  %v359_v4 = vsel %vm232_vm0, %v4345_v26, %v358_v58  ;;  %v293_v6 = vsel %vm232_vm0, %v292_v59, %v243_v49  ;;  %v355_v14 = vperm.slane %v347_v2, %v4310_v7 }
  0x34   : > { %v367_v19 = vperm.slane %v359_v4, %v4310_v7  ;;  %v371_v31 = vsel %vm232_vm0, %v4341_v24, %v370_v60  ;;  %v299_v32 = vperm.slane %v293_v6, %v4312_v8  ;;  %v383_v34 = vsel %vm232_vm0, %v4355_v30, %v382_v61 }
  0x35   : > { %v317_v63 = vsel %vm232_vm0, %v316_v1, %v267_v55  ;;  %v379_v33 = vperm.slane %v371_v31, %v4310_v7  ;;  %v391_v36 = vperm.slane %v383_v34, %v4310_v7  ;;  %v333_v39 = vsel %vm232_vm0, %v332_v0, %v4392_v62  ;;  %v4498_v34 = vld [vmem:[%s4305_s28 + $0x14] sm:$0x1] }
  0x36   : > { %v323_v18 = vperm.slane %v317_v63, %v4312_v8  ;;  %v404_v37 = vrot.slane %v367_v19, 4  ;;  %v445_v40 = vsel %vm232_vm0, %v444_v5, %v403_v13  ;;  %v338_v42 = vrot.slane %v299_v32, 4  ;;  %7145 = vst [vmem:[#allocation16_spill] sm:$0xff] %v4498_v34 }
  0x37   : > { %v294_v43 = vrot.slane %v243_v49, 4  ;;  %v428_v46 = vrot.slane %v391_v36, 4  ;;  %v3612_v47 = vpack.i.bf16 %v445_v40, %v333_v39  ;;  %v318_v51 = vrot.slane %v267_v55, 4  ;;  %v4507_v39 = vld [vmem:[%s4305_s28 + $0x20] sm:$0x1] }
  0x38   : > { %v336_v44 = vrot.slane %v323_v18, 4  ;;  %v405_v45 = vsel %vm232_vm0, %v404_v37, %v355_v14  ;;  %v339_v62 = vsel %vm232_vm0, %v323_v18, %v338_v42  ;;  %v406_v49 = vrot.slane %v355_v14, 4  ;;  %7146 = vst [vmem:[#allocation17_spill] sm:$0xff] %v4507_v39  ;;  %v4510_v40 = vld [vmem:[%s4305_s28 + $0x2c] sm:$0x1] }
  0x39   : > { %v411_v48 = vperm.slane %v405_v45, %v4312_v8  ;;  %v295_v50 = vsel %vm232_vm0, %v255_v52, %v294_v43  ;;  %v429_v53 = vsel %vm232_vm0, %v428_v46, %v379_v33  ;;  %v319_v58 = vsel %vm232_vm0, %v279_v56, %v318_v51  ;;  %7147 = vst [vmem:[#allocation18_spill] sm:$0xff] %v4510_v40  ;;  %v4523_v46 = vld [vmem:[%s4305_s28 + $0x38] sm:$0x1] }
  0x3a   : > { %3613 = vrot.lane.b32.xlu0 %v3612_v47, %s4221_s5  ;;  %v303_v13 = vperm.slane %v295_v50, %v4312_v8  ;;  %v435_v54 = vperm.slane %v429_v53, %v4312_v8  ;;  %v430_v59 = vrot.slane %v379_v33, 4  ;;  %v337_v60 = vsel %vm232_vm0, %v336_v44, %v299_v32  ;;  %v4495_v33 = vld [vmem:[%s4305_s28 + $0x8] sm:$0x1]  ;;  %7148 = vst [vmem:[#allocation19_spill] sm:$0xff] %v4523_v46  ;;  %v4526_v47 = vld [vmem:[%s4305_s28 + $0x44] sm:$0x1] }
  0x3b   : > { %v450_v57 = vrot.slane %v411_v48, 4  ;;  %v327_v52 = vperm.slane %v319_v58, %v4312_v8  ;;  %v407_v61 = vsel %vm232_vm0, %v367_v19, %v406_v49  ;;  %7144 = vst [vmem:[#allocation15_spill] sm:$0xff] %v4495_v33  ;;  %v4502_v18 = vpack.i.bf16 %v4345_v26, %v4343_v25  ;;  %v4549_v58 = vld [vmem:[%s4305_s28 + $0x5c] sm:$0x1] }
  0x3c   : > { %v342_v55 = vrot.slane %v303_v13, 4  ;;  %v448_v0 = vrot.slane %v435_v54, 4  ;;  %v415_v2 = vperm.slane %v407_v61, %v4312_v8  ;;  %v431_v4 = vsel %vm232_vm0, %v391_v36, %v430_v59  ;;  %7149 = vst [vmem:[#allocation20_spill] sm:$0xff] %v4526_v47 }
  0x3d   : > { %v451_v1 = vsel %vm232_vm0, %v435_v54, %v450_v57  ;;  %v439_v56 = vperm.slane %v431_v4, %v4312_v8  ;;  %v340_v6 = vrot.slane %v327_v52, 4  ;;  %v4516_v44 = vpack.i.bf16 %v4341_v24, %v4339_v23  ;;  %v4546_v57 = vld [vmem:[%s4305_s28 + $0x50] sm:$0x1]  ;;  %7151 = vst [vmem:[#allocation22_spill] sm:$0xff] %v4549_v58 }
  0x3e   : > { %v3627_v5 = vpack.i.bf16 %v451_v1, %v339_v62  ;;  %v449_v14 = vsel %vm232_vm0, %v448_v0, %v411_v48  ;;  %v343_v31 = vsel %vm232_vm0, %v327_v52, %v342_v55  ;;  %v454_v32 = vrot.slane %v415_v2, 4  ;;  %7150 = vst [vmem:[#allocation21_spill] sm:$0xff] %v4546_v57 }
  0x3f   : > { %v3622_v19 = vpack.i.bf16 %v449_v14, %v337_v60  ;;  %v452_v63 = vrot.slane %v439_v56, 4  ;;  %v341_v37 = vsel %vm232_vm0, %v340_v6, %v303_v13  ;;  %v4520_v45 = vpack.i.bf16 %v4320_v12, %v4318_v11 }
  0x40   : > { %3628 = vrot.lane.b32.xlu2 %v3627_v5, %s4222_s6  ;;  %v455_v36 = vsel %vm232_vm0, %v439_v56, %v454_v32  ;;  %v4530_v48 = vpack.i.bf16 %v4327_v17, %v4325_v16  ;;  %v4534_v50 = vpack.i.bf16 %v4349_v28, %v4347_v27  ;;  %v7035_v51 = vunpack.c.l.bf16 %v4495_v33 }
  0x41   : > { %3623 = vrot.lane.b32.xlu1 %v3622_v19, %s4223_s7  ;;  %v3637_v42 = vpack.i.bf16 %v455_v36, %v343_v31  ;;  %v453_v43 = vsel %vm232_vm0, %v452_v63, %v415_v2  ;;  %v7038_v53 = vunpack.c.l.bf16 %v4498_v34  ;;  %v4541_v13 = vpack.i.bf16 %v4355_v30, %v4351_v29 }
  0x42   : > { %v3632_v62 = vpack.i.bf16 %v453_v43, %v341_v37  ;;  %v7037_v49 = vunpack.c.l.bf16 %v4507_v39  ;;  %v7039_v54 = vunpack.c.l.bf16 %v4510_v40  ;;  %v7036_v59 = vunpack.c.l.bf16 %v4523_v46 }
  0x43   : > { %3638 = vrot.lane.b32.xlu0 %v3637_v42, %s4224_s8  ;;  %v7041_v60 = vunpack.c.l.bf16 %v4526_v47  ;;  %v1242_v52 = vrot.slane %v4314_v9, 1  ;;  %v1243_v55 = vrot.slane %v4316_v10, 1  ;;  %v1245_v61 = vrot.slane %v7035_v51, 1 }
  0x44   : > { %v1247_v0 = vrot.slane %v4331_v20, 1  ;;  %v1248_v1 = vrot.slane %v4333_v21, 1  ;;  %v1250_v2 = vrot.slane %v7038_v53, 1  ;;  %v1252_v4 = vrot.slane %v4318_v11, 1 }
  0x45   : > { %v1253_v5 = vrot.slane %v4320_v12, 1  ;;  %v1255_v56 = vrot.slane %v7037_v49, 1  ;;  %v7040_v6 = vunpack.c.l.bf16 %v4546_v57  ;;  %v7042_v14 = vunpack.c.l.bf16 %v4549_v58 }
  0x46   : > { %v4569_v31 = vsel %vm1241_vm1, %v1242_v52, %v1243_v55  ;;  %v4572_v32 = vsel %vm1241_vm1, %v1243_v55, %v1245_v61  ;;  %v4575_v19 = vsel %vm1241_vm1, %v1247_v0, %v1248_v1  ;;  %v4578_v63 = vsel %vm1241_vm1, %v1248_v1, %v1250_v2 }
  0x47   : > { %v4581_v36 = vsel %vm1241_vm1, %v1252_v4, %v1253_v5  ;;  %v1257_v37 = vrot.slane %v4343_v25, 1  ;;  %v4587_v42 = vsel %vm1241_vm1, %v1253_v5, %v1255_v56  ;;  %v1258_v43 = vrot.slane %v4345_v26, 1 }
  0x48   : > { %3633 = vrot.lane.b32.xlu2 %v3632_v62, %s4225_s9  ;;  %v1260_v62 = vrot.slane %v7039_v54, 1  ;;  %v1262_v52 = vrot.slane %v4325_v16, 1  ;;  %v1263_v55 = vrot.slane %v4327_v17, 1  ;;  %v1265_v61 = vrot.slane %v7036_v59, 1 }
  0x49   : > { %3648 = vrot.lane.b32.xlu1 %v4502_v18, %s4218_s29  ;;  %v1267_v0 = vrot.slane %v4347_v27, 1  ;;  %v1268_v1 = vrot.slane %v4349_v28, 1  ;;  %v4601_v2 = vsel %vm1241_vm1, %v1257_v37, %v1258_v43  ;;  %v1270_v5 = vrot.slane %v7041_v60, 1 }
  0x4a   : > { %v4604_v4 = vsel %vm1241_vm1, %v1258_v43, %v1260_v62  ;;  %v1272_v56 = vrot.slane %v4339_v23, 1  ;;  %v4610_v51 = vsel %vm1241_vm1, %v1262_v52, %v1263_v55  ;;  %v4613_v59 = vsel %vm1241_vm1, %v1263_v55, %v1265_v61 }
  0x4b   : > { %3643 = vrot.lane.b32.xlu0 %v4520_v45, %s4218_s29  ;;  %v4616_v49 = vsel %vm1241_vm1, %v1267_v0, %v1268_v1  ;;  %v1273_v37 = vrot.slane %v4341_v24, 1  ;;  %v4620_v53 = vsel %vm1241_vm1, %v1268_v1, %v1270_v5  ;;  %v1275_v43 = vrot.slane %v7040_v6, 1 }
  0x4c   : > { %v1277_v62 = vrot.slane %v4351_v29, 1  ;;  %v1278_v54 = vrot.slane %v4355_v30, 1  ;;  %v1280_v55 = vrot.slane %v7042_v14, 1  ;;  %v1298_v61 = vrot.slane %v4581_v36, 4 }
  0x4d   : > { %v4627_v52 = vsel %vm1241_vm1, %v1272_v56, %v1273_v37  ;;  %v1310_v0 = vrot.slane %v4601_v2, 4  ;;  %v4636_v1 = vsel %vm1241_vm1, %v1273_v37, %v1275_v43  ;;  %v1410_v56 = vrot.slane %v4587_v42, 4 }
  0x4e   : > { %7152 = vst [vmem:[#allocation23_spill] sm:$0xff] %v4627_v52  ;;  %v4639_v5 = vsel %vm1241_vm1, %v1277_v62, %v1278_v54  ;;  %v1322_v6 = vrot.slane %v4627_v52, 4  ;;  %v4644_v60 = vsel %vm1241_vm1, %v1278_v54, %v1280_v55  ;;  %v1299_v14 = vsel %vm232_vm0, %v1298_v61, %v4569_v31 }
  0x4f   : > { %7153 = vst [vmem:[#allocation24_spill] sm:$0xff] %v4636_v1  ;;  %v1311_v33 = vsel %vm232_vm0, %v1310_v0, %v4575_v19  ;;  %v1334_v27 = vrot.slane %v4639_v5, 4  ;;  %v1305_v37 = vperm.slane %v1299_v14, %v4310_v7  ;;  %v1411_v54 = vsel %vm232_vm0, %v1410_v56, %v4572_v32 }
  0x50   : > { %3653 = vrot.lane.b32.xlu2 %v4530_v48, %s4218_s29  ;;  %v1317_v43 = vperm.slane %v1311_v33, %v4310_v7  ;;  %v1323_v62 = vsel %vm232_vm0, %v1322_v6, %v4610_v51  ;;  %v1417_v0 = vperm.slane %v1411_v54, %v4310_v7  ;;  %v1422_v46 = vrot.slane %v4604_v4, 4 }
  0x51   : > { %3663 = vrot.lane.b32.xlu1 %v4516_v44, %s4218_s29  ;;  %v1329_v55 = vperm.slane %v1323_v62, %v4310_v7  ;;  %v1335_v61 = vsel %vm232_vm0, %v1334_v27, %v4616_v49  ;;  %v1434_v6 = vrot.slane %v4636_v1, 4  ;;  %v1446_v57 = vrot.slane %v4644_v60, 4 }
  0x52   : > { %v1341_v33 = vperm.slane %v1335_v61, %v4310_v7  ;;  %v1346_v14 = vrot.slane %v1317_v43, 4  ;;  %v1423_v56 = vsel %vm232_vm0, %v1422_v46, %v4578_v63  ;;  %v1348_v62 = vrot.slane %v1305_v37, 4 }
  0x53   : > { %3658 = vrot.lane.b32.xlu0 %v4534_v50, %s4218_s29  ;;  %v1460_v29 = vrot.slane %v1417_v0, 4  ;;  %v1429_v27 = vperm.slane %v1423_v56, %v4310_v7  ;;  %v1435_v54 = vsel %vm232_vm0, %v1434_v6, %v4613_v59  ;;  %v1372_v39 = vrot.slane %v1329_v55, 4 }
  0x54   : > { %v1347_v11 = vsel %vm232_vm0, %v1346_v14, %v1305_v37  ;;  %v1447_v61 = vsel %vm232_vm0, %v1446_v57, %v4620_v53  ;;  %v1349_v12 = vsel %vm232_vm0, %v1317_v43, %v1348_v62  ;;  %v1370_v34 = vrot.slane %v1341_v33, 4 }
  0x55   : > { %v1441_v46 = vperm.slane %v1435_v54, %v4310_v7  ;;  %v1453_v58 = vperm.slane %v1447_v61, %v4310_v7  ;;  %v1458_v56 = vrot.slane %v1429_v27, 4  ;;  %v4683_v17 = vperm.slane %v1349_v12, %v4312_v8 }
  0x56   : > { %v1461_v6 = vsel %vm232_vm0, %v1429_v27, %v1460_v29  ;;  %v1373_v57 = vsel %vm232_vm0, %v1341_v33, %v1372_v39  ;;  %v4690_v37 = vperm.slane %v1347_v11, %v4312_v8  ;;  %v1371_v12 = vsel %vm232_vm0, %v1370_v34, %v1329_v55 }
  0x57   : > { %v4693_v43 = vperm.slane %v1461_v6, %v4312_v8  ;;  %v1459_v14 = vsel %vm232_vm0, %v1458_v56, %v1417_v0  ;;  %v1482_v29 = vrot.slane %v1453_v58, 4  ;;  %v1484_v62 = vrot.slane %v1441_v46, 4 }
  0x58   : > { %3668 = vrot.lane.b32.xlu2 %v4541_v13, %s4218_s29  ;;  %v4700_v27 = vperm.slane %v1373_v57, %v4312_v8  ;;  %v1300_v39 = vrot.slane %v4569_v31, 4  ;;  %v1312_v54 = vrot.slane %v4575_v19, 4  ;;  %v1336_v34 = vrot.slane %v4616_v49, 4 }
  0x59   : > { %3673 = vrot.lane.b32.xlu1 %v4337_v22, %s4226_s10  ;;  %v1400_v22 = vrot.slane %v4683_v17, 4  ;;  %v1512_v11 = vrot.slane %v4693_v43, 4  ;;  %v1485_v33 = vsel %vm232_vm0, %v1453_v58, %v1484_v62  ;;  %v4710_v55 = vperm.slane %v1371_v12, %v4312_v8 }
  0x5a   : > { %v1396_v0 = vrot.slane %v4690_v37, 4  ;;  %v4714_v61 = vperm.slane %v1485_v33, %v4312_v8  ;;  %v1301_v56 = vsel %vm232_vm0, %v4581_v36, %v1300_v39  ;;  %v4721_v58 = vperm.slane %v1459_v14, %v4312_v8 }
  0x5b   : > { %3683 = vrot.lane.b32.xlu0 %v4520_v45, %s4226_s10  ;;  %v1324_v45 = vrot.slane %v4610_v51, 4  ;;  %v1309_v6 = vperm.slane %v1301_v56, %v4310_v7  ;;  %v1313_v57 = vsel %vm232_vm0, %v4601_v2, %v1312_v54  ;;  %v1483_v62 = vsel %vm232_vm0, %v1482_v29, %v1441_v46 }
  0x5c   : > { %v1401_v33 = vsel %vm232_vm0, %v4700_v27, %v1400_v22  ;;  %v1513_v14 = vsel %vm232_vm0, %v4714_v61, %v1512_v11  ;;  %v1424_v46 = vrot.slane %v4578_v63, 4  ;;  %v1321_v29 = vperm.slane %v1313_v57, %v4310_v7 }
  0x5d   : > { %v1325_v12 = vsel %vm232_vm0, %v4627_v52, %v1324_v45  ;;  %v1412_v45 = vrot.slane %v4572_v32, 4  ;;  %v1436_v22 = vrot.slane %v4613_v59, 4  ;;  %v1448_v56 = vrot.slane %v4620_v53, 4 }
  0x5e   : > { %v1333_v39 = vperm.slane %v1325_v12, %v4310_v7  ;;  %v1360_v12 = vrot.slane %v1309_v6, 4  ;;  %v4751_v30 = vperm.slane %v1483_v62, %v4312_v8  ;;  %v3722_v16 = vpack.i.bf16 %v1513_v14, %v1401_v33 }
  0x5f   : > { %v1413_v11 = vsel %vm232_vm0, %v4587_v42, %v1412_v45  ;;  %v1437_v9 = vsel %vm232_vm0, %v4636_v1, %v1436_v22  ;;  %v1449_v45 = vsel %vm232_vm0, %v4644_v60, %v1448_v56 }
  0x60   : > { %3678 = vrot.lane.b32.xlu2 %v4422_v38, %s4226_s10  ;;  %v1337_v38 = vsel %vm232_vm0, %v4639_v5, %v1336_v34  ;;  %v1425_v34 = vsel %vm232_vm0, %v4604_v4, %v1424_v46  ;;  %v1421_v57 = vperm.slane %v1413_v11, %v4310_v7  ;;  %v1445_v40 = vperm.slane %v1437_v9, %v4310_v7 }
  0x61   : > { %3688 = vrot.lane.b32.xlu1 %v4502_v18, %s4226_s10  ;;  %v1345_v54 = vperm.slane %v1337_v38, %v4310_v7  ;;  %v1384_v38 = vrot.slane %v1333_v39, 4  ;;  %v1433_v10 = vperm.slane %v1425_v34, %v4310_v7  ;;  %v1358_v46 = vrot.slane %v1321_v29, 4 }
  0x62   : > { %v1457_v62 = vperm.slane %v1449_v45, %v4310_v7  ;;  %v1361_v11 = vsel %vm232_vm0, %v1321_v29, %v1360_v12  ;;  %v1472_v28 = vrot.slane %v1421_v57, 4  ;;  %v1496_v33 = vrot.slane %v1445_v40, 4 }
  0x63   : > { %3698 = vrot.lane.b32.xlu0 %v4534_v50, %s4226_s10  ;;  %v1382_v18 = vrot.slane %v1345_v54, 4  ;;  %v1508_v50 = vrot.slane %v4721_v58, 4  ;;  %v1470_v34 = vrot.slane %v1433_v10, 4  ;;  %v1385_v22 = vsel %vm232_vm0, %v1345_v54, %v1384_v38 }
  0x64   : > { %v1397_v9 = vsel %vm232_vm0, %v4710_v55, %v1396_v0  ;;  %v1494_v14 = vrot.slane %v1457_v62, 4  ;;  %v1393_v56 = vperm.slane %v1385_v22, %v4312_v8  ;;  %v1369_v29 = vperm.slane %v1361_v11, %v4312_v8 }
  0x65   : > { %v1383_v47 = vsel %vm232_vm0, %v1382_v18, %v1333_v39  ;;  %v1509_v39 = vsel %vm232_vm0, %v4751_v30, %v1508_v50  ;;  %v1497_v54 = vsel %vm232_vm0, %v1457_v62, %v1496_v33  ;;  %v1359_v12 = vsel %vm232_vm0, %v1358_v46, %v1309_v6 }
  0x66   : > { %v1389_v18 = vperm.slane %v1383_v47, %v4312_v8  ;;  %v1495_v0 = vsel %vm232_vm0, %v1494_v14, %v1445_v40  ;;  %v1406_v38 = vrot.slane %v1393_v56, 4  ;;  %v1505_v11 = vperm.slane %v1497_v54, %v4312_v8 }
  0x67   : > { %v1501_v45 = vperm.slane %v1495_v0, %v4312_v8  ;;  %v3712_v6 = vpack.i.bf16 %v1509_v39, %v1397_v9  ;;  %v1365_v40 = vperm.slane %v1359_v12, %v4312_v8  ;;  %v1408_v54 = vrot.slane %v1369_v29, 4 }
  0x68   : > { %3693 = vrot.lane.b32.xlu2 %v4530_v48, %s4226_s10  ;;  %v1473_v48 = vsel %vm232_vm0, %v1433_v10, %v1472_v28  ;;  %v1398_v10 = vrot.slane %v4700_v27, 4  ;;  %v1510_v28 = vrot.slane %v4714_v61, 4  ;;  %v1407_v47 = vsel %vm232_vm0, %v1406_v38, %v1369_v29 }
  0x69   : > { %3703 = vrot.lane.b32.xlu1 %v4516_v44, %s4226_s10  ;;  %v1471_v44 = vsel %vm232_vm0, %v1470_v34, %v1421_v57  ;;  %v1481_v50 = vperm.slane %v1473_v48, %v4312_v8  ;;  %v1518_v46 = vrot.slane %v1505_v11, 4  ;;  %v1402_v62 = vrot.slane %v1389_v18, 4 }
  0x6a   : > { %v1514_v57 = vrot.slane %v1501_v45, 4  ;;  %v1399_v27 = vsel %vm232_vm0, %v1398_v10, %v4683_v17  ;;  %v1511_v61 = vsel %vm232_vm0, %v1510_v28, %v4693_v43  ;;  %v1404_v39 = vrot.slane %v1365_v40, 4 }
  0x6b   : > { %3723 = vrot.lane.b32.xlu0 %v3722_v16, %s4219_s30  ;;  %v1477_v16 = vperm.slane %v1471_v44, %v4312_v8  ;;  %v1519_v34 = vsel %vm232_vm0, %v1518_v46, %v1481_v50  ;;  %v1403_v33 = vsel %vm232_vm0, %v1402_v62, %v1365_v40  ;;  %v3717_v14 = vpack.i.bf16 %v1511_v61, %v1399_v27 }
  0x6c   : > { %v3737_v22 = vpack.i.bf16 %v1519_v34, %v1407_v47  ;;  %v1520_v12 = vrot.slane %v1481_v50, 4  ;;  %v4804_v17 = vpack.i.bf16 %v4578_v63, %v4575_v19  ;;  %v1405_v43 = vsel %vm232_vm0, %v1389_v18, %v1404_v39 }
  0x6d   : > { %v1515_v9 = vsel %vm232_vm0, %v1514_v57, %v1477_v16  ;;  %v1409_v38 = vsel %vm232_vm0, %v1393_v56, %v1408_v54  ;;  %v4816_v19 = vpack.i.bf16 %v4613_v59, %v4610_v51  ;;  %v4823_v63 = vpack.i.bf16 %v4572_v32, %v4569_v31 }
  0x6e   : > { %v3727_v48 = vpack.i.bf16 %v1515_v9, %v1403_v33  ;;  %7154 = vst [vmem:[#allocation25_spill] sm:$0xff] %v4804_v17  ;;  %v1521_v44 = vsel %vm232_vm0, %v1505_v11, %v1520_v12  ;;  %v4827_v56 = vpack.i.bf16 %v4587_v42, %v4581_v36  ;;  %v4833_v51 = vpack.i.bf16 %v4644_v60, %v4639_v5 }
  0x6f   : > { %v3742_v50 = vpack.i.bf16 %v1521_v44, %v1409_v38  ;;  %7155 = vst [vmem:[#allocation26_spill] sm:$0xff] %v4816_v19  ;;  %v4841_v59 = vpack.i.bf16 %v4604_v4, %v4601_v2  ;;  %v4845_v31 = vpack.i.bf16 %v4620_v53, %v4616_v49  ;;  %v3777_v60 = vpack.i.bf16 %v4636_v1, %v4627_v52 }
  0x70   : > { %3708 = vrot.lane.b32.xlu2 %v4541_v13, %s4226_s10  ;;  %v1516_v13 = vrot.slane %v1477_v16, 4  ;;  %7156 = vst [vmem:[#allocation27_spill] sm:$0xff] %v4823_v63  ;;  %v328_v42 = vrot.slane %v4407_v15, 4  ;;  %v440_v53 = vrot.slane %v4427_v41, 4 }
  0x71   : > { %3713 = vrot.lane.b32.xlu1 %v3712_v6, %s4220_s4  ;;  %7157 = vst [vmem:[#allocation28_spill] sm:$0xff] %v4827_v56 }
  0x72   : > { %v1517_v0 = vsel %vm232_vm0, %v1501_v45, %v1516_v13  ;;  %7158 = vst [vmem:[#allocation29_spill] sm:$0xff] %v4833_v51  ;;  %v441_v4 = vsel %vm232_vm0, %v440_v53, %v4415_v35  ;;  %v329_v18 = vsel %vm232_vm0, %v328_v42, %v4400_v3 }
  0x73   : > { %3738 = vrot.lane.b32.xlu0 %v3737_v22, %s4225_s9  ;;  %v3732_v29 = vpack.i.bf16 %v1517_v0, %v1405_v43  ;;  %7159 = vst [vmem:[#allocation30_spill] sm:$0xff] %v4841_v59 }
  0x74   : > { %7160 = vst [vmem:[#allocation31_spill] sm:$0xff] %v4845_v31 }
  0x78   : > { %3718 = vrot.lane.b32.xlu2 %v3717_v14, %s4221_s5 }
  0x79   : > { %3728 = vrot.lane.b32.xlu1 %v3727_v48, %s4223_s7 }
  0x7b   : > { %3753 = vrot.lane.b32.xlu0 %v4804_v17, %s4218_s29 }
  0x80   : > { %3733 = vrot.lane.b32.xlu2 %v3732_v29, %s4222_s6 }
  0x81   : > { %3743 = vrot.lane.b32.xlu1 %v3742_v50, %s4224_s8 }
  0x83   : > { %3768 = vrot.lane.b32.xlu0 %v4816_v19, %s4218_s29 }
  0x87   : > { %v4849_v32 = vpop.permute.xlu2 %3603 }
  0x88   : > { %3748 = vrot.lane.b32.xlu2 %v4823_v63, %s4218_s29  ;;  %v3606_v61 = vunpack.i.h.bf16 %v4849_v32  ;;  %v3605_v9 = vunpack.i.l.bf16 %v4849_v32 }
  0x89   : > { %3758 = vrot.lane.b32.xlu1 %v4827_v56, %s4218_s29 }
  0x8a   : > { %v723_v50 = vrot.slane %v3606_v61, 4  ;;  %v611_v53 = vrot.slane %v3605_v9, 4 }
  0x8b   : > { %3783 = vrot.lane.b32.xlu0 %v4833_v51, %s4218_s29 }
  0x90   : > { %3763 = vrot.lane.b32.xlu2 %v4841_v59, %s4218_s29 }
  0x91   : > { %3773 = vrot.lane.b32.xlu1 %v4845_v31, %s4218_s29  ;;  %v4860_v49 = vpop.permute.xlu1 %3598 }
  0x92   : > { %v3601_v14 = vunpack.i.h.bf16 %v4860_v49  ;;  %v3600_v13 = vunpack.i.l.bf16 %v4860_v49 }
  0x98   : > { %3778 = vrot.lane.b32.xlu2 %v3777_v60, %s4218_s29 }
  0x9a   : > { %v4856_v36 = vpop.permute.xlu2 %3628 }
  0x9b   : > { %7161 = vst [vmem:[#allocation32_spill] sm:$0xff] %v4856_v36 }
  0xa2   : > { %v4862_v2 = vpop.permute.xlu2 %3633  ;;  %v3619_v28 = vpop.permute.xlu1 %3618 }
  0xa3   : > { %7162 = vst [vmem:[#allocation33_spill] sm:$0xff] %v4862_v2  ;;  %v3621_v35 = vunpack.i.h.bf16 %v3619_v28  ;;  %v3620_v40 = vunpack.i.l.bf16 %v3619_v28 }
  0xa4   : > { %v3609_v5 = vpop.permute.xlu0 %3608 }
  0xa5   : > { %v3611_v45 = vunpack.i.h.bf16 %v3609_v5  ;;  %v3610_v11 = vunpack.i.l.bf16 %v3609_v5  ;;  %v711_v5 = vrot.slane %v3601_v14, 4 }
  0xa7   : > { %v526_v10 = vsel %vm512_vm2, %v441_v4, %v3611_v45  ;;  %v513_v15 = vsel %vm512_vm2, %v329_v18, %v3610_v11  ;;  %v599_v18 = vrot.slane %v3600_v13, 4 }
  0xaa   : > { %v4870_v41 = vpop.permute.xlu2 %3653 }
  0xab   : > { %v3656_v48 = vunpack.i.h.bf16 %v4870_v41  ;;  %v3655_v43 = vunpack.i.l.bf16 %v4870_v41 }
  0xac   : > { %v3614_v6 = vpop.permute.xlu0 %3613 }
  0xad   : > { %v3616_v47 = vunpack.i.h.bf16 %v3614_v6  ;;  %v3615_v46 = vunpack.i.l.bf16 %v3614_v6  ;;  %v735_v45 = vrot.slane %v3656_v48, 4 }
  0xaf   : > { %v515_v62 = vsel %vm514_vm3, %v513_v15, %v3615_v46  ;;  %v527_v3 = vsel %vm514_vm3, %v526_v10, %v3616_v47  ;;  %v623_v10 = vrot.slane %v3655_v43, 4 }
  0xb0   : > { %v4875_v16 = vsel %vm516_vm4, %v515_v62, %v3620_v40  ;;  %v4878_v57 = vsel %vm516_vm4, %v527_v3, %v3621_v35 }
  0xb1   : > { %7163 = vst [vmem:[#allocation34_spill] sm:$0xff] %v4875_v16 }
  0xb2   : > { %7164 = vst [vmem:[#allocation35_spill] sm:$0xff] %v4878_v57  ;;  %v4880_v34 = vpop.permute.xlu2 %3668 }
  0xb3   : > { %v4882_v22 = vpop.permute.xlu1 %3623  ;;  %v7066_v0 = vunpack.i.h.bf16 %v4880_v34  ;;  %v7065_v38 = vunpack.i.l.bf16 %v4880_v34 }
  0xb4   : > { %7165 = vst [vmem:[#allocation36_spill] sm:$0xff] %v4882_v22  ;;  %v7170_v22 = vunpack.i.l.bf16 %v4880_v34 }
  0xb5   : > { %v4884_v27 = vpop.permute.xlu0 %3638  ;;  %v4901_v15 = vrot.slane %v7066_v0, 4  ;;  %v633_v28 = vrot.slane %v7065_v38, 4 }
  0xb6   : > { %7166 = vst [vmem:[#allocation37_spill] sm:$0xff] %v4884_v27 }
  0xba   : > { %v4887_v33 = vpop.permute.xlu2 %3678 }
  0xbb   : > { %v3649_v39 = vpop.permute.xlu1 %3648  ;;  %v7064_v62 = vunpack.i.h.bf16 %v4887_v33  ;;  %v7063_v3 = vunpack.i.l.bf16 %v4887_v33 }
  0xbc   : > { %v3651_v54 = vunpack.i.h.bf16 %v3649_v39  ;;  %v3650_v12 = vunpack.i.l.bf16 %v3649_v39 }
  0xbd   : > { %v3644_v44 = vpop.permute.xlu0 %3643 }
  0xbe   : > { %v721_v32 = vrot.slane %v3651_v54, 4  ;;  %v609_v60 = vrot.slane %v3650_v12, 4  ;;  %v3646_v49 = vunpack.i.h.bf16 %v3644_v44  ;;  %v3645_v4 = vunpack.i.l.bf16 %v3644_v44 }
  0xbf   : > { %v724_v11 = vsel %vm232_vm0, %v3651_v54, %v723_v50  ;;  %v612_v41 = vsel %vm232_vm0, %v3650_v12, %v611_v53 }
  0xc0   : > { %v722_v6 = vsel %vm232_vm0, %v721_v32, %v3606_v61  ;;  %v610_v47 = vsel %vm232_vm0, %v609_v60, %v3605_v9  ;;  %v709_v46 = vrot.slane %v3646_v49, 4  ;;  %v597_v35 = vrot.slane %v3645_v4, 4 }
  0xc1   : > { %v4909_v40 = vperm.slane %v724_v11, %v4310_v7  ;;  %v712_v54 = vsel %vm232_vm0, %v3646_v49, %v711_v5  ;;  %v4915_v44 = vperm.slane %v612_v41, %v4310_v7  ;;  %v4921_v32 = vperm.slane %v722_v6, %v4310_v7 }
  0xc2   : > { %v710_v61 = vsel %vm232_vm0, %v709_v46, %v3601_v14  ;;  %v4918_v9 = vpop.permute.xlu2 %3693  ;;  %v4924_v60 = vperm.slane %v610_v47, %v4310_v7  ;;  %v598_v53 = vsel %vm232_vm0, %v597_v35, %v3600_v13  ;;  %v600_v11 = vsel %vm232_vm0, %v3645_v4, %v599_v18 }
  0xc3   : > { %v3664_v39 = vpop.permute.xlu1 %3663  ;;  %v769_v14 = vrot.slane %v4909_v40, 4  ;;  %v4935_v6 = vrot.slane %v7064_v62, 4  ;;  %v4939_v47 = vrot.slane %v7063_v3, 4  ;;  %v4942_v13 = vperm.slane %v710_v61, %v4310_v7 }
  0xc4   : > { %v3666_v12 = vunpack.i.h.bf16 %v3664_v39  ;;  %v3665_v50 = vunpack.i.l.bf16 %v3664_v39  ;;  %v4930_v39 = vperm.slane %v712_v54, %v4310_v7  ;;  %v4948_v46 = vperm.slane %v598_v53, %v4310_v7 }
  0xc5   : > { %v3659_v49 = vpop.permute.xlu0 %3658  ;;  %v657_v54 = vrot.slane %v4915_v44, 4  ;;  %v4956_v29 = vperm.slane %v600_v11, %v4310_v7 }
  0xc6   : > { %v733_v5 = vrot.slane %v3666_v12, 4  ;;  %v736_v41 = vsel %vm232_vm0, %v3666_v12, %v735_v45  ;;  %v621_v42 = vrot.slane %v3665_v50, 4  ;;  %v624_v45 = vsel %vm232_vm0, %v3665_v50, %v623_v10 }
  0xc7   : > { %v4953_v12 = vperm.slane %v736_v41, %v4310_v7  ;;  %v4970_v53 = vperm.slane %v624_v45, %v4310_v7  ;;  %v759_v41 = vrot.slane %v4942_v13, 4  ;;  %v647_v35 = vrot.slane %v4948_v46, 4 }
  0xc8   : > { %v734_v4 = vsel %vm232_vm0, %v733_v5, %v3656_v48  ;;  %v622_v18 = vsel %vm232_vm0, %v621_v42, %v3655_v43  ;;  %v4961_v48 = vsel %vm232_vm0, %v769_v14, %v4930_v39  ;;  %v3661_v43 = vunpack.i.h.bf16 %v3659_v49 }
  0xc9   : > { %v3660_v42 = vunpack.i.l.bf16 %v3659_v49  ;;  %v4964_v10 = vperm.slane %v734_v4, %v4310_v7  ;;  %v4967_v50 = vperm.slane %v622_v18, %v4310_v7  ;;  %v4979_v4 = vsel %vm232_vm0, %v657_v54, %v4956_v29 }
  0xca   : > { %v747_v45 = vrot.slane %v3661_v43, 4  ;;  %v4984_v0 = vpop.permute.xlu2 %3708  ;;  %v7167_v18 = vunpack.i.h.bf16 %v4918_v9  ;;  %v7169_v54 = vunpack.i.l.bf16 %v4918_v9 }
  0xcb   : > { %v3674_v5 = vpop.permute.xlu1 %3673  ;;  %v634_v62 = vsel %vm232_vm0, %v633_v28, %v3660_v42  ;;  %v635_v38 = vrot.slane %v3660_v42, 4  ;;  %v783_v14 = vrot.slane %v4964_v10, 4  ;;  %v671_v49 = vrot.slane %v4967_v50, 4 }
  0xcc   : > { %v3676_v61 = vunpack.i.h.bf16 %v3674_v5  ;;  %v3675_v11 = vunpack.i.l.bf16 %v3674_v5  ;;  %v4992_v27 = vrot.slane %v7167_v18, 4  ;;  %v746_v28 = vsel %vm232_vm0, %v4901_v15, %v3661_v43 }
  0xcd   : > { %v3684_v51 = vpop.permute.xlu0 %3683  ;;  %v7168_v5 = vunpack.i.h.bf16 %v4880_v34  ;;  %v640_v2 = vperm.slane %v634_v62, %v4310_v7  ;;  %v5003_v1 = vrot.slane %v7169_v54, 4  ;;  %v636_v31 = vsel %vm232_vm0, %v7170_v22, %v635_v38 }
  0xce   : > { %v1053_v3 = vrot.slane %v3676_v61, 4  ;;  %v3686_v36 = vunpack.i.h.bf16 %v3684_v51  ;;  %v3685_v57 = vunpack.i.l.bf16 %v3684_v51  ;;  %v941_v18 = vrot.slane %v3675_v11, 4 }
  0xcf   : > { %v748_v16 = vsel %vm232_vm0, %v7168_v5, %v747_v45  ;;  %v648_v15 = vsel %vm232_vm0, %v4924_v60, %v647_v35  ;;  %v752_v43 = vperm.slane %v746_v28, %v4310_v7  ;;  %v7171_v45 = vunpack.i.h.bf16 %v4984_v0 }
  0xd0   : > { %v1051_v51 = vrot.slane %v3686_v36, 4  ;;  %v1054_v42 = vsel %vm232_vm0, %v3686_v36, %v1053_v3  ;;  %v5017_v54 = vperm.slane %v748_v16, %v4310_v7  ;;  %v939_v56 = vrot.slane %v3685_v57, 4 }
  0xd1   : > { %v5013_v5 = vrot.slane %v7171_v45, 4  ;;  %v5020_v22 = vperm.slane %v636_v31, %v4310_v7  ;;  %v942_v38 = vsel %vm232_vm0, %v3685_v57, %v941_v18  ;;  %v656_v35 = vperm.slane %v648_v15, %v4312_v8 }
  0xd2   : > { %v672_v28 = vsel %vm232_vm0, %v640_v2, %v671_v49  ;;  %v7172_v45 = vunpack.i.l.bf16 %v4984_v0  ;;  %v1052_v36 = vsel %vm232_vm0, %v1051_v51, %v3676_v61  ;;  %v5031_v16 = vperm.slane %v1054_v42, %v4310_v7  ;;  %v5046_v63 = vpop.permute.xlu2 %3718 }
  0xd3   : > { %v3689_v62 = vpop.permute.xlu1 %3688  ;;  %v760_v3 = vsel %vm232_vm0, %v4921_v32, %v759_v41  ;;  %v781_v15 = vrot.slane %v752_v43, 4  ;;  %v680_v61 = vperm.slane %v672_v28, %v4312_v8  ;;  %v669_v51 = vrot.slane %v640_v2, 4 }
  0xd4   : > { %v3691_v52 = vunpack.i.h.bf16 %v3689_v62  ;;  %v3690_v34 = vunpack.i.l.bf16 %v3689_v62  ;;  %v5027_v59 = vrot.slane %v7172_v45, 4  ;;  %v940_v62 = vsel %vm232_vm0, %v939_v56, %v3675_v11 }
  0xd5   : > { %v5041_v45 = vperm.slane %v942_v38, %v4310_v7  ;;  %v699_v19 = vrot.slane %v656_v35, 4  ;;  %v5055_v56 = vperm.slane %v1052_v36, %v4310_v7  ;;  %v7173_v11 = vunpack.i.h.bf16 %v4887_v33 }
  0xd6   : > { %v1063_v31 = vrot.slane %v3691_v52, 4  ;;  %v1066_v57 = vsel %vm232_vm0, %v3691_v52, %v4935_v6  ;;  %v951_v18 = vrot.slane %v3690_v34, 4  ;;  %v954_v49 = vsel %vm232_vm0, %v3690_v34, %v4939_v47 }
  0xd7   : > { %v5049_v52 = vperm.slane %v1066_v57, %v4310_v7  ;;  %v5052_v6 = vperm.slane %v954_v49, %v4310_v7  ;;  %v768_v47 = vperm.slane %v760_v3, %v4312_v8  ;;  %v7174_v34 = vunpack.i.l.bf16 %v4887_v33 }
  0xd8   : > { %v1064_v2 = vsel %vm232_vm0, %v1063_v31, %v7173_v11  ;;  %v5066_v57 = vperm.slane %v940_v62, %v4310_v7  ;;  %v700_v36 = vsel %vm232_vm0, %v680_v61, %v699_v19  ;;  %v784_v42 = vsel %vm232_vm0, %v752_v43, %v783_v14 }
  0xd9   : > { %v952_v38 = vsel %vm232_vm0, %v951_v18, %v7174_v34  ;;  %v811_v3 = vrot.slane %v768_v47, 4  ;;  %v792_v41 = vperm.slane %v784_v42, %v4312_v8  ;;  %v697_v17 = vrot.slane %v680_v61, 4 }
  0xda   : > { %v7175_v33 = vrot.slane %v4924_v60, 4  ;;  %v670_v18 = vsel %vm232_vm0, %v669_v51, %v4967_v50  ;;  %v7177_v19 = vrot.slane %v4921_v32, 4  ;;  %v782_v43 = vsel %vm232_vm0, %v781_v15, %v4964_v10  ;;  %v3699_v51 = vpop.permute.xlu0 %3698 }
  0xdb   : > { %v5082_v11 = vperm.slane %v670_v18, %v4312_v8  ;;  %v3704_v60 = vpop.permute.xlu1 %3703  ;;  %v698_v61 = vsel %vm232_vm0, %v697_v17, %v656_v35  ;;  %v809_v50 = vrot.slane %v792_v41, 4  ;;  %v5096_v34 = vperm.slane %v1064_v2, %v4310_v7 }
  0xdc   : > { %v646_v31 = vsel %vm232_vm0, %v7175_v33, %v4948_v46  ;;  %v758_v14 = vsel %vm232_vm0, %v7177_v19, %v4942_v13  ;;  %v812_v46 = vsel %vm232_vm0, %v792_v41, %v811_v3  ;;  %v5100_v13 = vperm.slane %v782_v43, %v4312_v8 }
  0xdd   : > { %v5079_v62 = vperm.slane %v646_v31, %v4312_v8  ;;  %v5093_v42 = vperm.slane %v758_v14, %v4312_v8  ;;  %v3797_v33 = vpack.i.bf16 %v812_v46, %v700_v36  ;;  %v810_v10 = vsel %vm232_vm0, %v809_v50, %v768_v47  ;;  %v5114_v14 = vpop.permute.xlu2 %3733 }
  0xde   : > { %v3706_v3 = vunpack.i.h.bf16 %v3704_v60  ;;  %v3705_v17 = vunpack.i.l.bf16 %v3704_v60  ;;  %v5105_v35 = vperm.slane %v952_v38, %v4310_v7  ;;  %v3792_v41 = vpack.i.bf16 %v810_v10, %v698_v61  ;;  %7178 = vst [vmem:[#allocation39_spill] sm:$0xff] %v5114_v14 }
  0xdf   : > { %7176 = vst [vmem:[#allocation38_spill] sm:$0xff] %v5079_v62  ;;  %v695_v32 = vrot.slane %v5079_v62, 4  ;;  %v807_v15 = vrot.slane %v5093_v42, 4  ;;  %3798 = vrot.lane.b32.xlu2 %v3797_v33, %s4219_s30  ;;  %v3701_v36 = vunpack.i.h.bf16 %v3699_v51  ;;  %v1111_v38 = vrot.slane %v5049_v52, 4 }
  0xe0   : > { %v1075_v18 = vrot.slane %v3706_v3, 4  ;;  %v1078_v47 = vsel %vm232_vm0, %v3706_v3, %v4992_v27  ;;  %v963_v19 = vrot.slane %v3705_v17, 4  ;;  %v999_v43 = vrot.slane %v5052_v6, 4  ;;  %3793 = vrot.lane.b32.xlu1 %v3792_v41, %s4221_s5 }
  0xe1   : > { %v696_v2 = vsel %vm232_vm0, %v5082_v11, %v695_v32  ;;  %v808_v31 = vsel %vm232_vm0, %v5100_v13, %v807_v15  ;;  %v966_v46 = vsel %vm232_vm0, %v3705_v17, %v5003_v1  ;;  %v7179_v33 = vunpack.i.h.bf16 %v4918_v9 }
  0xe2   : > { %v3787_v60 = vpack.i.bf16 %v808_v31, %v696_v2  ;;  %v5127_v32 = vperm.slane %v1078_v47, %v4310_v7  ;;  %v7180_v3 = vunpack.i.l.bf16 %v4918_v9  ;;  %v5136_v17 = vperm.slane %v966_v46, %v4310_v7 }
  0xe3   : > { %v1076_v27 = vsel %vm232_vm0, %v1075_v18, %v7179_v33  ;;  %v1088_v2 = vsel %vm232_vm0, %v5013_v5, %v3701_v36  ;;  %v1089_v31 = vrot.slane %v3701_v36, 4  ;;  %v3700_v18 = vunpack.i.l.bf16 %v3699_v51 }
  0xe4   : > { %3788 = vrot.lane.b32.xlu0 %v3787_v60, %s4220_s4  ;;  %v964_v1 = vsel %vm232_vm0, %v963_v19, %v7180_v3  ;;  %v5139_v41 = vperm.slane %v1076_v27, %v4310_v7  ;;  %v5145_v47 = vsel %vm232_vm0, %v1111_v38, %v5031_v16  ;;  %v5149_v9 = vsel %vm232_vm0, %v999_v43, %v5041_v45  ;;  %v3714_v43 = vpop.permute.xlu1 %3713 }
  0xe5   : > { %v3721_v19 = vunpack.i.h.bf16 %v5046_v63  ;;  %v3720_v60 = vunpack.i.l.bf16 %v5046_v63  ;;  %v5155_v33 = vperm.slane %v964_v1, %v4310_v7  ;;  %v7181_v5 = vrot.slane %v4956_v29, 4 }
  0xe6   : > { %v7182_v36 = vrot.slane %v4970_v53, 4  ;;  %v5167_v63 = vperm.slane %v1088_v2, %v4310_v7  ;;  %v976_v3 = vsel %vm232_vm0, %v5027_v59, %v3700_v18  ;;  %v7185_v2 = vrot.slane %v4953_v12, 4  ;;  %v3724_v59 = vpop.permute.xlu0 %3723 }
  0xe7   : > { %v660_v51 = vsel %vm232_vm0, %v4915_v44, %v7181_v5  ;;  %v7183_v44 = vunpack.i.h.bf16 %v4984_v0  ;;  %v977_v27 = vrot.slane %v3700_v18, 4  ;;  %v776_v18 = vperm.slane %v4961_v48, %v4312_v8 }
  0xe8   : > { %v684_v38 = vsel %vm232_vm0, %v5020_v22, %v7182_v36  ;;  %v7184_v36 = vrot.slane %v4930_v39, 4  ;;  %v796_v28 = vsel %vm232_vm0, %v5017_v54, %v7185_v2  ;;  %v664_v39 = vperm.slane %v4979_v4, %v4312_v8 }
  0xe9   : > { %v5172_v1 = vperm.slane %v684_v38, %v4312_v8  ;;  %v1090_v5 = vsel %vm232_vm0, %v7183_v44, %v1089_v31  ;;  %v668_v38 = vperm.slane %v660_v51, %v4312_v8  ;;  %v804_v10 = vperm.slane %v796_v28, %v4312_v8 }
  0xea   : > { %v772_v46 = vsel %vm232_vm0, %v4909_v40, %v7184_v36  ;;  %v5190_v31 = vperm.slane %v976_v3, %v4310_v7  ;;  %v7186_v40 = vrot.slane %v5020_v22, 4  ;;  %v5200_v36 = vpop.permute.xlu2 %3748  ;;  %v703_v15 = vrot.slane %v664_v39, 4 }
  0xeb   : > { %v705_v49 = vrot.slane %v5172_v1, 4  ;;  %v780_v28 = vperm.slane %v772_v46, %v4312_v8  ;;  %v817_v2 = vrot.slane %v804_v10, 4  ;;  %v7187_v4 = vrot.slane %v5017_v54, 4 }
  0xec   : > { %v682_v44 = vsel %vm232_vm0, %v7186_v40, %v4970_v53  ;;  %v815_v29 = vrot.slane %v776_v18, 4  ;;  %v7188_v53 = vrot.slane %v4710_v55, 4  ;;  %v3715_v50 = vunpack.i.l.bf16 %v3714_v43 }
  0xed   : > { %v706_v51 = vsel %vm232_vm0, %v705_v49, %v668_v38  ;;  %v688_v3 = vperm.slane %v682_v44, %v4312_v8  ;;  %v794_v22 = vsel %vm232_vm0, %v7187_v4, %v4953_v12  ;;  %v818_v49 = vsel %vm232_vm0, %v817_v2, %v780_v28 }
  0xee   : > { %v1395_v48 = vsel %vm232_vm0, %v7188_v53, %v4690_v37  ;;  %v800_v46 = vperm.slane %v794_v22, %v4312_v8  ;;  %v7189_v44 = vrot.slane %v4751_v30, 4  ;;  %v3812_v54 = vpack.i.bf16 %v818_v49, %v706_v51 }
  0xef   : > { %v701_v40 = vrot.slane %v688_v3, 4  ;;  %v704_v12 = vsel %vm232_vm0, %v688_v3, %v703_v15  ;;  %v3716_v4 = vunpack.i.h.bf16 %v3714_v43  ;;  %v3726_v14 = vunpack.i.h.bf16 %v3724_v59 }
  0xf0   : > { %v1507_v61 = vsel %vm232_vm0, %v7189_v44, %v4721_v58  ;;  %v816_v55 = vsel %vm232_vm0, %v800_v46, %v815_v29  ;;  %v813_v53 = vrot.slane %v800_v46, 4  ;;  %3813 = vrot.lane.b32.xlu2 %v3812_v54, %s4225_s9  ;;  %v1578_v30 = vsel %vm512_vm2, %v1395_v48, %v3715_v50  ;;  %v3729_v58 = vpop.permute.xlu1 %3728 }
  0xf1   : > { %v702_v37 = vsel %vm232_vm0, %v701_v40, %v664_v39  ;;  %v3807_v2 = vpack.i.bf16 %v816_v55, %v704_v12  ;;  %v1585_v22 = vsel %vm512_vm2, %v1507_v61, %v3716_v4  ;;  %v3725_v62 = vunpack.i.l.bf16 %v3724_v59  ;;  %v5235_v59 = vpop.permute.xlu0 %3738 }
  0xf2   : > { %v7190_v51 = vunpack.i.l.bf16 %v4984_v0  ;;  %v814_v43 = vsel %vm232_vm0, %v813_v53, %v776_v18  ;;  %v1579_v29 = vsel %vm514_vm3, %v1578_v30, %v3720_v60  ;;  %v1586_v39 = vsel %vm514_vm3, %v1585_v22, %v3721_v19  ;;  %v5246_v40 = vpop.permute.xlu2 %3763 }
  0xf3   : > { %v1013_v3 = vrot.slane %v5155_v33, 4  ;;  %3808 = vrot.lane.b32.xlu1 %v3807_v2, %s4222_s6  ;;  %v3802_v49 = vpack.i.bf16 %v814_v43, %v702_v37  ;;  %v1587_v61 = vsel %vm516_vm4, %v1586_v39, %v3726_v14  ;;  %v1580_v50 = vsel %vm516_vm4, %v1579_v29, %v3725_v62 }
  0xf4   : > { %v978_v15 = vsel %vm232_vm0, %v7190_v51, %v977_v27  ;;  %v5238_v0 = vperm.slane %v1090_v5, %v4310_v7  ;;  %v707_v27 = vrot.slane %v668_v38, 4  ;;  %v819_v18 = vrot.slane %v780_v28, 4 }
  0xf5   : > { %v3731_v48 = vunpack.i.h.bf16 %v3729_v58  ;;  %v1123_v60 = vrot.slane %v5167_v63, 4  ;;  %v5242_v19 = vperm.slane %v978_v15, %v4310_v7  ;;  %v1011_v46 = vrot.slane %v5190_v31, 4  ;;  %3803 = vrot.lane.b32.xlu0 %v3802_v49, %s4223_s7 }
  0xf6   : > { %v3730_v14 = vunpack.i.l.bf16 %v3729_v58  ;;  %v708_v62 = vsel %vm232_vm0, %v5172_v1, %v707_v27  ;;  %v820_v5 = vsel %vm232_vm0, %v804_v10, %v819_v18  ;;  %v7191_v28 = vrot.slane %v5066_v57, 4 }
  0xf7   : > { %v5252_v38 = vsel %vm518_vm5, %v1587_v61, %v3731_v48  ;;  %v3751_v54 = vunpack.i.h.bf16 %v5200_v36  ;;  %v1014_v1 = vsel %vm232_vm0, %v5190_v31, %v1013_v3  ;;  %v7192_v55 = vrot.slane %v5055_v56, 4 }
  0xf8   : > { %v990_v44 = vsel %vm232_vm0, %v5105_v35, %v7191_v28  ;;  %v5260_v12 = vsel %vm518_vm5, %v1580_v50, %v3730_v14  ;;  %v1022_v10 = vperm.slane %v1014_v1, %v4312_v8  ;;  %v7193_v53 = vrot.slane %v5139_v41, 4  ;;  %v5296_v14 = vpop.permute.xlu1 %3743 }
  0xf9   : > { %v998_v4 = vperm.slane %v990_v44, %v4312_v8  ;;  %v1102_v37 = vsel %vm232_vm0, %v5096_v34, %v7192_v55  ;;  %v3766_v22 = vunpack.i.h.bf16 %v5246_v40  ;;  %v3817_v30 = vpack.i.bf16 %v820_v5, %v708_v62  ;;  %v3754_v5 = vpop.permute.xlu0 %3753 }
  0xfa   : > { %v1126_v2 = vsel %vm232_vm0, %v5167_v63, %v7193_v53  ;;  %v1110_v51 = vperm.slane %v1102_v37, %v4312_v8  ;;  %v1039_v15 = vrot.slane %v1022_v10, 4  ;;  %v3765_v43 = vunpack.i.l.bf16 %v5246_v40 }
  0xfb   : > { %v1041_v58 = vrot.slane %v998_v4, 4  ;;  %v1134_v31 = vperm.slane %v1126_v2, %v4312_v8  ;;  %v7194_v29 = vrot.slane %v5105_v35, 4  ;;  %v1012_v3 = vsel %vm232_vm0, %v1011_v46, %v5155_v33 }
  0xfc   : > { %v1153_v49 = vrot.slane %v1110_v51, 4  ;;  %v1764_v50 = vrot.slane %v3766_v22, 4  ;;  %v1040_v27 = vsel %vm232_vm0, %v1039_v15, %v998_v4  ;;  %v5290_v48 = vperm.slane %v1012_v3, %v4312_v8 }
  0xfd   : > { %v988_v39 = vsel %vm232_vm0, %v7194_v29, %v5066_v57  ;;  %v1042_v63 = vsel %vm232_vm0, %v1022_v10, %v1041_v58  ;;  %v1151_v61 = vrot.slane %v1134_v31, 4  ;;  %v7195_v35 = vrot.slane %v5096_v34, 4  ;;  %3818 = vrot.lane.b32.xlu0 %v3817_v30, %s4224_s8 }
  0xfe   : > { %v5287_v18 = vperm.slane %v988_v39, %v4312_v8  ;;  %v1154_v33 = vsel %vm232_vm0, %v1134_v31, %v1153_v49  ;;  %v1124_v62 = vsel %vm232_vm0, %v1123_v60, %v5139_v41  ;;  %v1652_v34 = vrot.slane %v3765_v43, 4 }
  0xff   : > { %v1100_v57 = vsel %vm232_vm0, %v7195_v35, %v5055_v56  ;;  %v1152_v46 = vsel %vm232_vm0, %v1151_v61, %v1110_v51  ;;  %v3832_v28 = vpack.i.bf16 %v1154_v33, %v1042_v63  ;;  %v1135_v4 = vrot.slane %v5238_v0, 4 }
 0x100   : > { %v5302_v40 = vperm.slane %v1100_v57, %v4312_v8  ;;  %v3827_v44 = vpack.i.bf16 %v1152_v46, %v1040_v27  ;;  %v1037_v56 = vrot.slane %v5287_v18, 4  ;;  %v1023_v1 = vrot.slane %v5242_v19, 4 }
 0x101   : > { %v5310_v10 = vperm.slane %v1124_v62, %v4312_v8  ;;  %v3750_v37 = vunpack.i.l.bf16 %v5200_v36  ;;  %3833 = vrot.lane.b32.xlu2 %v3832_v28, %s4219_s30  ;;  %v3756_v60 = vunpack.i.h.bf16 %v3754_v5  ;;  %v3755_v53 = vunpack.i.l.bf16 %v3754_v5  ;;  %v5368_v28 = vpop.permute.xlu2 %3778 }
 0x102   : > { %v1149_v55 = vrot.slane %v5302_v40, 4  ;;  %3828 = vrot.lane.b32.xlu1 %v3827_v44, %s4221_s5  ;;  %v1038_v41 = vsel %vm232_vm0, %v5290_v48, %v1037_v56  ;;  %v1754_v2 = vrot.slane %v3751_v54, 4  ;;  %v7196_v58 = vrot.slane %v5041_v45, 4  ;;  %v3759_v44 = vpop.permute.xlu1 %3758 }
 0x103   : > { %v7197_v31 = vrot.slane %v5136_v17, 4  ;;  %v1765_v39 = vsel %vm232_vm0, %v1764_v50, %v3756_v60  ;;  %v1766_v3 = vrot.slane %v3756_v60, 4  ;;  %v1653_v63 = vsel %vm232_vm0, %v1652_v34, %v3755_v53 }
 0x104   : > { %v1150_v30 = vsel %vm232_vm0, %v5310_v10, %v1149_v55  ;;  %v1002_v51 = vsel %vm232_vm0, %v5052_v6, %v7196_v58  ;;  %v5333_v49 = vperm.slane %v1765_v39, %v4310_v7  ;;  %v1654_v61 = vrot.slane %v3755_v53, 4  ;;  %v3769_v39 = vpop.permute.xlu0 %3768 }
 0x105   : > { %v1026_v15 = vsel %vm232_vm0, %v5242_v19, %v7197_v31  ;;  %v3822_v29 = vpack.i.bf16 %v1150_v30, %v1038_v41  ;;  %v5336_v45 = vperm.slane %v1653_v63, %v4310_v7  ;;  %v1767_v27 = vsel %vm232_vm0, %v3766_v22, %v1766_v3 }
 0x106   : > { %v5339_v6 = vperm.slane %v1026_v15, %v4312_v8  ;;  %v7198_v19 = vrot.slane %v5031_v16, 4  ;;  %v7199_v35 = vrot.slane %v5127_v32, 4  ;;  %v1006_v33 = vperm.slane %v5149_v9, %v4312_v8 }
 0x107   : > { %v1642_v46 = vrot.slane %v3750_v37, 4  ;;  %3823 = vrot.lane.b32.xlu0 %v3822_v29, %s4220_s4  ;;  %v5356_v22 = vperm.slane %v1767_v27, %v4310_v7  ;;  %v1655_v16 = vsel %vm232_vm0, %v3765_v43, %v1654_v61  ;;  %v1800_v62 = vrot.slane %v5333_v49, 4 }
 0x108   : > { %v1114_v50 = vsel %vm232_vm0, %v5049_v52, %v7198_v19  ;;  %v1138_v57 = vsel %vm232_vm0, %v5238_v0, %v7199_v35  ;;  %v5360_v52 = vperm.slane %v1002_v51, %v4312_v8  ;;  %v1688_v0 = vrot.slane %v5336_v45, 4 }
 0x109   : > { %v1047_v5 = vrot.slane %v5339_v6, 4  ;;  %v5366_v9 = vperm.slane %v1138_v57, %v4312_v8  ;;  %v5371_v34 = vperm.slane %v1655_v16, %v4310_v7  ;;  %v5374_v43 = vperm.slane %v1114_v50, %v4312_v8 }
 0x10a   : > { %v1024_v56 = vsel %vm232_vm0, %v1023_v1, %v5136_v17  ;;  %v1118_v55 = vperm.slane %v5145_v47, %v4312_v8  ;;  %v1045_v30 = vrot.slane %v1006_v33, 4  ;;  %v1812_v58 = vrot.slane %v5356_v22, 4 }
 0x10b   : > { %v1048_v41 = vsel %vm232_vm0, %v1047_v5, %v5360_v52  ;;  %v1159_v60 = vrot.slane %v5366_v9, 4  ;;  %v1030_v53 = vperm.slane %v1024_v56, %v4312_v8  ;;  %v1136_v51 = vsel %vm232_vm0, %v1135_v4, %v5127_v32 }
 0x10c   : > { %v1157_v31 = vrot.slane %v1118_v55, 4  ;;  %v3781_v15 = vunpack.i.h.bf16 %v5368_v28  ;;  %v1142_v1 = vperm.slane %v1136_v51, %v4312_v8  ;;  %v3780_v61 = vunpack.i.l.bf16 %v5368_v28 }
 0x10d   : > { %v1160_v17 = vsel %vm232_vm0, %v1159_v60, %v5374_v43  ;;  %v1046_v47 = vsel %vm232_vm0, %v1030_v53, %v1045_v30  ;;  %v1043_v29 = vrot.slane %v1030_v53, 4  ;;  %v3761_v27 = vunpack.i.h.bf16 %v3759_v44 }
 0x10e   : > { %v3847_v3 = vpack.i.bf16 %v1160_v17, %v1048_v41  ;;  %v1776_v63 = vrot.slane %v3781_v15, 4  ;;  %v1158_v19 = vsel %vm232_vm0, %v1142_v1, %v1157_v31  ;;  %v1155_v4 = vrot.slane %v1142_v1, 4  ;;  %v3774_v31 = vpop.permute.xlu1 %3773 }
 0x10f   : > { %v1044_v32 = vsel %vm232_vm0, %v1043_v29, %v1006_v33  ;;  %v3760_v50 = vunpack.i.l.bf16 %v3759_v44  ;;  %v3842_v35 = vpack.i.bf16 %v1158_v19, %v1046_v47  ;;  %v1752_v57 = vrot.slane %v3761_v27, 4 }
 0x110   : > { %3848 = vrot.lane.b32.xlu2 %v3847_v3, %s4225_s9  ;;  %v1755_v16 = vsel %vm232_vm0, %v3761_v27, %v1754_v2  ;;  %v3771_v5 = vunpack.i.h.bf16 %v3769_v39  ;;  %v1156_v56 = vsel %vm232_vm0, %v1155_v4, %v1118_v55  ;;  %v1700_v55 = vrot.slane %v5371_v34, 4 }
 0x111   : > { %v5399_v41 = vperm.slane %v1755_v16, %v4310_v7  ;;  %v1640_v28 = vrot.slane %v3760_v50, 4  ;;  %v1643_v60 = vsel %vm232_vm0, %v3760_v50, %v1642_v46  ;;  %3843 = vrot.lane.b32.xlu1 %v3842_v35, %s4222_s6  ;;  %v3837_v33 = vpack.i.bf16 %v1156_v56, %v1044_v32 }
 0x112   : > { %v1753_v44 = vsel %vm232_vm0, %v1752_v57, %v3751_v54  ;;  %v5407_v53 = vperm.slane %v1643_v60, %v4310_v7  ;;  %v1777_v2 = vsel %vm232_vm0, %v1776_v63, %v3771_v5  ;;  %v1664_v30 = vrot.slane %v3780_v61, 4  ;;  %v3784_v57 = vpop.permute.xlu0 %3783 }
 0x113   : > { %v5412_v51 = vperm.slane %v1753_v44, %v4310_v7  ;;  %v1641_v46 = vsel %vm232_vm0, %v1640_v28, %v3750_v37  ;;  %3838 = vrot.lane.b32.xlu0 %v3837_v33, %s4223_s7  ;;  %v1814_v54 = vrot.slane %v5399_v41, 4  ;;  %v5422_v47 = vsel %vm232_vm0, %v1812_v58, %v5399_v41 }
 0x114   : > { %v1647_v17 = vperm.slane %v1641_v46, %v4310_v7  ;;  %v1778_v1 = vrot.slane %v3771_v5, 4  ;;  %v5427_v3 = vsel %vm232_vm0, %v1700_v55, %v5407_v53  ;;  %v1783_v36 = vperm.slane %v1777_v2, %v4310_v7 }
 0x115   : > { %v1802_v29 = vrot.slane %v5412_v51, 4  ;;  %v3770_v37 = vunpack.i.l.bf16 %v3769_v39  ;;  %v1049_v27 = vrot.slane %v5360_v52, 4  ;;  %v1161_v19 = vrot.slane %v5374_v43, 4 }
 0x116   : > { %v1779_v63 = vsel %vm232_vm0, %v3781_v15, %v1778_v1  ;;  %v3776_v32 = vunpack.i.h.bf16 %v3774_v31  ;;  %v1690_v4 = vrot.slane %v1647_v17, 4  ;;  %v1702_v16 = vrot.slane %v5407_v53, 4 }
 0x117   : > { %v5434_v58 = vperm.slane %v1779_v63, %v4310_v7  ;;  %v1665_v50 = vsel %vm232_vm0, %v1664_v30, %v3770_v37  ;;  %v1666_v35 = vrot.slane %v3770_v37, 4  ;;  %v1050_v39 = vsel %vm232_vm0, %v5339_v6, %v1049_v27 }
 0x118   : > { %v1162_v15 = vsel %vm232_vm0, %v5366_v9, %v1161_v19  ;;  %v1790_v52 = vrot.slane %v3776_v32, 4  ;;  %v1826_v5 = vrot.slane %v1783_v36, 4  ;;  %v1671_v56 = vperm.slane %v1665_v50, %v4310_v7 }
 0x119   : > { %v1667_v43 = vsel %vm232_vm0, %v3780_v61, %v1666_v35  ;;  %v3775_v28 = vunpack.i.l.bf16 %v3774_v31  ;;  %v3852_v33 = vpack.i.bf16 %v1162_v15, %v1050_v39  ;;  %v3786_v44 = vunpack.i.h.bf16 %v3784_v57 }
 0x11a   : > { %v5445_v60 = vperm.slane %v1667_v43, %v4310_v7  ;;  %v3785_v2 = vunpack.i.l.bf16 %v3784_v57  ;;  %v1838_v53 = vrot.slane %v5434_v58, 4  ;;  %v1691_v6 = vsel %vm232_vm0, %v5336_v45, %v1690_v4 }
 0x11b   : > { %v1678_v55 = vrot.slane %v3775_v28, 4  ;;  %v1803_v9 = vsel %vm232_vm0, %v5333_v49, %v1802_v29  ;;  %3853 = vrot.lane.b32.xlu0 %v3852_v33, %s4224_s8  ;;  %v1788_v61 = vrot.slane %v3786_v44, 4  ;;  %v1791_v30 = vsel %vm232_vm0, %v3786_v44, %v1790_v52 }
 0x11c   : > { %v1676_v46 = vrot.slane %v3785_v2, 4  ;;  %v1689_v31 = vsel %vm232_vm0, %v1688_v0, %v1647_v17  ;;  %v1726_v1 = vrot.slane %v5445_v60, 4  ;;  %v1799_v37 = vperm.slane %v1791_v30, %v4310_v7 }
 0x11d   : > { %v1679_v63 = vsel %vm232_vm0, %v3785_v2, %v1678_v55  ;;  %v1699_v27 = vperm.slane %v1691_v6, %v4312_v8  ;;  %v1789_v29 = vsel %vm232_vm0, %v1788_v61, %v3776_v32  ;;  %v1811_v50 = vperm.slane %v1803_v9, %v4312_v8 }
 0x11e   : > { %v1677_v19 = vsel %vm232_vm0, %v1676_v46, %v3775_v28  ;;  %v1687_v4 = vperm.slane %v1679_v63, %v4310_v7  ;;  %v1714_v35 = vrot.slane %v1671_v56, 4  ;;  %v1795_v45 = vperm.slane %v1789_v29, %v4310_v7 }
 0x11f   : > { %v1683_v0 = vperm.slane %v1677_v19, %v4310_v7  ;;  %v5468_v17 = vperm.slane %v1689_v31, %v4312_v8  ;;  %v1839_v15 = vsel %vm232_vm0, %v1799_v37, %v1838_v53  ;;  %v1742_v32 = vrot.slane %v1699_v27, 4 }
 0x120   : > { %v1724_v57 = vrot.slane %v1687_v4, 4  ;;  %v1727_v39 = vsel %vm232_vm0, %v1687_v4, %v1726_v1  ;;  %v1824_v52 = vrot.slane %v1795_v45, 4  ;;  %v1827_v33 = vsel %vm232_vm0, %v1795_v45, %v1826_v5 }
 0x121   : > { %v1712_v43 = vrot.slane %v1683_v0, 4  ;;  %v1715_v28 = vsel %vm232_vm0, %v1683_v0, %v1714_v35  ;;  %v1835_v2 = vperm.slane %v1827_v33, %v4312_v8  ;;  %v1854_v55 = vrot.slane %v1811_v50, 4 }
 0x122   : > { %v1723_v44 = vperm.slane %v1715_v28, %v4312_v8  ;;  %v1801_v6 = vsel %vm232_vm0, %v1800_v62, %v5412_v51  ;;  %v1825_v61 = vsel %vm232_vm0, %v1824_v52, %v1783_v36  ;;  %v1703_v5 = vsel %vm232_vm0, %v5371_v34, %v1702_v16 }
 0x123   : > { %v1713_v9 = vsel %vm232_vm0, %v1712_v43, %v1671_v56  ;;  %v5482_v53 = vperm.slane %v1801_v6, %v4312_v8  ;;  %v1855_v46 = vsel %vm232_vm0, %v1835_v2, %v1854_v55  ;;  %v1852_v1 = vrot.slane %v1835_v2, 4 }
 0x124   : > { %v1743_v30 = vsel %vm232_vm0, %v1723_v44, %v1742_v32  ;;  %v1740_v31 = vrot.slane %v1723_v44, 4  ;;  %v5490_v49 = vperm.slane %v1713_v9, %v4312_v8  ;;  %v1738_v62 = vrot.slane %v5468_v17, 4 }
 0x125   : > { %v3867_v63 = vpack.i.bf16 %v1855_v46, %v1743_v30  ;;  %v5494_v51 = vperm.slane %v1825_v61, %v4312_v8  ;;  %v1853_v56 = vsel %vm232_vm0, %v1852_v1, %v1811_v50  ;;  %v1850_v34 = vrot.slane %v5482_v53, 4 }
 0x126   : > { %v1741_v36 = vsel %vm232_vm0, %v1740_v31, %v1699_v27  ;;  %v1735_v16 = vperm.slane %v1727_v39, %v4312_v8  ;;  %v1836_v29 = vrot.slane %v1799_v37, 4  ;;  %v1739_v4 = vsel %vm232_vm0, %v5490_v49, %v1738_v62 }
 0x127   : > { %3868 = vrot.lane.b32.xlu0 %v3867_v63, %s4219_s30  ;;  %v3862_v19 = vpack.i.bf16 %v1853_v56, %v1741_v36  ;;  %v1711_v35 = vperm.slane %v1703_v5, %v4312_v8  ;;  %v1851_v45 = vsel %vm232_vm0, %v5494_v51, %v1850_v34  ;;  %v1815_v27 = vsel %vm232_vm0, %v5356_v22, %v1814_v54 }
 0x128   : > { %v1748_v0 = vrot.slane %v1735_v16, 4  ;;  %v1847_v50 = vperm.slane %v1839_v15, %v4312_v8  ;;  %v3857_v37 = vpack.i.bf16 %v1851_v45, %v1739_v4  ;;  %v1823_v39 = vperm.slane %v1815_v27, %v4312_v8 }
 0x129   : > { %3863 = vrot.lane.b32.xlu2 %v3862_v19, %s4221_s5  ;;  %v1707_v32 = vperm.slane %v5427_v3, %v4312_v8  ;;  %v1725_v52 = vsel %vm232_vm0, %v1724_v57, %v5445_v60  ;;  %v1819_v22 = vperm.slane %v5422_v47, %v4312_v8  ;;  %v1837_v15 = vsel %vm232_vm0, %v1836_v29, %v5434_v58  ;;  %v7200_v19 = vld [vmem:[#allocation25_spill] sm:$0xff] }
 0x12a   : > { %v1749_v43 = vsel %vm232_vm0, %v1748_v0, %v1711_v35  ;;  %v1860_v28 = vrot.slane %v1847_v50, 4  ;;  %v1731_v41 = vperm.slane %v1725_v52, %v4312_v8  ;;  %3858 = vrot.lane.b32.xlu1 %v3857_v37, %s4220_s4  ;;  %v1843_v3 = vperm.slane %v1837_v15, %v4312_v8 }
 0x12b   : > { %v1746_v54 = vrot.slane %v1707_v32, 4  ;;  %v1858_v44 = vrot.slane %v1819_v22, 4  ;;  %v1750_v5 = vrot.slane %v1711_v35, 4  ;;  %v1862_v46 = vrot.slane %v1823_v39, 4 }
 0x12c   : > { %v1861_v33 = vsel %vm232_vm0, %v1860_v28, %v1823_v39  ;;  %v1744_v60 = vrot.slane %v1731_v41, 4  ;;  %v1856_v47 = vrot.slane %v1843_v3, 4  ;;  %v2307_v31 = vrot.slane %v4339_v23, 2  ;;  %v7207_v28 = vld [vmem:[#allocation9_spill] sm:$0xff] }
 0x12d   : > { %v3882_v57 = vpack.i.bf16 %v1861_v33, %v1749_v43  ;;  %v1747_v2 = vsel %vm232_vm0, %v1731_v41, %v1746_v54  ;;  %v1859_v55 = vsel %vm232_vm0, %v1843_v3, %v1858_v44  ;;  %v1751_v30 = vsel %vm232_vm0, %v1735_v16, %v1750_v5  ;;  %v7208_v54 = vld [vmem:[#allocation5_spill] sm:$0xff]  ;;  %v7209_v33 = vld [vmem:[#allocation6_spill] sm:$0xff] }
 0x12e   : > { %v1745_v6 = vsel %vm232_vm0, %v1744_v60, %v1707_v32  ;;  %v3877_v9 = vpack.i.bf16 %v1859_v55, %v1747_v2  ;;  %v1857_v61 = vsel %vm232_vm0, %v1856_v47, %v1819_v22  ;;  %v2308_v1 = vrot.slane %v4341_v24, 2  ;;  %v7210_v60 = vld [vmem:[#allocation14_spill] sm:$0xff] }
 0x12f   : > { %3883 = vrot.lane.b32.xlu0 %v3882_v57, %s4225_s9  ;;  %v3872_v58 = vpack.i.bf16 %v1857_v61, %v1745_v6  ;;  %v2282_v63 = vrot.slane %v4331_v20, 2  ;;  %v2283_v62 = vrot.slane %v4333_v21, 2  ;;  %v1863_v36 = vsel %vm232_vm0, %v1847_v50, %v1862_v46  ;;  %v7201_v20 = vld [vmem:[#allocation12_spill] sm:$0xff]  ;;  %v7211_v2 = vld [vmem:[#allocation10_spill] sm:$0xff] }
 0x130   : > { %v2293_v56 = vrot.slane %v4345_v26, 2  ;;  %v2292_v34 = vrot.slane %v4343_v25, 2  ;;  %v1035_v29 = vrot.slane %v5290_v48, 4  ;;  %v1147_v16 = vrot.slane %v5310_v10, 4  ;;  %v7202_v26 = vld [vmem:[#allocation20_spill] sm:$0xff]  ;;  %v7204_v48 = vld [vmem:[#allocation27_spill] sm:$0xff] }
 0x131   : > { %3878 = vrot.lane.b32.xlu2 %v3877_v9, %s4222_s6  ;;  %v5546_v23 = vsel %vm2276_vm6, %v2282_v63, %v2283_v62  ;;  %v2303_v4 = vrot.slane %v7201_v20, 2  ;;  %v7203_v45 = vunpack.c.l.bf16 %v7202_v26  ;;  %v3887_v0 = vpack.i.bf16 %v1863_v36, %v1751_v30  ;;  %v7205_v10 = vld [vmem:[#allocation18_spill] sm:$0xff] }
 0x132   : > { %3873 = vrot.lane.b32.xlu1 %v3872_v58, %s4223_s7  ;;  %v2347_v21 = vrot.slane %v5546_v23, 4  ;;  %v5551_v35 = vsel %vm2276_vm6, %v2292_v34, %v2293_v56  ;;  %v7206_v27 = vunpack.c.l.bf16 %v7205_v10  ;;  %v5562_v37 = vsel %vm2276_vm6, %v2307_v31, %v2308_v1  ;;  %v7212_v6 = vld [vmem:[#allocation22_spill] sm:$0xff] }
 0x133   : > { %v2305_v25 = vrot.slane %v7203_v45, 2  ;;  %v2345_v39 = vrot.slane %v5551_v35, 4  ;;  %v2357_v32 = vrot.slane %v5562_v37, 4  ;;  %v2297_v41 = vrot.slane %v7207_v28, 2  ;;  %v7214_v63 = vld [vmem:[#allocation26_spill] sm:$0xff]  ;;  %v7218_v45 = vld [vmem:[#allocation8_spill] sm:$0xff] }
 0x134   : > { %v2295_v50 = vrot.slane %v7206_v27, 2  ;;  %v5568_v52 = vsel %vm232_vm0, %v5551_v35, %v2347_v21  ;;  %v2277_v15 = vrot.slane %v7208_v54, 2  ;;  %v2278_v3 = vrot.slane %v7209_v33, 2  ;;  %v7217_v26 = vld [vmem:[#allocation30_spill] sm:$0xff] }
 0x135   : > { %v5573_v43 = vsel %vm2276_vm6, %v2303_v4, %v2305_v25  ;;  %v5579_v22 = vsel %vm232_vm0, %v2345_v39, %v5546_v23  ;;  %v2313_v57 = vrot.slane %v7210_v60, 2  ;;  %v2298_v55 = vrot.slane %v7211_v2, 2  ;;  %v7220_v39 = vld [vmem:[#allocation28_spill] sm:$0xff] }
 0x136   : > { %v2483_v44 = vrot.slane %v5573_v43, 4  ;;  %v7213_v47 = vunpack.c.l.bf16 %v7212_v6  ;;  %v5589_v61 = vsel %vm2276_vm6, %v2293_v56, %v2295_v50  ;;  %v5593_v58 = vsel %vm232_vm0, %v1035_v29, %v5287_v18 }
 0x137   : > { %3898 = vrot.lane.b32.xlu0 %v7200_v19, %s4226_s10  ;;  %v5597_v5 = vsel %vm232_vm0, %v1147_v16, %v5302_v40  ;;  %v2457_v30 = vrot.slane %v5589_v61, 4  ;;  %v5601_v46 = vsel %vm2276_vm6, %v2297_v41, %v2298_v55  ;;  %v5611_v18 = vsel %vm2276_vm6, %v2277_v15, %v2278_v3  ;;  %v7215_v16 = vld [vmem:[#allocation16_spill] sm:$0xff]  ;;  %v7221_v15 = vld [vmem:[#allocation17_spill] sm:$0xff] }
 0x138   : > { %v2315_v9 = vrot.slane %v7213_v47, 2  ;;  %v5620_v56 = vsel %vm232_vm0, %v2357_v32, %v5601_v46  ;;  %v2335_v34 = vrot.slane %v5611_v18, 4  ;;  %v2359_v29 = vrot.slane %v5601_v46, 4 }
 0x139   : > { %3893 = vrot.lane.b32.xlu2 %v7204_v48, %s4226_s10  ;;  %v7216_v19 = vunpack.c.l.bf16 %v7215_v16  ;;  %v2288_v25 = vrot.slane %v7218_v45, 2  ;;  %v7219_v48 = vld [vmem:[#allocation7_spill] sm:$0xff]  ;;  %v3927_v32 = vpack.i.bf16 %v5562_v37, %v5589_v61 }
 0x13a   : > { %3888 = vrot.lane.b32.xlu1 %v3887_v0, %s4224_s8  ;;  %v5604_v31 = vsel %vm2276_vm6, %v2313_v57, %v2315_v9  ;;  %v2287_v10 = vrot.slane %v7219_v48, 2  ;;  %v5636_v27 = vsel %vm232_vm0, %v5562_v37, %v2359_v29  ;;  %v7224_v9 = vld [vmem:[#allocation21_spill] sm:$0xff]  ;;  %v7226_v29 = vld [vmem:[#allocation23_spill] sm:$0xff] }
 0x13b   : > { %v2481_v36 = vrot.slane %v5604_v31, 4  ;;  %v5616_v40 = vsel %vm232_vm0, %v5604_v31, %v2483_v44  ;;  %v2285_v21 = vrot.slane %v7216_v19, 2  ;;  %v7222_v44 = vunpack.c.l.bf16 %v7221_v15 }
 0x13c   : > { %v5646_v28 = vsel %vm2276_vm6, %v2287_v10, %v2288_v25  ;;  %v7229_v10 = vld [vmem:[#allocation31_spill] sm:$0xff] }
 0x13d   : > { %v5631_v0 = vsel %vm232_vm0, %v2481_v36, %v5573_v43  ;;  %v5639_v50 = vsel %vm2276_vm6, %v2283_v62, %v2285_v21  ;;  %v2290_v60 = vrot.slane %v7222_v44, 2  ;;  %v7223_v62 = vld [vmem:[#allocation13_spill] sm:$0xff]  ;;  %v2333_v6 = vrot.slane %v5646_v28, 4 }
 0x13e   : > { %v5650_v41 = vsel %vm232_vm0, %v2457_v30, %v5639_v50  ;;  %v2459_v54 = vrot.slane %v5639_v50, 4  ;;  %v2312_v2 = vrot.slane %v7223_v62, 2  ;;  %v5659_v47 = vsel %vm232_vm0, %v5646_v28, %v2335_v34 }
 0x13f   : > { %3913 = vrot.lane.b32.xlu0 %v7214_v63, %s4226_s10  ;;  %v7225_v63 = vunpack.c.l.bf16 %v7224_v9  ;;  %v3922_v30 = vpack.i.bf16 %v5551_v35, %v7226_v29  ;;  %v5671_v19 = vsel %vm232_vm0, %v2333_v6, %v5611_v18  ;;  %v5675_v21 = vsel %vm2276_vm6, %v2288_v25, %v2290_v60  ;;  %v7230_v25 = vld [vmem:[#allocation19_spill] sm:$0xff] }
 0x140   : > { %v5667_v16 = vsel %vm232_vm0, %v5589_v61, %v2459_v54  ;;  %7228 = vst [vmem:[#allocation12_spill] sm:$0xff] %v5675_v21  ;;  %v5678_v34 = vsel %vm2276_vm6, %v2312_v2, %v2313_v57  ;;  %v7232_v57 = vld [vmem:[#allocation11_spill] sm:$0xff]  ;;  %v3937_v24 = vpack.i.bf16 %v5646_v28, %v5639_v50  ;;  %v1736_v9 = vrot.slane %v5490_v49, 4 }
 0x141   : > { %3908 = vrot.lane.b32.xlu2 %v7217_v26, %s4226_s10  ;;  %v2310_v36 = vrot.slane %v7225_v63, 2  ;;  %7227 = vst [vmem:[#allocation25_spill] sm:$0xff] %v5667_v16  ;;  %v2369_v45 = vrot.slane %v5678_v34, 4  ;;  %v2302_v15 = vrot.slane %v7232_v57, 2  ;;  %v1848_v63 = vrot.slane %v5494_v51, 4 }
 0x142   : > { %3903 = vrot.lane.b32.xlu1 %v7220_v39, %s4226_s10  ;;  %v3942_v39 = vpack.i.bf16 %v5678_v34, %v5675_v21  ;;  %v5736_v51 = vsel %vm232_vm0, %v1736_v9, %v5468_v17 }
 0x143   : > { %v2311_v26 = vsel %vm2276_vm6, %v2308_v1, %v2310_v36  ;;  %v5700_v44 = vsel %vm2276_vm6, %v2302_v15, %v2303_v4  ;;  %v3957_v36 = vpack.i.bf16 %v5611_v18, %v5573_v43 }
 0x144   : > { %v2469_v48 = vrot.slane %v2311_v26, 4  ;;  %v5704_v60 = vsel %vm232_vm0, %v2369_v45, %v5700_v44  ;;  %v2371_v62 = vrot.slane %v5700_v44, 4  ;;  %v805_v45 = vrot.slane %v5100_v13, 4 }
 0x145   : > { %v3972_v17 = vpack.i.bf16 %v2311_v26, %v5562_v37 }
 0x146   : > { %v5716_v20 = vsel %vm232_vm0, %v5678_v34, %v2371_v62 }
 0x147   : > { %3928 = vrot.lane.b32.xlu0 %v3927_v32, %s4226_s10  ;;  %v7231_v32 = vunpack.c.l.bf16 %v7230_v25  ;;  %v7234_v25 = vld [vmem:[#allocation15_spill] sm:$0xff] }
 0x149   : > { %3923 = vrot.lane.b32.xlu2 %v3922_v30, %s4226_s10  ;;  %v2300_v54 = vrot.slane %v7231_v32, 2  ;;  %v693_v30 = vrot.slane %v5082_v11, 4  ;;  %v7235_v32 = vunpack.c.l.bf16 %v7234_v25 }
 0x14a   : > { %3918 = vrot.lane.b32.xlu1 %v7229_v10, %s4226_s10  ;;  %v5740_v10 = vsel %vm232_vm0, %v1848_v63, %v5482_v53  ;;  %v806_v53 = vsel %vm232_vm0, %v805_v45, %v5093_v42  ;;  %v3967_v42 = vpack.i.bf16 %v5589_v61, %v5551_v35 }
 0x14b   : > { %v5695_v1 = vsel %vm2276_vm6, %v2298_v55, %v2300_v54  ;;  %v3932_v55 = vpack.i.bf16 %v5546_v23, %v2311_v26  ;;  %v2280_v11 = vrot.slane %v7235_v32, 2  ;;  %v7241_v32 = vld [vmem:[#allocation33_spill] sm:$0xff] }
 0x14c   : > { %v5709_v2 = vsel %vm232_vm0, %v2469_v48, %v5695_v1  ;;  %v2471_v6 = vrot.slane %v5695_v1, 4  ;;  %v3952_v29 = vpack.i.bf16 %v5700_v44, %v5695_v1  ;;  %v3947_v48 = vpack.i.bf16 %v5601_v46, %v5604_v31 }
 0x14d   : > { %v5754_v63 = vsel %vm2276_vm6, %v2278_v3, %v2280_v11  ;;  %v7239_v3 = vld [vmem:[#allocation24_spill] sm:$0xff]  ;;  %v3635_v11 = vunpack.i.l.bf16 %v7241_v32 }
 0x14e   : > { %v5720_v4 = vsel %vm232_vm0, %v2311_v26, %v2471_v6  ;;  %7237 = vst [vmem:[#allocation27_spill] sm:$0xff] %v5754_v63  ;;  %v3962_v45 = vpack.i.bf16 %v7239_v3, %v5754_v63 }
 0x14f   : > { %3943 = vrot.lane.b32.xlu0 %v3942_v39, %s4226_s10  ;;  %7233 = vst [vmem:[#allocation20_spill] sm:$0xff] %v5720_v4  ;;  %v3799_v39 = vpop.permute.xlu2 %3798 }
 0x150   : > { %v3801_v62 = vunpack.i.h.bf16 %v3799_v39  ;;  %v3800_v9 = vunpack.i.l.bf16 %v3799_v39  ;;  %v7240_v39 = vld [vmem:[#allocation32_spill] sm:$0xff] }
 0x151   : > { %3938 = vrot.lane.b32.xlu2 %v3937_v24, %s4226_s10  ;;  %v3630_v25 = vunpack.i.l.bf16 %v7240_v39 }
 0x152   : > { %3933 = vrot.lane.b32.xlu1 %v3932_v55, %s4226_s10  ;;  %v3794_v49 = vpop.permute.xlu1 %3793  ;;  %v7236_v55 = vld [vmem:[#allocation38_spill] sm:$0xff] }
 0x153   : > { %v3796_v54 = vunpack.i.h.bf16 %v3794_v49  ;;  %v3795_v13 = vunpack.i.l.bf16 %v3794_v49  ;;  %v694_v6 = vsel %vm232_vm0, %v693_v30, %v7236_v55  ;;  %v7238_v49 = vld [vmem:[#allocation36_spill] sm:$0xff] }
 0x156   : > { %v3789_v57 = vpop.permute.xlu0 %3788 }
 0x157   : > { %3958 = vrot.lane.b32.xlu0 %v3957_v36, %s4226_s10  ;;  %v3791_v15 = vunpack.i.h.bf16 %v3789_v57  ;;  %v3790_v24 = vunpack.i.l.bf16 %v3789_v57  ;;  %v5787_v55 = vpop.permute.xlu2 %3813 }
 0x158   : > { %7245 = vst [vmem:[#allocation9_spill] sm:$0xff] %v5787_v55 }
 0x159   : > { %3953 = vrot.lane.b32.xlu2 %v3952_v29, %s4226_s10  ;;  %v884_v36 = vsel %vm512_vm2, %v806_v53, %v3791_v15  ;;  %v877_v29 = vsel %vm512_vm2, %v694_v6, %v3790_v24  ;;  %v3987_v15 = vpack.i.bf16 %v5604_v31, %v5678_v34 }
 0x15a   : > { %3948 = vrot.lane.b32.xlu1 %v3947_v48, %s4226_s10  ;;  %v3625_v48 = vunpack.i.l.bf16 %v7238_v49  ;;  %v885_v37 = vsel %vm514_vm3, %v884_v36, %v3796_v54  ;;  %v878_v26 = vsel %vm514_vm3, %v877_v29, %v3795_v13  ;;  %v7242_v54 = vld [vmem:[#allocation34_spill] sm:$0xff]  ;;  %v7243_v13 = vld [vmem:[#allocation37_spill] sm:$0xff]  ;;  %v3992_v36 = vpack.i.bf16 %v5695_v1, %v5601_v46 }
 0x15b   : > { %v879_v30 = vsel %vm516_vm4, %v878_v26, %v3800_v9  ;;  %v886_v33 = vsel %vm516_vm4, %v885_v37, %v3801_v62  ;;  %v3640_v57 = vunpack.i.l.bf16 %v7243_v13  ;;  %v3982_v62 = vpack.i.bf16 %v5675_v21, %v5646_v28 }
 0x15c   : > { %v519_v35 = vsel %vm518_vm5, %v7242_v54, %v3625_v48  ;;  %v4002_v28 = vpack.i.bf16 %v5754_v63, %v5611_v18  ;;  %v3626_v37 = vunpack.i.h.bf16 %v7238_v49  ;;  %v3631_v26 = vunpack.i.h.bf16 %v7240_v39 }
 0x15d   : > { %v521_v61 = vsel %vm520_vm7, %v519_v35, %v3630_v25  ;;  %v3641_v49 = vunpack.i.h.bf16 %v7243_v13 }
 0x15e   : > { %v523_v24 = vsel %vm522_vm8, %v521_v61, %v3635_v11 }
 0x15f   : > { %3973 = vrot.lane.b32.xlu0 %v3972_v17, %s4218_s29  ;;  %v3977_v17 = vpack.i.bf16 %v5639_v50, %v5546_v23  ;;  %v5785_v53 = vsel %vm524_vm9, %v523_v24, %v3640_v57  ;;  %v3997_v50 = vpack.i.bf16 %v5573_v43, %v5700_v44  ;;  %v3834_v29 = vpop.permute.xlu2 %3833  ;;  %v3636_v43 = vunpack.i.h.bf16 %v7241_v32 }
 0x160   : > { %7244 = vst [vmem:[#allocation18_spill] sm:$0xff] %v5785_v53  ;;  %v3836_v32 = vunpack.i.h.bf16 %v3834_v29  ;;  %v3835_v35 = vunpack.i.l.bf16 %v3834_v29  ;;  %v7258_v29 = vld [vmem:[#allocation39_spill] sm:$0xff] }
 0x161   : > { %3968 = vrot.lane.b32.xlu2 %v3967_v42, %s4218_s29 }
 0x162   : > { %3963 = vrot.lane.b32.xlu1 %v3962_v45, %s4226_s10 }
 0x165   : > { %v5804_v48 = vpop.permute.xlu1 %3808 }
 0x166   : > { %7248 = vst [vmem:[#allocation14_spill] sm:$0xff] %v5804_v48 }
 0x167   : > { %3988 = vrot.lane.b32.xlu0 %v3987_v15, %s4218_s29  ;;  %v3804_v6 = vpop.permute.xlu0 %3803 }
 0x168   : > { %v3806_v31 = vunpack.i.h.bf16 %v3804_v6  ;;  %v3805_v34 = vunpack.i.l.bf16 %v3804_v6 }
 0x169   : > { %3983 = vrot.lane.b32.xlu2 %v3982_v62, %s4218_s29 }
 0x16a   : > { %3978 = vrot.lane.b32.xlu1 %v3977_v17, %s4218_s29  ;;  %v5794_v9 = vsel %vm518_vm5, %v879_v30, %v3805_v34  ;;  %v5797_v23 = vsel %vm518_vm5, %v886_v33, %v3806_v31  ;;  %v7250_v30 = vld [vmem:[#allocation35_spill] sm:$0xff]  ;;  %v5815_v1 = vpop.permute.xlu2 %3848  ;;  %v7252_v33 = vld [vmem:[#allocation29_spill] sm:$0xff] }
 0x16b   : > { %7246 = vst [vmem:[#allocation5_spill] sm:$0xff] %v5794_v9  ;;  %v529_v46 = vsel %vm518_vm5, %v7250_v30, %v3626_v37  ;;  %v3735_v37 = vunpack.i.l.bf16 %v7258_v29  ;;  %v3741_v30 = vunpack.i.h.bf16 %v5235_v59 }
 0x16c   : > { %7247 = vst [vmem:[#allocation6_spill] sm:$0xff] %v5797_v23  ;;  %v530_v25 = vsel %vm520_vm7, %v529_v46, %v3631_v26 }
 0x16d   : > { %7251 = vst [vmem:[#allocation22_spill] sm:$0xff] %v5815_v1  ;;  %v531_v54 = vsel %vm522_vm8, %v530_v25, %v3636_v43  ;;  %v1582_v46 = vsel %vm520_vm7, %v5260_v12, %v3735_v37 }
 0x16e   : > { %v5831_v17 = vsel %vm524_vm9, %v531_v54, %v3641_v49  ;;  %v3746_v49 = vunpack.i.h.bf16 %v5296_v14 }
 0x16f   : > { %4003 = vrot.lane.b32.xlu0 %v4002_v28, %s4218_s29  ;;  %v5807_v18 = vpop.permute.xlu0 %3818  ;;  %7253 = vst [vmem:[#allocation26_spill] sm:$0xff] %v5831_v17 }
 0x170   : > { %7249 = vst [vmem:[#allocation10_spill] sm:$0xff] %v5807_v18 }
 0x171   : > { %3998 = vrot.lane.b32.xlu2 %v3997_v50, %s4218_s29 }
 0x172   : > { %3993 = vrot.lane.b32.xlu1 %v3992_v36, %s4218_s29  ;;  %s3409_s29 = scalar_lea.hbm %s7033_s2, %s3524_s25 }
 0x174   : > { %v3829_v42 = vpop.permute.xlu1 %3828 }
 0x175   : > { %v3831_v11 = vunpack.i.h.bf16 %v3829_v42  ;;  %v3830_v39 = vunpack.i.l.bf16 %v3829_v42  ;;  %v3736_v42 = vunpack.i.h.bf16 %v7258_v29 }
 0x179   : > { %v3824_v44 = vpop.permute.xlu0 %3823 }
 0x17a   : > { %4008 = vrot.lane.b32.xlu1 %v7252_v33, %s4226_s10  ;;  %v3826_v3 = vunpack.i.h.bf16 %v3824_v44  ;;  %v3825_v45 = vunpack.i.l.bf16 %v3824_v44  ;;  %v3740_v44 = vunpack.i.l.bf16 %v5235_v59 }
 0x17c   : > { %v1226_v61 = vsel %vm512_vm2, %v5597_v5, %v3826_v3  ;;  %v1219_v57 = vsel %vm512_vm2, %v5593_v58, %v3825_v45  ;;  %v1583_v33 = vsel %vm522_vm8, %v1582_v46, %v3740_v44  ;;  %v1589_v3 = vsel %vm520_vm7, %v5252_v38, %v3736_v42 }
 0x17d   : > { %v1227_v15 = vsel %vm514_vm3, %v1226_v61, %v3831_v11  ;;  %v1220_v24 = vsel %vm514_vm3, %v1219_v57, %v3830_v39  ;;  %v1590_v25 = vsel %vm522_vm8, %v1589_v3, %v3741_v30  ;;  %v3745_v11 = vunpack.i.l.bf16 %v5296_v14 }
 0x17e   : > { %v1221_v62 = vsel %vm516_vm4, %v1220_v24, %v3835_v35  ;;  %v1228_v13 = vsel %vm516_vm4, %v1227_v15, %v3836_v32  ;;  %v5863_v57 = vsel %vm524_vm9, %v1590_v25, %v3746_v49  ;;  %v2445_v30 = vrot.slane %v5675_v21, 4 }
 0x17f   : > { %v5860_v12 = vsel %vm524_vm9, %v1583_v33, %v3745_v11  ;;  %7261 = vst [vmem:[#allocation13_spill] sm:$0xff] %v5863_v57 }
 0x180   : > { %7260 = vst [vmem:[#allocation17_spill] sm:$0xff] %v5860_v12 }
 0x183   : > { %v3864_v6 = vpop.permute.xlu2 %3863  ;;  %v5847_v43 = vpop.permute.xlu1 %3843 }
 0x184   : > { %7259 = vst [vmem:[#allocation28_spill] sm:$0xff] %v5847_v43  ;;  %v3866_v59 = vunpack.i.h.bf16 %v3864_v6  ;;  %v3865_v61 = vunpack.i.l.bf16 %v3864_v6 }
 0x185   : > { %v3839_v31 = vpop.permute.xlu0 %3838 }
 0x186   : > { %v3841_v34 = vunpack.i.h.bf16 %v3839_v31  ;;  %v3840_v28 = vunpack.i.l.bf16 %v3839_v31 }
 0x188   : > { %v5834_v5 = vsel %vm518_vm5, %v1221_v62, %v3840_v28  ;;  %v5837_v58 = vsel %vm518_vm5, %v1228_v13, %v3841_v34 }
 0x189   : > { %7254 = vst [vmem:[#allocation16_spill] sm:$0xff] %v5834_v5 }
 0x18a   : > { %7255 = vst [vmem:[#allocation30_spill] sm:$0xff] %v5837_v58 }
 0x18b   : > { %v5839_v50 = vpop.permute.xlu2 %3878 }
 0x18c   : > { %7256 = vst [vmem:[#allocation8_spill] sm:$0xff] %v5839_v50 }
 0x18d   : > { %v5841_v36 = vpop.permute.xlu0 %3853 }
 0x18e   : > { %7257 = vst [vmem:[#allocation7_spill] sm:$0xff] %v5841_v36 }
 0x193   : > { %v5844_v26 = vpop.permute.xlu2 %3893 }
 0x199   : > { %v3869_v45 = vpop.permute.xlu0 %3868 }
 0x19a   : > { %v3871_v38 = vunpack.i.h.bf16 %v3869_v45  ;;  %v3870_v15 = vunpack.i.l.bf16 %v3869_v45  ;;  %v5886_v45 = vperm.slane %v5616_v40, %v4310_v7 }
 0x19b   : > { %v3909_v39 = vpop.permute.xlu2 %3908 }
 0x19c   : > { %v3859_v54 = vpop.permute.xlu1 %3858  ;;  %v3911_v29 = vunpack.i.h.bf16 %v3909_v39  ;;  %v3910_v37 = vunpack.i.l.bf16 %v3909_v39  ;;  %7265 = vst [vmem:[#allocation19_spill] sm:$0xff] %v5886_v45  ;;  %v5890_v39 = vperm.slane %v5620_v56, %v4310_v7  ;;  %v5905_v56 = vperm.slane %v5579_v22, %v4310_v7 }
 0x19d   : > { %v3861_v32 = vunpack.i.h.bf16 %v3859_v54  ;;  %v3860_v35 = vunpack.i.l.bf16 %v3859_v54  ;;  %v5894_v54 = vperm.slane %v5650_v41, %v4310_v7  ;;  %v5909_v41 = vperm.slane %v5568_v52, %v4310_v7 }
 0x19e   : > { %v2106_v33 = vrot.slane %v3911_v29, 4  ;;  %v1994_v3 = vrot.slane %v3910_v37, 4 }
 0x19f   : > { %v1927_v24 = vsel %vm512_vm2, %v5740_v10, %v3861_v32  ;;  %v1920_v14 = vsel %vm512_vm2, %v5736_v51, %v3860_v35  ;;  %v2446_v32 = vsel %vm232_vm0, %v2445_v30, %v5754_v63  ;;  %7266 = vst [vmem:[#allocation11_spill] sm:$0xff] %v5909_v41  ;;  %v3895_v30 = vunpack.i.l.bf16 %v5844_v26 }
 0x1a0   : > { %v1928_v62 = vsel %vm514_vm3, %v1927_v24, %v3866_v59  ;;  %v1921_v13 = vsel %vm514_vm3, %v1920_v14, %v3865_v61  ;;  %v5924_v52 = vperm.slane %v2446_v32, %v4310_v7 }
 0x1a1   : > { %v5871_v31 = vpop.permute.xlu0 %3883  ;;  %v1922_v6 = vsel %vm516_vm4, %v1921_v13, %v3870_v15  ;;  %v1929_v34 = vsel %vm516_vm4, %v1928_v62, %v3871_v38  ;;  %v5917_v13 = vperm.slane %v5659_v47, %v4310_v7  ;;  %v3896_v47 = vunpack.i.h.bf16 %v5844_v26 }
 0x1a2   : > { %7262 = vst [vmem:[#allocation21_spill] sm:$0xff] %v5871_v31 }
 0x1a3   : > { %v5875_v28 = vpop.permute.xlu2 %3923  ;;  %7268 = vst [vmem:[#allocation38_spill] sm:$0xff] %v5917_v13 }
 0x1a4   : > { %v3874_v42 = vpop.permute.xlu1 %3873  ;;  %v3925_v35 = vunpack.i.l.bf16 %v5875_v28 }
 0x1a5   : > { %v3876_v44 = vunpack.i.h.bf16 %v3874_v42  ;;  %v3875_v10 = vunpack.i.l.bf16 %v3874_v42 }
 0x1a7   : > { %v5879_v51 = vsel %vm518_vm5, %v1922_v6, %v3875_v10  ;;  %v5882_v46 = vsel %vm518_vm5, %v1929_v34, %v3876_v44  ;;  %v5928_v44 = vperm.slane %v5709_v2, %v4310_v7 }
 0x1a8   : > { %7263 = vst [vmem:[#allocation23_spill] sm:$0xff] %v5879_v51 }
 0x1a9   : > { %7264 = vst [vmem:[#allocation31_spill] sm:$0xff] %v5882_v46  ;;  %v3899_v25 = vpop.permute.xlu0 %3898 }
 0x1aa   : > { %v3901_v49 = vunpack.i.h.bf16 %v3899_v25  ;;  %v3900_v11 = vunpack.i.l.bf16 %v3899_v25 }
 0x1ab   : > { %v5899_v59 = vpop.permute.xlu2 %3938 }
 0x1ac   : > { %v2107_v40 = vsel %vm232_vm0, %v2106_v33, %v3901_v49  ;;  %v2108_v61 = vrot.slane %v3901_v49, 4  ;;  %v1995_v38 = vsel %vm232_vm0, %v1994_v3, %v3900_v11  ;;  %v1996_v15 = vrot.slane %v3900_v11, 4  ;;  %v5912_v14 = vpop.permute.xlu1 %3888 }
 0x1ad   : > { %7267 = vst [vmem:[#allocation15_spill] sm:$0xff] %v5912_v14  ;;  %v5936_v33 = vperm.slane %v5704_v60, %v4310_v7  ;;  %v5940_v3 = vperm.slane %v5716_v20, %v4310_v7  ;;  %v1984_v49 = vrot.slane %v3895_v30, 4  ;;  %v3940_v26 = vunpack.i.l.bf16 %v5899_v59 }
 0x1ae   : > { %v2109_v6 = vsel %vm232_vm0, %v3911_v29, %v2108_v61  ;;  %v1997_v34 = vsel %vm232_vm0, %v3910_v37, %v1996_v15  ;;  %v2006_v29 = vrot.slane %v3925_v35, 4  ;;  %v2096_v37 = vrot.slane %v3896_v47, 4 }
 0x1af   : > { %7269 = vst [vmem:[#allocation36_spill] sm:$0xff] %v5940_v3  ;;  %v5952_v15 = vperm.slane %v2109_v6, %v4310_v7  ;;  %v5955_v20 = vperm.slane %v1997_v34, %v4310_v7  ;;  %v5983_v18 = vperm.slane %v2107_v40, %v4310_v7  ;;  %v3143_v2 = vrot.slane %v3940_v26, 4 }
 0x1b1   : > { %v5943_v25 = vpop.permute.xlu0 %3913  ;;  %7270 = vst [vmem:[#allocation24_spill] sm:$0xff] %v5952_v15 }
 0x1b2   : > { %v3915_v32 = vunpack.i.l.bf16 %v5943_v25  ;;  %7271 = vst [vmem:[#allocation32_spill] sm:$0xff] %v5955_v20  ;;  %v7281_v48 = vunpack.i.h.bf16 %v5943_v25  ;;  %v7297_v21 = vunpack.i.h.bf16 %v5943_v25 }
 0x1b3   : > { %v5957_v10 = vpop.permute.xlu2 %3953  ;;  %7274 = vst [vmem:[#allocation37_spill] sm:$0xff] %v5983_v18 }
 0x1b4   : > { %v2007_v11 = vsel %vm232_vm0, %v2006_v29, %v3915_v32  ;;  %v2008_v24 = vrot.slane %v3915_v32, 4  ;;  %v3904_v6 = vpop.permute.xlu1 %3903  ;;  %v2154_v29 = vrot.slane %v5952_v15, 4  ;;  %v2042_v32 = vrot.slane %v5955_v20, 4 }
 0x1b5   : > { %v3906_v62 = vunpack.i.h.bf16 %v3904_v6  ;;  %v3905_v22 = vunpack.i.l.bf16 %v3904_v6  ;;  %v3955_v40 = vunpack.i.l.bf16 %v5957_v10 }
 0x1b6   : > { %v2009_v34 = vsel %vm232_vm0, %v3925_v35, %v2008_v24 }
 0x1b7   : > { %v2094_v42 = vrot.slane %v3906_v62, 4  ;;  %v2097_v61 = vsel %vm232_vm0, %v3906_v62, %v2096_v37  ;;  %v1982_v53 = vrot.slane %v3905_v22, 4  ;;  %v1985_v60 = vsel %vm232_vm0, %v3905_v22, %v1984_v49 }
 0x1b8   : > { %v5975_v24 = vperm.slane %v2097_v61, %v4310_v7  ;;  %v5978_v6 = vperm.slane %v1985_v60, %v4310_v7  ;;  %v5989_v49 = vperm.slane %v1995_v38, %v4310_v7  ;;  %v3956_v38 = vunpack.i.h.bf16 %v5957_v10 }
 0x1b9   : > { %v5980_v17 = vpop.permute.xlu0 %3928  ;;  %v2095_v62 = vsel %vm232_vm0, %v2094_v42, %v3896_v47  ;;  %v1983_v37 = vsel %vm232_vm0, %v1982_v53, %v3895_v30  ;;  %v6007_v30 = vperm.slane %v2007_v11, %v4310_v7  ;;  %v7280_v11 = vunpack.i.h.bf16 %v5899_v59 }
 0x1ba   : > { %7272 = vst [vmem:[#allocation33_spill] sm:$0xff] %v5975_v24  ;;  %v3930_v22 = vunpack.i.l.bf16 %v5980_v17  ;;  %v5993_v61 = vsel %vm232_vm0, %v2042_v32, %v5978_v6  ;;  %v6002_v53 = vsel %vm232_vm0, %v2154_v29, %v5975_v24  ;;  %v6010_v32 = vperm.slane %v2009_v34, %v4310_v7 }
 0x1bb   : > { %7273 = vst [vmem:[#allocation34_spill] sm:$0xff] %v5978_v6  ;;  %v5996_v35 = vpop.permute.xlu2 %3968  ;;  %v7279_v29 = vunpack.i.h.bf16 %v5875_v28  ;;  %v3017_v23 = vrot.slane %v7280_v11, 4  ;;  %v6026_v10 = vrot.slane %v7281_v48, 4  ;;  %v6029_v42 = vperm.slane %v2095_v62, %v4310_v7 }
 0x1bc   : > { %7275 = vst [vmem:[#allocation35_spill] sm:$0xff] %v5989_v49  ;;  %v6012_v60 = vpop.permute.xlu1 %3918  ;;  %v3141_v12 = vrot.slane %v3930_v22, 4  ;;  %v3144_v9 = vsel %vm232_vm0, %v3930_v22, %v3143_v2  ;;  %v6032_v57 = vperm.slane %v1983_v37, %v4310_v7  ;;  %v3155_v11 = vrot.slane %v3955_v40, 4 }
 0x1bd   : > { %7276 = vst [vmem:[#allocation29_spill] sm:$0xff] %v5993_v61  ;;  %v3029_v55 = vrot.slane %v7279_v29, 4  ;;  %v3055_v29 = vrot.slane %v3956_v38, 4  ;;  %v6042_v62 = vperm.slane %v3144_v9, %v4310_v7  ;;  %v7284_v47 = vunpack.i.h.bf16 %v5980_v17 }
 0x1be   : > { %7277 = vst [vmem:[#allocation39_spill] sm:$0xff] %v6002_v53  ;;  %v3142_v48 = vsel %vm232_vm0, %v3141_v12, %v3940_v26 }
 0x1bf   : > { %7278 = vst [vmem:[#allocation40_spill] sm:$0xff] %v6007_v30  ;;  %v3041_v1 = vrot.slane %v7284_v47, 4  ;;  %v6056_v2 = vperm.slane %v3142_v48, %v4310_v7  ;;  %v7285_v47 = vunpack.i.h.bf16 %v5996_v35  ;;  %v7287_v48 = vunpack.i.l.bf16 %v6012_v60 }
 0x1c0   : > { %7282 = vst [vmem:[#allocation41_spill] sm:$0xff] %v6029_v42 }
 0x1c1   : > { %7283 = vst [vmem:[#allocation42_spill] sm:$0xff] %v6032_v57  ;;  %v6036_v58 = vpop.permute.xlu0 %3943  ;;  %v6061_v36 = vrot.slane %v7285_v47, 4  ;;  %v6072_v34 = vrot.slane %v7287_v48, 4 }
 0x1c2   : > { %v3946_v37 = vunpack.i.h.bf16 %v6036_v58 }
 0x1c3   : > { %v6050_v43 = vpop.permute.xlu2 %3983 }
 0x1c4   : > { %v3053_v26 = vrot.slane %v3946_v37, 4  ;;  %v3056_v9 = vsel %vm232_vm0, %v3946_v37, %v3055_v29  ;;  %v3934_v31 = vpop.permute.xlu1 %3933  ;;  %v7286_v29 = vunpack.i.h.bf16 %v6012_v60  ;;  %v7291_v6 = vunpack.i.h.bf16 %v6050_v43 }
 0x1c5   : > { %v3936_v12 = vunpack.i.h.bf16 %v3934_v31  ;;  %v3935_v51 = vunpack.i.l.bf16 %v3934_v31  ;;  %v6075_v50 = vperm.slane %v3056_v9, %v4310_v7  ;;  %v7289_v9 = vunpack.i.l.bf16 %v5996_v35 }
 0x1c6   : > { %v3054_v22 = vsel %vm232_vm0, %v3053_v26, %v3956_v38  ;;  %v6068_v37 = vrot.slane %v7286_v29, 4  ;;  %v7288_v29 = vunpack.i.l.bf16 %v6036_v58  ;;  %v6101_v53 = vrot.slane %v7291_v6, 4 }
 0x1c7   : > { %v3030_v5 = vsel %vm232_vm0, %v3029_v55, %v3936_v12  ;;  %v3031_v46 = vrot.slane %v3936_v12, 4  ;;  %v3153_v14 = vrot.slane %v3935_v51, 4  ;;  %v6082_v26 = vperm.slane %v3054_v22, %v4310_v7 }
 0x1c8   : > { %v6086_v48 = vrot.slane %v7288_v29, 4  ;;  %v6090_v24 = vrot.slane %v7289_v9, 4  ;;  %v7290_v55 = vunpack.i.h.bf16 %v5875_v28  ;;  %v3156_v38 = vsel %vm232_vm0, %v3935_v51, %v3155_v11 }
 0x1c9   : > { %v3959_v15 = vpop.permute.xlu0 %3958  ;;  %v3036_v20 = vperm.slane %v3030_v5, %v4310_v7  ;;  %v3154_v29 = vsel %vm232_vm0, %v3153_v14, %v3955_v40  ;;  %v6115_v14 = vperm.slane %v3156_v38, %v4310_v7  ;;  %v7293_v11 = vunpack.i.h.bf16 %v5899_v59 }
 0x1ca   : > { %v3032_v12 = vsel %vm232_vm0, %v7290_v55, %v3031_v46  ;;  %v3961_v47 = vunpack.i.h.bf16 %v3959_v15  ;;  %v3960_v31 = vunpack.i.l.bf16 %v3959_v15  ;;  %v7292_v46 = vunpack.i.l.bf16 %v6050_v43 }
 0x1cb   : > { %v6108_v51 = vpop.permute.xlu2 %3998  ;;  %v6112_v5 = vperm.slane %v3032_v12, %v4310_v7  ;;  %v3065_v18 = vrot.slane %v3036_v20, 4 }
 0x1cc   : > { %v3018_v9 = vsel %vm232_vm0, %v3017_v23, %v3961_v47  ;;  %v3019_v61 = vrot.slane %v3961_v47, 4  ;;  %v3167_v28 = vrot.slane %v3960_v31, 4  ;;  %v6106_v55 = vrot.slane %v7292_v46, 4  ;;  %v3949_v40 = vpop.permute.xlu1 %3948 }
 0x1cd   : > { %v3024_v6 = vperm.slane %v3018_v9, %v4310_v7  ;;  %v3160_v23 = vperm.slane %v3154_v29, %v4310_v7  ;;  %v3951_v46 = vunpack.i.h.bf16 %v3949_v40  ;;  %v3950_v22 = vunpack.i.l.bf16 %v3949_v40 }
 0x1ce   : > { %v3020_v47 = vsel %vm232_vm0, %v7293_v11, %v3019_v61  ;;  %v3215_v29 = vrot.slane %v6115_v14, 4  ;;  %v7295_v45 = vunpack.i.h.bf16 %v6108_v51  ;;  %v7296_v12 = vunpack.i.l.bf16 %v6108_v51 }
 0x1cf   : > { %v3067_v42 = vrot.slane %v3024_v6, 4  ;;  %v3043_v30 = vrot.slane %v3951_v46, 4  ;;  %v3042_v38 = vsel %vm232_vm0, %v3041_v1, %v3951_v46  ;;  %v3165_v49 = vrot.slane %v3950_v22, 4 }
 0x1d0   : > { %v3168_v9 = vsel %vm232_vm0, %v3950_v22, %v3167_v28  ;;  %v6128_v59 = vperm.slane %v3020_v47, %v4310_v7  ;;  %v3048_v61 = vperm.slane %v3042_v38, %v4310_v7  ;;  %v3203_v15 = vrot.slane %v3160_v23, 4 }
 0x1d1   : > { %v6132_v40 = vperm.slane %v3168_v9, %v4310_v7  ;;  %v6134_v11 = vpop.permute.xlu0 %3973  ;;  %v7294_v1 = vunpack.i.h.bf16 %v5980_v17  ;;  %v3166_v22 = vsel %vm232_vm0, %v3165_v49, %v3960_v31  ;;  %v3066_v9 = vsel %vm232_vm0, %v3065_v18, %v3024_v6 }
 0x1d2   : > { %v3091_v28 = vrot.slane %v3048_v61, 4  ;;  %v3172_v47 = vperm.slane %v3166_v22, %v4310_v7  ;;  %v7120_v57 = vunpack.i.h.bf16 %v6134_v11  ;;  %v7121_v38 = vunpack.i.l.bf16 %v6134_v11 }
 0x1d3   : > { %v3044_v46 = vsel %vm232_vm0, %v7294_v1, %v3043_v30  ;;  %v2825_v4 = vrot.slane %v7295_v45, 4  ;;  %v2713_v16 = vrot.slane %v7296_v12, 4  ;;  %v3068_v17 = vsel %vm232_vm0, %v3036_v20, %v3067_v42 }
 0x1d4   : > { %v6152_v49 = vperm.slane %v3044_v46, %v4310_v7  ;;  %v6157_v1 = vsel %vm232_vm0, %v6132_v40, %v3215_v29  ;;  %v3964_v18 = vpop.permute.xlu1 %3963  ;;  %v3092_v45 = vsel %vm232_vm0, %v6082_v26, %v3091_v28  ;;  %v3204_v12 = vsel %vm232_vm0, %v3172_v47, %v3203_v15 }
 0x1d5   : > { %v3966_v6 = vunpack.i.h.bf16 %v3964_v18  ;;  %v3965_v22 = vunpack.i.l.bf16 %v3964_v18  ;;  %v3201_v20 = vrot.slane %v3172_v47, 4  ;;  %v6164_v42 = vrot.slane %v7120_v57, 4 }
 0x1d6   : > { %v6168_v46 = vrot.slane %v7121_v38, 4  ;;  %v6171_v29 = vperm.slane %v3068_v17, %v4312_v8  ;;  %v6182_v38 = vperm.slane %v3092_v45, %v4312_v8  ;;  %v6185_v17 = vperm.slane %v3204_v12, %v4312_v8 }
 0x1d7   : > { %v2118_v30 = vrot.slane %v3966_v6, 4  ;;  %v2121_v18 = vsel %vm232_vm0, %v3966_v6, %v6026_v10  ;;  %v3130_v28 = vsel %vm232_vm0, %v6086_v48, %v3965_v22  ;;  %v3131_v15 = vrot.slane %v3965_v22, 4 }
 0x1d8   : > { %v6179_v31 = vperm.slane %v2121_v18, %v4310_v7  ;;  %v6191_v48 = vperm.slane %v3066_v9, %v4312_v8  ;;  %v7298_v22 = vunpack.i.l.bf16 %v6036_v58  ;;  %v3136_v47 = vperm.slane %v3130_v28, %v4310_v7 }
 0x1d9   : > { %v3989_v57 = vpop.permute.xlu0 %3988  ;;  %v2119_v10 = vsel %vm232_vm0, %v2118_v30, %v7297_v21  ;;  %v7299_v45 = vrot.slane %v6082_v26, 4  ;;  %v6201_v13 = vsel %vm232_vm0, %v3201_v20, %v3160_v23  ;;  %v3117_v28 = vrot.slane %v6182_v38, 4 }
 0x1da   : > { %v3991_v6 = vunpack.i.h.bf16 %v3989_v57  ;;  %v3990_v63 = vunpack.i.l.bf16 %v3989_v57  ;;  %v3132_v18 = vsel %vm232_vm0, %v7298_v22, %v3131_v15  ;;  %v6206_v30 = vperm.slane %v2119_v10, %v4310_v7 }
 0x1db   : > { %v3090_v12 = vsel %vm232_vm0, %v7299_v45, %v3048_v61  ;;  %v3229_v26 = vrot.slane %v6185_v17, 4  ;;  %v6212_v61 = vperm.slane %v3132_v18, %v4310_v7  ;;  %v7301_v22 = vunpack.i.l.bf16 %v6108_v51 }
 0x1dc   : > { %v2823_v25 = vrot.slane %v3991_v6, 4  ;;  %v2711_v21 = vrot.slane %v3990_v63, 4  ;;  %v2714_v57 = vsel %vm232_vm0, %v3990_v63, %v2713_v16  ;;  %7300 = vst [vmem:[#allocation43_spill] sm:$0xff] %v6206_v30  ;;  %v3979_v15 = vpop.permute.xlu1 %3978  ;;  %v7302_v63 = vrot.slane %v6056_v2, 4 }
 0x1dd   : > { %v3981_v23 = vunpack.i.h.bf16 %v3979_v15  ;;  %v3980_v20 = vunpack.i.l.bf16 %v3979_v15  ;;  %v6221_v45 = vperm.slane %v2714_v57, %v4310_v7  ;;  %v7303_v58 = vunpack.i.h.bf16 %v6108_v51 }
 0x1de   : > { %v2712_v16 = vsel %vm232_vm0, %v2711_v21, %v7301_v22  ;;  %v3178_v10 = vsel %vm232_vm0, %v7302_v63, %v3136_v47  ;;  %v2826_v18 = vsel %vm232_vm0, %v3991_v6, %v2825_v4  ;;  %v3179_v63 = vrot.slane %v3136_v47, 4 }
 0x1df   : > { %v2824_v9 = vsel %vm232_vm0, %v2823_v25, %v7303_v58  ;;  %v2800_v15 = vsel %vm232_vm0, %v6061_v36, %v3981_v23  ;;  %v2801_v3 = vrot.slane %v3981_v23, 4  ;;  %v2688_v21 = vsel %vm232_vm0, %v6090_v24, %v3980_v20 }
 0x1e0   : > { %v2689_v22 = vrot.slane %v3980_v20, 4  ;;  %v6233_v57 = vperm.slane %v2800_v15, %v4310_v7  ;;  %v6236_v51 = vperm.slane %v2712_v16, %v4310_v7  ;;  %v7304_v6 = vunpack.i.h.bf16 %v5996_v35 }
 0x1e1   : > { %v4004_v25 = vpop.permute.xlu0 %4003  ;;  %v7305_v58 = vunpack.i.l.bf16 %v5996_v35  ;;  %v6246_v47 = vperm.slane %v2688_v21, %v4310_v7  ;;  %v6250_v16 = vperm.slane %v2824_v9, %v4310_v7  ;;  %v6253_v15 = vperm.slane %v2826_v18, %v4310_v7 }
 0x1e2   : > { %v2802_v36 = vsel %vm232_vm0, %v7304_v6, %v2801_v3  ;;  %v4006_v23 = vunpack.i.h.bf16 %v4004_v25  ;;  %v2835_v6 = vrot.slane %v6233_v57, 4  ;;  %v3180_v9 = vsel %vm232_vm0, %v6056_v2, %v3179_v63 }
 0x1e3   : > { %v2690_v24 = vsel %vm232_vm0, %v7305_v58, %v2689_v22  ;;  %v6256_v41 = vperm.slane %v2802_v36, %v4310_v7  ;;  %v4005_v22 = vunpack.i.l.bf16 %v4004_v25  ;;  %v7306_v18 = vunpack.i.h.bf16 %v6050_v43 }
 0x1e4   : > { %v2788_v3 = vsel %vm232_vm0, %v6101_v53, %v4006_v23  ;;  %v2789_v35 = vrot.slane %v4006_v23, 4  ;;  %v6262_v21 = vperm.slane %v2690_v24, %v4310_v7  ;;  %v3188_v25 = vperm.slane %v3180_v9, %v4312_v8  ;;  %v3994_v23 = vpop.permute.xlu1 %3993 }
 0x1e5   : > { %v6271_v20 = vperm.slane %v2788_v3, %v4310_v7  ;;  %v2677_v53 = vrot.slane %v4005_v22, 4  ;;  %v2723_v4 = vrot.slane %v6246_v47, 4  ;;  %v2676_v63 = vsel %vm232_vm0, %v6106_v55, %v4005_v22 }
 0x1e6   : > { %v2790_v36 = vsel %vm232_vm0, %v7306_v18, %v2789_v35  ;;  %v3118_v3 = vsel %vm232_vm0, %v3117_v28, %v6171_v29  ;;  %v3230_v35 = vsel %vm232_vm0, %v3229_v26, %v3188_v25  ;;  %v7307_v18 = vunpack.i.l.bf16 %v6050_v43 }
 0x1e7   : > { %v6278_v30 = vperm.slane %v2790_v36, %v4310_v7  ;;  %v6291_v58 = vperm.slane %v3090_v12, %v4312_v8  ;;  %v3115_v36 = vrot.slane %v6191_v48, 4  ;;  %v6296_v2 = vsel %vm232_vm0, %v2835_v6, %v6271_v20 }
 0x1e8   : > { %v2678_v24 = vsel %vm232_vm0, %v7307_v18, %v2677_v53  ;;  %v4017_v28 = vpack.i.bf16 %v3230_v35, %v3118_v3  ;;  %v6300_v26 = vperm.slane %v3178_v10, %v4312_v8  ;;  %v6304_v43 = vperm.slane %v2676_v63, %v4310_v7 }
 0x1e9   : > { %v3996_v53 = vunpack.i.h.bf16 %v3994_v23  ;;  %v3995_v12 = vunpack.i.l.bf16 %v3994_v23  ;;  %v6307_v18 = vperm.slane %v2678_v24, %v4310_v7  ;;  %v6312_v6 = vperm.slane %v6201_v13, %v4312_v8 }
 0x1ea   : > { %7308 = vst [vmem:[#allocation44_spill] sm:$0xff] %v6300_v26  ;;  %4018 = vrot.lane.b32.xlu0 %v4017_v28, %s4221_s5  ;;  %v3227_v3 = vrot.slane %v6300_v26, 4  ;;  %v3231_v10 = vrot.slane %v3188_v25, 4  ;;  %v3116_v35 = vsel %vm232_vm0, %v6291_v58, %v3115_v36  ;;  %v7309_v23 = vrot.slane %v6112_v5, 4 }
 0x1eb   : > { %v2700_v63 = vsel %vm232_vm0, %v6168_v46, %v3995_v12  ;;  %v2701_v22 = vrot.slane %v3995_v12, 4  ;;  %v2813_v13 = vrot.slane %v3996_v53, 4  ;;  %v2812_v9 = vsel %vm232_vm0, %v6164_v42, %v3996_v53 }
 0x1ec   : > { %v3078_v24 = vsel %vm232_vm0, %v7309_v23, %v6128_v59  ;;  %v3228_v28 = vsel %vm232_vm0, %v6312_v6, %v3227_v3  ;;  %v3232_v25 = vsel %vm232_vm0, %v6185_v17, %v3231_v10  ;;  %v6331_v36 = vsel %vm232_vm0, %v2723_v4, %v6304_v43  ;;  %v4009_v4 = vpop.permute.xlu1 %4008 }
 0x1ed   : > { %v4012_v46 = vpack.i.bf16 %v3228_v28, %v3116_v35  ;;  %v7310_v12 = vunpack.i.l.bf16 %v6134_v11  ;;  %v7311_v23 = vrot.slane %v6171_v29, 4  ;;  %v6343_v17 = vperm.slane %v2700_v63, %v4310_v7 }
 0x1ee   : > { %v6347_v10 = vperm.slane %v2812_v9, %v4310_v7  ;;  %v7312_v29 = vrot.slane %v6075_v50, 4  ;;  %v7313_v35 = vrot.slane %v6042_v62, 4 }
 0x1ef   : > { %v2702_v55 = vsel %vm232_vm0, %v7310_v12, %v2701_v22  ;;  %v3120_v3 = vsel %vm232_vm0, %v6182_v38, %v7311_v23  ;;  %4013 = vrot.lane.b32.xlu2 %v4012_v46, %s4220_s4  ;;  %v3084_v22 = vperm.slane %v3078_v24, %v4312_v8  ;;  %v7315_v23 = vrot.slane %v6132_v40, 4 }
 0x1f0   : > { %v4022_v53 = vpack.i.bf16 %v3232_v25, %v3120_v3  ;;  %v3102_v38 = vsel %vm232_vm0, %v7312_v29, %v6152_v49  ;;  %v3190_v63 = vsel %vm232_vm0, %v7313_v35, %v6212_v61  ;;  %v6359_v28 = vperm.slane %v2702_v55, %v4310_v7 }
 0x1f1   : > { %v7314_v25 = vunpack.i.h.bf16 %v6134_v11  ;;  %v3108_v24 = vperm.slane %v3102_v38, %v4312_v8  ;;  %v3196_v46 = vperm.slane %v3190_v63, %v4312_v8  ;;  %v3123_v12 = vrot.slane %v3084_v22, 4 }
 0x1f2   : > { %4023 = vrot.lane.b32.xlu1 %v4022_v53, %s4219_s30  ;;  %v3214_v3 = vsel %vm232_vm0, %v7315_v23, %v6115_v14  ;;  %v4011_v29 = vunpack.i.h.bf16 %v4009_v4  ;;  %v4010_v35 = vunpack.i.l.bf16 %v4009_v4  ;;  %v2340_v38 = vperm.slane %v5671_v19, %v4310_v7 }
 0x1f3   : > { %v2814_v9 = vsel %vm232_vm0, %v7314_v25, %v2813_v13  ;;  %v3220_v11 = vperm.slane %v3214_v3, %v4312_v8  ;;  %v3235_v42 = vrot.slane %v3196_v46, 4  ;;  %v3121_v13 = vrot.slane %v3108_v24, 4 }
 0x1f4   : > { %v6374_v53 = vperm.slane %v2814_v9, %v4310_v7  ;;  %v2018_v63 = vrot.slane %v4010_v35, 4  ;;  %v2021_v25 = vsel %vm232_vm0, %v4010_v35, %v6072_v34  ;;  %v3124_v40 = vsel %vm232_vm0, %v3108_v24, %v3123_v12 }
 0x1f5   : > { %v3236_v14 = vsel %vm232_vm0, %v3220_v11, %v3235_v42  ;;  %v3233_v4 = vrot.slane %v3220_v11, 4  ;;  %v6382_v23 = vperm.slane %v2021_v25, %v4310_v7  ;;  %v2130_v55 = vrot.slane %v4011_v29, 4 }
 0x1f6   : > { %v4032_v3 = vpack.i.bf16 %v3236_v14, %v3124_v40  ;;  %v2133_v9 = vsel %vm232_vm0, %v4011_v29, %v6068_v37  ;;  %v3122_v26 = vsel %vm232_vm0, %v3121_v13, %v3084_v22  ;;  %v7316_v24 = vunpack.i.l.bf16 %v6012_v60 }
 0x1f7   : > { %v3234_v34 = vsel %vm232_vm0, %v3233_v4, %v3196_v46  ;;  %v7317_v12 = vrot.slane %v6010_v32, 4  ;;  %v6402_v19 = vperm.slane %v2133_v9, %v4310_v7  ;;  %v2381_v22 = vrot.slane %v5905_v56, 4 }
 0x1f8   : > { %v2019_v42 = vsel %vm232_vm0, %v2018_v63, %v7316_v24  ;;  %4033 = vrot.lane.b32.xlu0 %v4032_v3, %s4222_s6  ;;  %v4027_v37 = vpack.i.bf16 %v3234_v34, %v3122_v26  ;;  %v2405_v29 = vrot.slane %v5936_v33, 4  ;;  %v2488_v13 = vperm.slane %v5631_v0, %v4310_v7 }
 0x1f9   : > { %v6397_v35 = vsel %vm232_vm0, %v6382_v23, %v7317_v12  ;;  %v7318_v63 = vrot.slane %v5894_v54, 4  ;;  %v6415_v26 = vperm.slane %v2019_v42, %v4310_v7  ;;  %v7319_v40 = vunpack.i.h.bf16 %v6012_v60 }
 0x1fa   : > { %4028 = vrot.lane.b32.xlu2 %v4027_v37, %s4223_s7  ;;  %v7320_v4 = vrot.slane %v6179_v31, 4  ;;  %v2382_v0 = vsel %vm232_vm0, %v2381_v22, %v2340_v38  ;;  %v2406_v34 = vsel %vm232_vm0, %v2405_v29, %v5890_v39  ;;  %v2517_v60 = vrot.slane %v2488_v13, 4 }
 0x1fb   : > { %v2494_v25 = vsel %vm232_vm0, %v7318_v63, %v5924_v52  ;;  %v2131_v14 = vsel %vm232_vm0, %v2130_v55, %v7319_v40  ;;  %v6428_v9 = vperm.slane %v2382_v0, %v4312_v8  ;;  %v6437_v42 = vperm.slane %v2406_v34, %v4312_v8 }
 0x1fc   : > { %v6424_v3 = vsel %vm232_vm0, %v6402_v19, %v7320_v4  ;;  %v6433_v24 = vperm.slane %v2494_v25, %v4312_v8  ;;  %v7323_v12 = vrot.slane %v6152_v49, 4  ;;  %v7324_v22 = vrot.slane %v6212_v61, 4 }
 0x1fd   : > { %7321 = vst [vmem:[#allocation45_spill] sm:$0xff] %v6428_v9  ;;  %v2431_v29 = vrot.slane %v6428_v9, 4  ;;  %v2518_v25 = vsel %vm232_vm0, %v2517_v60, %v5928_v44  ;;  %v7325_v4 = vrot.slane %v6128_v59, 4  ;;  %v6456_v0 = vperm.slane %v2131_v14, %v4310_v7 }
 0x1fe   : > { %7322 = vst [vmem:[#allocation46_spill] sm:$0xff] %v6433_v24  ;;  %v3104_v37 = vsel %vm232_vm0, %v6075_v50, %v7323_v12  ;;  %v3192_v63 = vsel %vm232_vm0, %v6042_v62, %v7324_v22  ;;  %v2543_v40 = vrot.slane %v6433_v24, 4  ;;  %v6459_v50 = vperm.slane %v2518_v25, %v4312_v8 }
 0x1ff   : > { %v3080_v49 = vsel %vm232_vm0, %v6112_v5, %v7325_v4  ;;  %v3112_v62 = vperm.slane %v3104_v37, %v4312_v8  ;;  %v3200_v61 = vperm.slane %v3192_v63, %v4312_v8  ;;  %v2432_v34 = vsel %vm232_vm0, %v6437_v42, %v2431_v29 }
 0x200   : > { %v3224_v60 = vperm.slane %v6157_v1, %v4312_v8  ;;  %v6469_v59 = vperm.slane %v6331_v36, %v4312_v8  ;;  %v7326_v5 = vrot.slane %v6236_v51, 4  ;;  %v2544_v12 = vsel %vm232_vm0, %v6459_v50, %v2543_v40 }
 0x201   : > { %v3088_v37 = vperm.slane %v3080_v49, %v4312_v8  ;;  %v3125_v22 = vrot.slane %v3112_v62, 4  ;;  %v4037_v29 = vpack.i.bf16 %v2544_v12, %v2432_v34  ;;  %v6484_v36 = vperm.slane %v6296_v2, %v4312_v8 }
 0x202   : > { %v2748_v14 = vsel %vm232_vm0, %v7326_v5, %v6343_v17  ;;  %v3237_v1 = vrot.slane %v3224_v60, 4  ;;  %v2773_v25 = vrot.slane %v6469_v59, 4  ;;  %v2054_v4 = vrot.slane %v6415_v26, 4 }
 0x203   : > { %v6479_v63 = vperm.slane %v2748_v14, %v4312_v8  ;;  %v3126_v5 = vsel %vm232_vm0, %v3125_v22, %v3088_v37  ;;  %v7327_v40 = vrot.slane %v6250_v16, 4  ;;  %v2383_v55 = vrot.slane %v2340_v38, 4  ;;  %4038 = vrot.lane.b32.xlu1 %v4037_v29, %s4220_s4 }
 0x204   : > { %v3238_v34 = vsel %vm232_vm0, %v3237_v1, %v3200_v61  ;;  %v2885_v12 = vrot.slane %v6484_v36, 4  ;;  %v7328_v11 = vrot.slane %v5890_v39, 4  ;;  %v2495_v29 = vrot.slane %v5924_v52, 4  ;;  %v7353_v1 = vld [vmem:[#allocation37_spill] sm:$0xff] }
 0x205   : > { %v2860_v49 = vsel %vm232_vm0, %v7327_v40, %v6347_v10  ;;  %v2774_v14 = vsel %vm232_vm0, %v6479_v63, %v2773_v25  ;;  %v4047_v46 = vpack.i.bf16 %v3238_v34, %v3126_v5  ;;  %v2384_v22 = vsel %vm232_vm0, %v5905_v56, %v2383_v55 }
 0x206   : > { %v6497_v2 = vperm.slane %v2860_v49, %v4312_v8  ;;  %v2408_v38 = vsel %vm232_vm0, %v5936_v33, %v7328_v11  ;;  %v2392_v40 = vperm.slane %v2384_v22, %v4312_v8  ;;  %v2496_v39 = vsel %vm232_vm0, %v5894_v54, %v2495_v29 }
 0x207   : > { %v2416_v49 = vperm.slane %v2408_v38, %v4312_v8  ;;  %4048 = vrot.lane.b32.xlu0 %v4047_v46, %s4225_s9  ;;  %v7329_v56 = vrot.slane %v5928_v44, 4  ;;  %v3127_v52 = vrot.slane %v3088_v37, 4  ;;  %v2504_v55 = vperm.slane %v2496_v39, %v4312_v8 }
 0x208   : > { %v2886_v25 = vsel %vm232_vm0, %v6497_v2, %v2885_v12  ;;  %v3239_v12 = vrot.slane %v3200_v61, 4  ;;  %v7330_v46 = vrot.slane %v6304_v43, 4  ;;  %v7331_v44 = vrot.slane %v6343_v17, 4 }
 0x209   : > { %v4042_v5 = vpack.i.bf16 %v2886_v25, %v2774_v14  ;;  %v2520_v33 = vsel %vm232_vm0, %v2488_v13, %v7329_v56  ;;  %v2433_v11 = vrot.slane %v2416_v49, 4  ;;  %v3128_v22 = vsel %vm232_vm0, %v3112_v62, %v3127_v52  ;;  %v7334_v52 = vld [vmem:[#allocation11_spill] sm:$0xff] }
 0x20a   : > { %v2528_v34 = vperm.slane %v2520_v33, %v4312_v8  ;;  %v2726_v54 = vsel %vm232_vm0, %v6246_v47, %v7330_v46  ;;  %v2750_v13 = vsel %vm232_vm0, %v6236_v51, %v7331_v44  ;;  %v7332_v37 = vrot.slane %v6271_v20, 4 }
 0x20b   : > { %4043 = vrot.lane.b32.xlu2 %v4042_v5, %s4220_s4  ;;  %v2434_v61 = vsel %vm232_vm0, %v2433_v11, %v2392_v40  ;;  %v3240_v62 = vsel %vm232_vm0, %v3224_v60, %v3239_v12  ;;  %v2734_v43 = vperm.slane %v2726_v54, %v4312_v8  ;;  %v2758_v47 = vperm.slane %v2750_v13, %v4312_v8  ;;  %v7336_v54 = vld [vmem:[#allocation38_spill] sm:$0xff] }
 0x20c   : > { %v2838_v14 = vsel %vm232_vm0, %v6233_v57, %v7332_v37  ;;  %v2545_v38 = vrot.slane %v2528_v34, 4  ;;  %v4062_v29 = vpack.i.bf16 %v3240_v62, %v3128_v22  ;;  %v7333_v25 = vrot.slane %v6347_v10, 4 }
 0x20d   : > { %v2846_v17 = vperm.slane %v2838_v14, %v4312_v8  ;;  %v2435_v5 = vrot.slane %v2392_v40, 4  ;;  %v2547_v39 = vrot.slane %v2504_v55, 4  ;;  %v2775_v60 = vrot.slane %v2758_v47, 4 }
 0x20e   : > { %v2862_v51 = vsel %vm232_vm0, %v6250_v16, %v7333_v25  ;;  %v2546_v20 = vsel %vm232_vm0, %v2545_v38, %v2504_v55  ;;  %v6547_v33 = vperm.slane %v5636_v27, %v4310_v7  ;;  %v2393_v11 = vrot.slane %v7334_v52, 4  ;;  %v7335_v16 = vld [vmem:[#allocation36_spill] sm:$0xff] }
 0x20f   : > { %v2870_v57 = vperm.slane %v2862_v51, %v4312_v8  ;;  %v4052_v56 = vpack.i.bf16 %v2546_v20, %v2434_v61  ;;  %v2436_v10 = vsel %vm232_vm0, %v2416_v49, %v2435_v5  ;;  %v2548_v22 = vsel %vm232_vm0, %v2528_v34, %v2547_v39  ;;  %4063 = vrot.lane.b32.xlu0 %v4062_v29, %s4224_s8  ;;  %v7337_v34 = vld [vmem:[#allocation27_spill] sm:$0xff]  ;;  %v7339_v61 = vld [vmem:[#allocation12_spill] sm:$0xff] }
 0x210   : > { %v2417_v46 = vrot.slane %v7335_v16, 4  ;;  %v2776_v40 = vsel %vm232_vm0, %v2775_v60, %v2734_v43  ;;  %v4067_v55 = vpack.i.bf16 %v2548_v22, %v2436_v10  ;;  %v2394_v27 = vsel %vm232_vm0, %v2393_v11, %v7336_v54  ;;  %v7341_v20 = vld [vmem:[#allocation20_spill] sm:$0xff] }
 0x211   : > { %v2887_v12 = vrot.slane %v2870_v57, 4  ;;  %4053 = vrot.lane.b32.xlu1 %v4052_v56, %s4221_s5  ;;  %v2777_v44 = vrot.slane %v2734_v43, 4  ;;  %v2400_v37 = vperm.slane %v2394_v27, %v4312_v8  ;;  %v7338_v14 = vrot.slane %v7337_v34, 4  ;;  %v7340_v43 = vld [vmem:[#allocation25_spill] sm:$0xff] }
 0x212   : > { %v2418_v49 = vsel %vm232_vm0, %v2417_v46, %v6547_v33  ;;  %v6572_v51 = vperm.slane %v7340_v43, %v4310_v7  ;;  %v6576_v5 = vperm.slane %v7341_v20, %v4310_v7  ;;  %v2889_v56 = vrot.slane %v2846_v17, 4 }
 0x213   : > { %v2888_v13 = vsel %vm232_vm0, %v2887_v12, %v2846_v17  ;;  %v2448_v38 = vsel %vm232_vm0, %v7339_v61, %v7338_v14  ;;  %v2424_v29 = vperm.slane %v2418_v49, %v4312_v8  ;;  %v2778_v39 = vsel %vm232_vm0, %v2758_v47, %v2777_v44  ;;  %v7344_v47 = vld [vmem:[#allocation19_spill] sm:$0xff] }
 0x214   : > { %v4057_v62 = vpack.i.bf16 %v2888_v13, %v2776_v40  ;;  %v6568_v25 = vperm.slane %v2448_v38, %v4310_v7  ;;  %v7342_v60 = vrot.slane %v6262_v21, 4  ;;  %v2505_v10 = vrot.slane %v6572_v51, 4 }
 0x215   : > { %v2437_v12 = vrot.slane %v2424_v29, 4  ;;  %v7343_v46 = vrot.slane %v6221_v45, 4  ;;  %v7345_v17 = vrot.slane %v7344_v47, 4  ;;  %v2890_v27 = vsel %vm232_vm0, %v2870_v57, %v2889_v56 }
 0x216   : > { %v2736_v11 = vsel %vm232_vm0, %v7342_v60, %v6307_v18  ;;  %4058 = vrot.lane.b32.xlu2 %v4057_v62, %s4221_s5  ;;  %v7346_v13 = vrot.slane %v6256_v41, 4  ;;  %v2506_v14 = vsel %vm232_vm0, %v2505_v10, %v6568_v25  ;;  %v4072_v38 = vpack.i.bf16 %v2890_v27, %v2778_v39  ;;  %v7348_v10 = vld [vmem:[#allocation42_spill] sm:$0xff] }
 0x217   : > { %v2742_v22 = vperm.slane %v2736_v11, %v4312_v8  ;;  %v2760_v7 = vsel %vm232_vm0, %v7343_v46, %v6359_v28  ;;  %v2530_v40 = vsel %vm232_vm0, %v7345_v17, %v6576_v5  ;;  %v2438_v34 = vsel %vm232_vm0, %v2437_v12, %v2400_v37  ;;  %v7349_v46 = vld [vmem:[#allocation35_spill] sm:$0xff] }
 0x218   : > { %v2766_v44 = vperm.slane %v2760_v7, %v4312_v8  ;;  %v2848_v49 = vsel %vm232_vm0, %v7346_v13, %v6278_v30  ;;  %v2536_v61 = vperm.slane %v2530_v40, %v4312_v8  ;;  %v2512_v62 = vperm.slane %v2506_v14, %v4312_v8  ;;  %v7351_v13 = vld [vmem:[#allocation40_spill] sm:$0xff] }
 0x219   : > { %v2854_v57 = vperm.slane %v2848_v49, %v4312_v8  ;;  %v7347_v20 = vrot.slane %v6253_v15, 4  ;;  %4068 = vrot.lane.b32.xlu1 %v4067_v55, %s4219_s30  ;;  %v2439_v12 = vrot.slane %v2400_v37, 4  ;;  %v7350_v7 = vrot.slane %v7349_v46, 4 }
 0x21a   : > { %v2779_v43 = vrot.slane %v2766_v44, 4  ;;  %v2549_v60 = vrot.slane %v2536_v61, 4  ;;  %v2551_v40 = vrot.slane %v2512_v62, 4  ;;  %v2055_v55 = vsel %vm232_vm0, %v2054_v4, %v7351_v13 }
 0x21b   : > { %v2872_v56 = vsel %vm232_vm0, %v7347_v20, %v6374_v53  ;;  %v2031_v39 = vsel %vm232_vm0, %v7350_v7, %v7348_v10  ;;  %v2440_v37 = vsel %vm232_vm0, %v2424_v29, %v2439_v12  ;;  %v6627_v20 = vperm.slane %v2055_v55, %v4312_v8  ;;  %v7355_v12 = vld [vmem:[#allocation43_spill] sm:$0xff] }
 0x21c   : > { %v2878_v11 = vperm.slane %v2872_v56, %v4312_v8  ;;  %v2780_v17 = vsel %vm232_vm0, %v2779_v43, %v2742_v22  ;;  %v6618_v27 = vperm.slane %v2031_v39, %v4312_v8  ;;  %v2550_v49 = vsel %vm232_vm0, %v2549_v60, %v2512_v62  ;;  %v7352_v39 = vld [vmem:[#allocation41_spill] sm:$0xff] }
 0x21d   : > { %v4077_v56 = vpack.i.bf16 %v2550_v49, %v2438_v34  ;;  %v2552_v43 = vsel %vm232_vm0, %v2536_v61, %v2551_v40  ;;  %v7354_v24 = vrot.slane %v7353_v1, 4  ;;  %v2178_v4 = vrot.slane %v6402_v19, 4  ;;  %v7371_v19 = vld [vmem:[#allocation33_spill] sm:$0xff] }
 0x21e   : > { %v2891_v14 = vrot.slane %v2878_v11, 4  ;;  %v2080_v7 = vrot.slane %v6618_v27, 4  ;;  %4073 = vrot.lane.b32.xlu2 %v4072_v38, %s4219_s30  ;;  %v4092_v29 = vpack.i.bf16 %v2552_v43, %v2440_v37  ;;  %v7356_v40 = vrot.slane %v6456_v0, 4 }
 0x21f   : > { %v2143_v9 = vsel %vm232_vm0, %v7354_v24, %v7352_v39  ;;  %4078 = vrot.lane.b32.xlu0 %v4077_v56, %s4223_s7  ;;  %v2781_v55 = vrot.slane %v2742_v22, 4  ;;  %v2507_v56 = vrot.slane %v6568_v25, 4  ;;  %v2531_v43 = vrot.slane %v6576_v5, 4 }
 0x220   : > { %v2892_v62 = vsel %vm232_vm0, %v2891_v14, %v2854_v57  ;;  %v6639_v60 = vperm.slane %v2143_v9, %v4312_v8  ;;  %v2081_v61 = vsel %vm232_vm0, %v6627_v20, %v2080_v7  ;;  %v2167_v24 = vsel %vm232_vm0, %v7356_v40, %v7355_v12 }
 0x221   : > { %v4082_v34 = vpack.i.bf16 %v2892_v62, %v2780_v17  ;;  %v6649_v38 = vperm.slane %v2167_v24, %v4312_v8  ;;  %v2893_v14 = vrot.slane %v2854_v57, 4  ;;  %v2395_v9 = vrot.slane %v7336_v54, 4 }
 0x222   : > { %v2192_v49 = vrot.slane %v6639_v60, 4  ;;  %v2782_v37 = vsel %vm232_vm0, %v2766_v44, %v2781_v55  ;;  %v2419_v17 = vrot.slane %v6547_v33, 4  ;;  %v2771_v7 = vrot.slane %v6479_v63, 4 }
 0x223   : > { %4083 = vrot.lane.b32.xlu1 %v4082_v34, %s4223_s7  ;;  %v2894_v62 = vsel %vm232_vm0, %v2878_v11, %v2893_v14  ;;  %v2396_v54 = vsel %vm232_vm0, %v7334_v52, %v2395_v9  ;;  %v2508_v34 = vsel %vm232_vm0, %v6572_v51, %v2507_v56  ;;  %v2532_v40 = vsel %vm232_vm0, %v7344_v47, %v2531_v43 }
 0x224   : > { %v2193_v22 = vsel %vm232_vm0, %v6649_v38, %v2192_v49  ;;  %v4097_v44 = vpack.i.bf16 %v2894_v62, %v2782_v37  ;;  %v2404_v33 = vperm.slane %v2396_v54, %v4312_v8  ;;  %v2420_v25 = vsel %vm232_vm0, %v7335_v16, %v2419_v17 }
 0x225   : > { %v4087_v57 = vpack.i.bf16 %v2193_v22, %v2081_v61  ;;  %v2428_v5 = vperm.slane %v2420_v25, %v4312_v8  ;;  %v7357_v11 = vrot.slane %v7348_v10, 4  ;;  %v2516_v61 = vperm.slane %v2508_v34, %v4312_v8 }
 0x226   : > { %v2540_v24 = vperm.slane %v2532_v40, %v4312_v8  ;;  %v7358_v16 = vrot.slane %v7351_v13, 4  ;;  %v7359_v10 = vrot.slane %v7352_v39, 4  ;;  %v7360_v14 = vrot.slane %v7355_v12, 4 }
 0x227   : > { %v2033_v52 = vsel %vm232_vm0, %v7349_v46, %v7357_v11  ;;  %4088 = vrot.lane.b32.xlu2 %v4087_v57, %s4220_s4  ;;  %v2441_v51 = vrot.slane %v2428_v5, 4  ;;  %4093 = vrot.lane.b32.xlu0 %v4092_v29, %s4222_s6  ;;  %v7361_v17 = vrot.slane %v6307_v18, 4  ;;  %v7362_v43 = vrot.slane %v6359_v28, 4  ;;  %s3412_s4 = sshll.u32 %s3409_s29, 4  ;;  %s3413_s4 = int_to_ptr.hbm [resolvable:$true] %s3412_s4 }
 0x228   : > { %v2041_v55 = vperm.slane %v2033_v52, %v4312_v8  ;;  %v2057_v49 = vsel %vm232_vm0, %v6415_v26, %v7358_v16  ;;  %v2145_v46 = vsel %vm232_vm0, %v7353_v1, %v7359_v10  ;;  %v2169_v9 = vsel %vm232_vm0, %v6456_v0, %v7360_v14 }
 0x229   : > { %v2065_v47 = vperm.slane %v2057_v49, %v4312_v8  ;;  %v2553_v13 = vrot.slane %v2540_v24, 4  ;;  %v2153_v26 = vperm.slane %v2145_v46, %v4312_v8  ;;  %v2177_v37 = vperm.slane %v2169_v9, %v4312_v8 }
 0x22a   : > { %v2738_v39 = vsel %vm232_vm0, %v6262_v21, %v7361_v17  ;;  %v2442_v56 = vsel %vm232_vm0, %v2441_v51, %v2404_v33  ;;  %v2762_v0 = vsel %vm232_vm0, %v6221_v45, %v7362_v43  ;;  %v7363_v18 = vrot.slane %v6278_v30, 4  ;;  %v7365_v17 = vld [vmem:[#allocation29_spill] sm:$0xff] }
 0x22b   : > { %v2082_v1 = vrot.slane %v2065_v47, 4  ;;  %v2746_v12 = vperm.slane %v2738_v39, %v4312_v8  ;;  %v2554_v29 = vsel %vm232_vm0, %v2553_v13, %v2516_v61  ;;  %v2194_v22 = vrot.slane %v2177_v37, 4  ;;  %4098 = vrot.lane.b32.xlu1 %v4097_v44, %s4222_s6 }
 0x22c   : > { %v2770_v62 = vperm.slane %v2762_v0, %v4312_v8  ;;  %v2850_v21 = vsel %vm232_vm0, %v6256_v41, %v7363_v18  ;;  %v4107_v54 = vpack.i.bf16 %v2554_v29, %v2442_v56  ;;  %v7364_v25 = vrot.slane %v6374_v53, 4  ;;  %v7367_v56 = vld [vmem:[#allocation39_spill] sm:$0xff] }
 0x22d   : > { %v2083_v57 = vsel %vm232_vm0, %v2082_v1, %v2041_v55  ;;  %v2858_v28 = vperm.slane %v2850_v21, %v4312_v8  ;;  %v2195_v34 = vsel %vm232_vm0, %v2194_v22, %v2153_v26  ;;  %v2443_v11 = vrot.slane %v2404_v33, 4 }
 0x22e   : > { %v2874_v45 = vsel %vm232_vm0, %v6253_v15, %v7364_v25  ;;  %v2783_v40 = vrot.slane %v2770_v62, 4  ;;  %v4102_v52 = vpack.i.bf16 %v2195_v34, %v2083_v57  ;;  %v2555_v41 = vrot.slane %v2516_v61, 4 }
 0x22f   : > { %v2882_v30 = vperm.slane %v2874_v45, %v4312_v8  ;;  %v2084_v16 = vrot.slane %v2041_v55, 4  ;;  %v2196_v44 = vrot.slane %v2153_v26, 4  ;;  %v2444_v10 = vsel %vm232_vm0, %v2428_v5, %v2443_v11  ;;  %4108 = vrot.lane.b32.xlu0 %v4107_v54, %s4225_s9 }
 0x230   : > { %v2784_v49 = vsel %vm232_vm0, %v2783_v40, %v2746_v12  ;;  %v2785_v46 = vrot.slane %v2746_v12, 4  ;;  %4103 = vrot.lane.b32.xlu2 %v4102_v52, %s4221_s5  ;;  %v2556_v15 = vsel %vm232_vm0, %v2540_v24, %v2555_v41  ;;  %v2897_v9 = vrot.slane %v2858_v28, 4  ;;  %s4166_s5 = sshra.s32 %s3413_s4, 4  ;;  %s4167_s5 = int_to_ptr.hbm [resolvable:$true] %s4166_s5 }
 0x231   : > { %v2895_v51 = vrot.slane %v2882_v30, 4  ;;  %v2085_v53 = vsel %vm232_vm0, %v2065_v47, %v2084_v16  ;;  %v2197_v14 = vsel %vm232_vm0, %v2177_v37, %v2196_v44  ;;  %v2883_v33 = vrot.slane %v6497_v2, 4  ;;  %p4173_p0 = scmp.lt.s32.totalorder %s4167_s5, %s7033_s2 }
 0x232   : > { %v4122_v55 = vpack.i.bf16 %v2556_v15, %v2444_v10  ;;  %v4117_v13 = vpack.i.bf16 %v2197_v14, %v2085_v53  ;;  %v2786_v5 = vsel %vm232_vm0, %v2770_v62, %v2785_v46  ;;  %v2049_v39 = vperm.slane %v7365_v17, %v4312_v8 }
 0x233   : > { %v2896_v61 = vsel %vm232_vm0, %v2895_v51, %v2858_v28  ;;  %v7366_v24 = vrot.slane %v6382_v23, 4  ;;  %v2898_v37 = vsel %vm232_vm0, %v2882_v30, %v2897_v9  ;;  %v2161_v1 = vperm.slane %v7367_v56, %v4312_v8  ;;  %v7368_v23 = vld [vmem:[#allocation34_spill] sm:$0xff]  ;;  %v7377_v9 = vld [vmem:[#allocation23_spill] sm:$0xff] }
 0x234   : > { %v4112_v26 = vpack.i.bf16 %v2896_v61, %v2784_v49  ;;  %v2179_v12 = vsel %vm232_vm0, %v2178_v4, %v6179_v31  ;;  %v2088_v43 = vrot.slane %v2049_v39, 4  ;;  %v7369_v29 = vrot.slane %v7368_v23, 4  ;;  %v7373_v31 = vld [vmem:[#allocation24_spill] sm:$0xff]  ;;  %v7374_v49 = vld [vmem:[#allocation15_spill] sm:$0xff]  ;;  %v7387_v23 = vld [vmem:[#allocation22_spill] sm:$0xff] }
 0x235   : > { %v2067_v47 = vsel %vm232_vm0, %v7366_v24, %v6010_v32  ;;  %v2185_v0 = vperm.slane %v2179_v12, %v4312_v8  ;;  %v7370_v32 = vld [vmem:[#allocation32_spill] sm:$0xff]  ;;  %v2077_v62 = vperm.slane %v6397_v35, %v4312_v8  ;;  %v2200_v18 = vrot.slane %v2161_v1, 4 }
 0x236   : > { %v2073_v2 = vperm.slane %v2067_v47, %v4312_v8  ;;  %4113 = vrot.lane.b32.xlu1 %v4112_v26, %s4225_s9  ;;  %v2045_v22 = vsel %vm232_vm0, %v7370_v32, %v7369_v29  ;;  %v7372_v57 = vrot.slane %v7371_v19, 4  ;;  %v2189_v35 = vperm.slane %v6424_v3, %v4312_v8  ;;  %v7375_v3 = vld [vmem:[#allocation8_spill] sm:$0xff]  ;;  %v7379_v26 = vld [vmem:[#allocation31_spill] sm:$0xff] }
 0x237   : > { %v2053_v54 = vperm.slane %v2045_v22, %v4312_v8  ;;  %v2198_v25 = vrot.slane %v2185_v0, 4  ;;  %v2090_v45 = vrot.slane %v2077_v62, 4  ;;  %v2201_v40 = vsel %vm232_vm0, %v2185_v0, %v2200_v18  ;;  %4123 = vrot.lane.b32.xlu0 %v4122_v55, %s4224_s8  ;;  %v7385_v0 = vld [vmem:[#allocation16_spill] sm:$0xff] }
 0x238   : > { %v2086_v21 = vrot.slane %v2073_v2, 4  ;;  %v2157_v4 = vsel %vm232_vm0, %v7373_v31, %v7372_v57  ;;  %v2089_v28 = vsel %vm232_vm0, %v2073_v2, %v2088_v43  ;;  %4118 = vrot.lane.b32.xlu2 %v4117_v13, %s4219_s30  ;;  %v3890_v51 = vunpack.i.l.bf16 %v7374_v49  ;;  %v7383_v43 = vld [vmem:[#allocation28_spill] sm:$0xff]  ;;  %s3410_s30 = sshll.u32 %s164_s26, 4  ;;  %s6997_s30 = int_to_ptr.vmem [resolvable:$true] %s3410_s30 }
 0x239   : > { %v2165_v34 = vperm.slane %v2157_v4, %v4312_v8  ;;  %v2092_v11 = vrot.slane %v2053_v54, 4  ;;  %v4137_v52 = vpack.i.bf16 %v2201_v40, %v2089_v28  ;;  %v2199_v41 = vsel %vm232_vm0, %v2198_v25, %v2161_v1  ;;  %v7394_v4 = vld [vmem:[#allocation14_spill] sm:$0xff]  ;;  %v7396_v25 = vld [vmem:[#allocation5_spill] sm:$0xff] }
 0x23a   : > { %v2087_v30 = vsel %vm232_vm0, %v2086_v21, %v2049_v39  ;;  %v2091_v16 = vsel %vm232_vm0, %v2090_v45, %v2053_v54  ;;  %v2202_v46 = vrot.slane %v2189_v35, 4  ;;  %v4127_v53 = vpack.i.bf16 %v2898_v37, %v2786_v5  ;;  %v7380_v37 = vld [vmem:[#allocation21_spill] sm:$0xff]  ;;  %v7391_v21 = vld [vmem:[#allocation7_spill] sm:$0xff]  ;;  %v7398_v40 = vld [vmem:[#allocation6_spill] sm:$0xff] }
 0x23b   : > { %v2204_v44 = vrot.slane %v2165_v34, 4  ;;  %v4132_v10 = vpack.i.bf16 %v2199_v41, %v2087_v30  ;;  %v2093_v15 = vsel %vm232_vm0, %v2077_v62, %v2092_v11  ;;  %v7376_v14 = vunpack.i.l.bf16 %v7375_v3  ;;  %v7390_v62 = vld [vmem:[#allocation30_spill] sm:$0xff] }
 0x23c   : > { %v7378_v13 = vunpack.i.h.bf16 %v7375_v3  ;;  %v2203_v39 = vsel %vm232_vm0, %v2202_v46, %v2165_v34  ;;  %v6784_v5 = vsel %vm232_vm0, %v2771_v7, %v6469_v59  ;;  %v6788_v24 = vsel %vm232_vm0, %v2883_v33, %v6484_v36  ;;  %v7405_v3 = vld [vmem:[#allocation10_spill] sm:$0xff] }
 0x23d   : > { %v2205_v8 = vsel %vm232_vm0, %v2189_v35, %v2204_v44  ;;  %v1924_v61 = vsel %vm520_vm7, %v7377_v9, %v7376_v14  ;;  %v4142_v47 = vpack.i.bf16 %v2203_v39, %v2091_v16  ;;  %v7381_v2 = vunpack.i.l.bf16 %v7380_v37  ;;  %v7399_v35 = vld [vmem:[#allocation17_spill] sm:$0xff]  ;;  %v7409_v39 = vld [vmem:[#allocation26_spill] sm:$0xff] }
 0x23e   : > { %v1931_v17 = vsel %vm520_vm7, %v7379_v26, %v7378_v13  ;;  %v4147_v55 = vpack.i.bf16 %v2205_v8, %v2093_v15  ;;  %4128 = vrot.lane.b32.xlu1 %v4127_v53, %s4224_s8  ;;  %v7382_v1 = vunpack.i.h.bf16 %v7380_v37  ;;  %v7384_v63 = vunpack.i.l.bf16 %v7383_v43  ;;  %v7401_v44 = vld [vmem:[#allocation9_spill] sm:$0xff]  ;;  %v7408_v26 = vld [vmem:[#allocation18_spill] sm:$0xff] }
 0x23f   : > { %v1925_v56 = vsel %vm522_vm8, %v1924_v61, %v7381_v2  ;;  %v7386_v36 = vunpack.i.h.bf16 %v7374_v49  ;;  %v7388_v29 = vunpack.i.l.bf16 %v7387_v23  ;;  %v7389_v22 = vunpack.i.h.bf16 %v7383_v43  ;;  %v7404_v53 = vld [vmem:[#allocation13_spill] sm:$0xff]  ;;  %4138 = vrot.lane.b32.xlu0 %v4137_v52, %s4222_s6  ;;  %s4168_s6 = scalar_lea.hbm %s4167_s5, 16 }
 0x240   : > { %v1932_v12 = vsel %vm522_vm8, %v1931_v17, %v7382_v1  ;;  %v1223_v59 = vsel %vm520_vm7, %v7385_v0, %v7384_v63  ;;  %v6802_v7 = vsel %vm524_vm9, %v1925_v56, %v3890_v51  ;;  %v7392_v54 = vunpack.i.l.bf16 %v7391_v21  ;;  %4133 = vrot.lane.b32.xlu2 %v4132_v10, %s4223_s7  ;;  %p4169_p11 = scmp.ne.s32.totalorder %s4167_s5, %s4168_s6 }
 0x241   : > { %v6807_v33 = vsel %vm524_vm9, %v1932_v12, %v7386_v36  ;;  %v1224_v32 = vsel %vm522_vm8, %v1223_v59, %v7388_v29  ;;  %v1230_v18 = vsel %vm520_vm7, %v7390_v62, %v7389_v22  ;;  %v7393_v57 = vunpack.i.h.bf16 %v7387_v23 }
 0x242   : > { %v6819_v19 = vsel %vm524_vm9, %v1224_v32, %v7392_v54  ;;  %v7395_v28 = vunpack.i.l.bf16 %v7394_v4  ;;  %v7397_v34 = vunpack.i.h.bf16 %v7394_v4  ;;  %v7400_v41 = vunpack.i.h.bf16 %v7391_v21  ;;  %v7410_v32 = vld [vmem:[#allocation44_spill] sm:$0xff]  ;;  %p4170_p12 = pnand %p4169_p11, %p4287_p5 }
 0x243   : > { %v1231_v31 = vsel %vm522_vm8, %v1230_v18, %v7393_v57  ;;  %v3313_v11 = vpack.c.bf16 %v7399_v35, %v6819_v19  ;;  %v7402_v49 = vunpack.i.l.bf16 %v7401_v44  ;;  %v7403_v46 = vunpack.i.h.bf16 %v7401_v44 }
 0x244   : > { %v881_v45 = vsel %vm520_vm7, %v7396_v25, %v7395_v28  ;;  %v888_v30 = vsel %vm520_vm7, %v7398_v40, %v7397_v34  ;;  %v6837_v16 = vsel %vm524_vm9, %v1231_v31, %v7400_v41  ;;  %v7406_v14 = vunpack.i.l.bf16 %v7405_v3  ;;  %p4171_p13 = pneg %p4170_p12 }
 0x245   : > { %v882_v51 = vsel %vm522_vm8, %v881_v45, %v7402_v49  ;;  %v889_v15 = vsel %vm522_vm8, %v888_v30, %v7403_v46  ;;  %v3314_v8 = vpack.c.bf16 %v7404_v53, %v6837_v16  ;;  %v7407_v61 = vunpack.i.h.bf16 %v7405_v3 }
 0x246   : > { %v6851_v9 = vsel %vm524_vm9, %v882_v51, %v7406_v14  ;;  %4143 = vrot.lane.b32.xlu1 %v4142_v47, %s4225_s9  ;;  %v2078_v37 = vrot.slane %v6627_v20, 4  ;;  %v2190_v2 = vrot.slane %v6649_v38, 4  ;;  %v3113_v20 = vrot.slane %v6291_v58, 4  ;;  %s4172_s9 = scalar_lea.hbm %s7033_s2, 32 }
 0x247   : > { %v6856_v13 = vsel %vm524_vm9, %v889_v15, %v7407_v61  ;;  %v3311_v17 = vpack.c.bf16 %v6851_v9, %v7408_v26  ;;  %p4174_p1 = scmp.lt.s32.totalorder %s4172_s9, %s4168_s6 }
 0x248   : > { %v3312_v10 = vpack.c.bf16 %v6856_v13, %v7409_v39  ;;  %4148 = vrot.lane.b32.xlu2 %v4147_v55, %s4224_s8  ;;  %v6869_v56 = vsel %vm232_vm0, %v2190_v2, %v6639_v60  ;;  %v6873_v52 = vsel %vm232_vm0, %v2078_v37, %v6618_v27  ;;  %v3225_v60 = vrot.slane %v6312_v6, 4 }
 0x249   : > { %v4014_v1 = vpop.permute.xlu2 %4013  ;;  %v3114_v27 = vsel %vm232_vm0, %v3113_v20, %v6191_v48  ;;  %p4175_p2 = por %p4174_p1, %p4173_p0 }
 0x24a   : > { %v4016_v38 = vunpack.i.h.bf16 %v4014_v1  ;;  %v4015_v59 = vunpack.i.l.bf16 %v4014_v1  ;;  %v3226_v22 = vsel %vm232_vm0, %v3225_v60, %v7410_v32  ;;  %v2429_v32 = vrot.slane %v6437_v42, 4 }
 0x24b   : > { %p4176_p3 = pnand %p4175_p2, %p4171_p13 }
 0x24c   : > { %v3297_v18 = vsel %vm512_vm2, %v3114_v27, %v4015_v59  ;;  %v3304_v21 = vsel %vm512_vm2, %v3226_v22, %v4016_v38  ;;  %v2541_v22 = vrot.slane %v6459_v50, 4  ;;  %v7412_v50 = vld [vmem:[#allocation46_spill] sm:$0xff] }
 0x254   : > { %v4029_v12 = vpop.permute.xlu2 %4028 }
 0x255   : > { %v4031_v45 = vunpack.i.h.bf16 %v4029_v12  ;;  %v4030_v34 = vunpack.i.l.bf16 %v4029_v12 }
 0x25c   : > { %v4019_v43 = vpop.permute.xlu0 %4018 }
 0x25d   : > { %v4021_v36 = vunpack.i.h.bf16 %v4019_v43  ;;  %v4020_v23 = vunpack.i.l.bf16 %v4019_v43 }
 0x25f   : > { %v3298_v57 = vsel %vm514_vm3, %v3297_v18, %v4020_v23  ;;  %v3305_v6 = vsel %vm514_vm3, %v3304_v21, %v4021_v36 }
 0x264   : > { %v4024_v47 = vpop.permute.xlu1 %4023 }
 0x265   : > { %v6875_v63 = vpop.permute.xlu2 %4043  ;;  %v4026_v58 = vunpack.i.h.bf16 %v4024_v47  ;;  %v4025_v54 = vunpack.i.l.bf16 %v4024_v47 }
 0x266   : > { %v4045_v18 = vunpack.i.l.bf16 %v6875_v63 }
 0x267   : > { %v3299_v31 = vsel %vm516_vm4, %v3298_v57, %v4025_v54  ;;  %v3306_v4 = vsel %vm516_vm4, %v3305_v6, %v4026_v58 }
 0x268   : > { %v3300_v41 = vsel %vm518_vm5, %v3299_v31, %v4030_v34  ;;  %v3307_v44 = vsel %vm518_vm5, %v3306_v4, %v4031_v45 }
 0x26a   : > { %v4034_v0 = vpop.permute.xlu0 %4033 }
 0x26b   : > { %v4036_v28 = vunpack.i.h.bf16 %v4034_v0  ;;  %v4035_v48 = vunpack.i.l.bf16 %v4034_v0 }
 0x26d   : > { %v3301_v46 = vsel %vm520_vm7, %v3300_v41, %v4035_v48  ;;  %v3308_v15 = vsel %vm520_vm7, %v3307_v44, %v4036_v28  ;;  %v7411_v28 = vld [vmem:[#allocation45_spill] sm:$0xff]  ;;  %v2542_v48 = vsel %vm232_vm0, %v2541_v22, %v7412_v50 }
 0x26e   : > { %v2430_v42 = vsel %vm232_vm0, %v2429_v32, %v7411_v28 }
 0x270   : > { %v6877_v55 = vpop.permute.xlu2 %4058 }
 0x271   : > { %v4061_v21 = vunpack.i.h.bf16 %v6877_v55  ;;  %v4060_v58 = vunpack.i.l.bf16 %v6877_v55  ;;  %v2955_v55 = vsel %vm512_vm2, %v6784_v5, %v4045_v18 }
 0x275   : > { %v6881_v29 = vpop.permute.xlu1 %4038 }
 0x276   : > { %v4041_v31 = vunpack.i.h.bf16 %v6881_v29  ;;  %v4040_v4 = vunpack.i.l.bf16 %v6881_v29 }
 0x278   : > { %v4074_v25 = vpop.permute.xlu2 %4073 }
 0x279   : > { %v4049_v62 = vpop.permute.xlu0 %4048  ;;  %v4076_v57 = vunpack.i.h.bf16 %v4074_v25  ;;  %v4075_v6 = vunpack.i.l.bf16 %v4074_v25  ;;  %v2956_v25 = vsel %vm514_vm3, %v2955_v55, %v4060_v58 }
 0x27a   : > { %v4051_v40 = vunpack.i.h.bf16 %v4049_v62  ;;  %v4050_v30 = vunpack.i.l.bf16 %v4049_v62  ;;  %v4046_v62 = vunpack.i.h.bf16 %v6875_v63 }
 0x27b   : > { %v2957_v44 = vsel %vm516_vm4, %v2956_v25, %v4075_v6 }
 0x27c   : > { %v3302_v61 = vsel %vm522_vm8, %v3301_v46, %v4050_v30  ;;  %v3309_v37 = vsel %vm522_vm8, %v3308_v15, %v4051_v40  ;;  %v2962_v63 = vsel %vm512_vm2, %v6788_v24, %v4046_v62  ;;  %v2620_v46 = vsel %vm512_vm2, %v2542_v48, %v4041_v31 }
 0x27d   : > { %v2963_v30 = vsel %vm514_vm3, %v2962_v63, %v4061_v21  ;;  %v2613_v15 = vsel %vm512_vm2, %v2430_v42, %v4040_v4 }
 0x281   : > { %v4064_v51 = vpop.permute.xlu0 %4063  ;;  %v6901_v20 = vpop.permute.xlu2 %4088 }
 0x282   : > { %v4066_v3 = vunpack.i.h.bf16 %v4064_v51  ;;  %v4065_v14 = vunpack.i.l.bf16 %v4064_v51  ;;  %v2964_v51 = vsel %vm516_vm4, %v2963_v30, %v4076_v57  ;;  %v4090_v5 = vunpack.i.l.bf16 %v6901_v20 }
 0x283   : > { %v4054_v49 = vpop.permute.xlu1 %4053 }
 0x284   : > { %v3303_v2 = vsel %vm524_vm9, %v3302_v61, %v4065_v14  ;;  %v3310_v1 = vsel %vm524_vm9, %v3309_v37, %v4066_v3  ;;  %v4056_v34 = vunpack.i.h.bf16 %v4054_v49  ;;  %v4055_v40 = vunpack.i.l.bf16 %v4054_v49 }
 0x285   : > { %v3319_v12 = vpack.c.bf16 %v3303_v2, %v3303_v2  ;;  %v3320_v43 = vpack.c.bf16 %v3310_v1, %v3310_v1  ;;  %v4091_v3 = vunpack.i.h.bf16 %v6901_v20 }
 0x286   : > { %v2614_v61 = vsel %vm514_vm3, %v2613_v15, %v4055_v40  ;;  %v2621_v37 = vsel %vm514_vm3, %v2620_v46, %v4056_v34 }
 0x287   : > { %v3334_v47 = vsel %vm3332_vm10, %v3319_v12, 0  ;;  %v3337_v0 = vsel %vm3332_vm10, %v3320_v43, 0 }
 0x288   : > { %3342 = vmatpush.bf16.msra.mxu0 %v3334_v47  ;;  %3356 = vmatpush.bf16.msra.mxu1 %v3337_v0 }
 0x28a   : > { %v6903_v36 = vpop.permute.xlu2 %4103 }
 0x28b   : > { %v4069_v38 = vpop.permute.xlu1 %4068  ;;  %v4106_v2 = vunpack.i.h.bf16 %v6903_v36  ;;  %v4105_v1 = vunpack.i.l.bf16 %v6903_v36 }
 0x28c   : > { %v4071_v29 = vunpack.i.h.bf16 %v4069_v38  ;;  %v4070_v41 = vunpack.i.l.bf16 %v4069_v38 }
 0x28e   : > { %v2615_v12 = vsel %vm516_vm4, %v2614_v61, %v4070_v41  ;;  %v2622_v43 = vsel %vm516_vm4, %v2621_v37, %v4071_v29 }
 0x291   : > { %v4079_v59 = vpop.permute.xlu0 %4078 }
 0x292   : > { %v6913_v54 = vpop.permute.xlu2 %4118  ;;  %v4081_v49 = vunpack.i.h.bf16 %v4079_v59  ;;  %v4080_v14 = vunpack.i.l.bf16 %v4079_v59 }
 0x293   : > { %v4121_v38 = vunpack.i.h.bf16 %v6913_v54  ;;  %v4120_v20 = vunpack.i.l.bf16 %v6913_v54 }
 0x294   : > { %v2623_v22 = vsel %vm518_vm5, %v2622_v43, %v4081_v49  ;;  %v2616_v62 = vsel %vm518_vm5, %v2615_v12, %v4080_v14  ;;  %v2262_v49 = vsel %vm512_vm2, %v6873_v52, %v4090_v5 }
 0x295   : > { %v4084_v60 = vpop.permute.xlu1 %4083  ;;  %v2263_v37 = vsel %vm514_vm3, %v2262_v49, %v4105_v1 }
 0x296   : > { %v4086_v47 = vunpack.i.h.bf16 %v4084_v60  ;;  %v4085_v0 = vunpack.i.l.bf16 %v4084_v60 }
 0x298   : > { %v2958_v4 = vsel %vm518_vm5, %v2957_v44, %v4085_v0  ;;  %v2965_v54 = vsel %vm518_vm5, %v2964_v51, %v4086_v47  ;;  %v2264_v47 = vsel %vm516_vm4, %v2263_v37, %v4120_v20 }
 0x299   : > { %v4094_v23 = vpop.permute.xlu0 %4093 }
 0x29a   : > { %v4096_v32 = vunpack.i.h.bf16 %v4094_v23  ;;  %v4095_v59 = vunpack.i.l.bf16 %v4094_v23  ;;  %v4134_v18 = vpop.permute.xlu2 %4133 }
 0x29b   : > { %v4136_v48 = vunpack.i.h.bf16 %v4134_v18  ;;  %v4135_v63 = vunpack.i.l.bf16 %v4134_v18 }
 0x29c   : > { %v2617_v42 = vsel %vm520_vm7, %v2616_v62, %v4095_v59  ;;  %v2624_v50 = vsel %vm520_vm7, %v2623_v22, %v4096_v32 }
 0x29d   : > { %v6905_v27 = vpop.permute.xlu1 %4098 }
 0x29e   : > { %v4101_v21 = vunpack.i.h.bf16 %v6905_v27  ;;  %v4100_v36 = vunpack.i.l.bf16 %v6905_v27 }
 0x2a0   : > { %v2959_v27 = vsel %vm520_vm7, %v2958_v4, %v4100_v36  ;;  %v2966_v34 = vsel %vm520_vm7, %v2965_v54, %v4101_v21 }
 0x2a1   : > { %v4109_v45 = vpop.permute.xlu0 %4108 }
 0x2a2   : > { %v4111_v57 = vunpack.i.h.bf16 %v4109_v45  ;;  %v4110_v6 = vunpack.i.l.bf16 %v4109_v45  ;;  %v4149_v52 = vpop.permute.xlu2 %4148 }
 0x2a3   : > { %v4151_v18 = vunpack.i.h.bf16 %v4149_v52  ;;  %v4150_v20 = vunpack.i.l.bf16 %v4149_v52 }
 0x2a4   : > { %v2618_v25 = vsel %vm522_vm8, %v2617_v42, %v4110_v6  ;;  %v2625_v29 = vsel %vm522_vm8, %v2624_v50, %v4111_v57 }
 0x2a8   : > { %v4114_v24 = vpop.permute.xlu1 %4113 }
 0x2a9   : > { %v4124_v58 = vpop.permute.xlu0 %4123  ;;  %v4116_v31 = vunpack.i.h.bf16 %v4114_v24  ;;  %v4115_v60 = vunpack.i.l.bf16 %v4114_v24  ;;  %v2269_v24 = vsel %vm512_vm2, %v6869_v56, %v4091_v3  ;;  %v2265_v56 = vsel %vm518_vm5, %v2264_v47, %v4135_v63 }
 0x2aa   : > { %v4126_v28 = vunpack.i.h.bf16 %v4124_v58  ;;  %v4125_v23 = vunpack.i.l.bf16 %v4124_v58  ;;  %v2270_v12 = vsel %vm514_vm3, %v2269_v24, %v4106_v2 }
 0x2ab   : > { %v2960_v30 = vsel %vm522_vm8, %v2959_v27, %v4115_v60  ;;  %v2967_v41 = vsel %vm522_vm8, %v2966_v34, %v4116_v31  ;;  %v2271_v0 = vsel %vm516_vm4, %v2270_v12, %v4121_v38  ;;  %v3523_v31 = vld [vmem:[%s7032_s1] sm:$0xff] }
 0x2ac   : > { %v2619_v44 = vsel %vm524_vm9, %v2618_v25, %v4125_v23  ;;  %v2626_v46 = vsel %vm524_vm9, %v2625_v29, %v4126_v28  ;;  %v2272_v3 = vsel %vm518_vm5, %v2271_v0, %v4136_v48 }
 0x2b0   : > { %v4129_v55 = vpop.permute.xlu1 %4128 }
 0x2b1   : > { %v4131_v45 = vunpack.i.h.bf16 %v4129_v55  ;;  %v4130_v40 = vunpack.i.l.bf16 %v4129_v55  ;;  %v4139_v43 = vpop.permute.xlu0 %4138 }
 0x2b2   : > { %v4141_v32 = vunpack.i.h.bf16 %v4139_v43  ;;  %v4140_v59 = vunpack.i.l.bf16 %v4139_v43 }
 0x2b3   : > { %v2961_v51 = vsel %vm524_vm9, %v2960_v30, %v4130_v40  ;;  %v2968_v15 = vsel %vm524_vm9, %v2967_v41, %v4131_v45 }
 0x2b4   : > { %v3317_v14 = vpack.c.bf16 %v2961_v51, %v2619_v44  ;;  %v3318_v61 = vpack.c.bf16 %v2968_v15, %v2626_v46  ;;  %v2266_v5 = vsel %vm520_vm7, %v2265_v56, %v4140_v59  ;;  %v2273_v1 = vsel %vm520_vm7, %v2272_v3, %v4141_v32 }
 0x2b6   : > { %3343 = vmatpush.bf16.msra.mxu0 %v3317_v14  ;;  %3357 = vmatpush.bf16.msra.mxu1 %v3318_v61 }
 0x2b8   : > { %v4144_v22 = vpop.permute.xlu1 %4143 }
 0x2b9   : > { %v4146_v2 = vunpack.i.h.bf16 %v4144_v22  ;;  %v4145_v62 = vunpack.i.l.bf16 %v4144_v22 }
 0x2bb   : > { %v2267_v38 = vsel %vm522_vm8, %v2266_v5, %v4145_v62  ;;  %v2274_v21 = vsel %vm522_vm8, %v2273_v1, %v4146_v2 }
 0x2bc   : > { %v2268_v36 = vsel %vm524_vm9, %v2267_v38, %v4150_v20  ;;  %v2275_v58 = vsel %vm524_vm9, %v2274_v21, %v4151_v18 }
 0x2bd   : > { %v3315_v57 = vpack.c.bf16 %v2268_v36, %v6802_v7  ;;  %v3316_v6 = vpack.c.bf16 %v2275_v58, %v6807_v33 }
 0x2bf   : > { %3344 = vmatpush.bf16.msra.mxu0 %v3315_v57  ;;  %3358 = vmatpush.bf16.msra.mxu1 %v3316_v6 }
 0x2c3   : > { %3345 = vmatpush.bf16.msra.mxu0 %v3313_v11  ;;  %3359 = vmatpush.bf16.msra.mxu1 %v3314_v8 }
 0x2c7   : > { %3346 = vmatpush.bf16.msra.mxu0 %v3311_v17  ;;  %3360 = vmatpush.bf16.msra.mxu1 %v3312_v10 }
 0x2ca   : > { %3515 = vmatmul.msk.bf16.vlgmr.msra.gmra.mxu0 %vm3328_vm11, %v3523_v31  ;;  %3516 = vmatmul.msk.bf16.vlgmr.msra.gmra.mxu1 %vm3328_vm11, %v3523_v31 }
 0x347   : > { %v3348_v7 = vpop.f32.mrf.mxu0  ;;  %v3362_v33 = vpop.f32.mrf.mxu1 }
 0x348   : > { %v3367_v19 = vpack.c.bf16 %v3362_v33, %v3348_v7  ;;  %v3371_v35 = vadd.f32 %v3362_v33, %v3348_v7  ;;  %v3377_v11 = vmul.f32 %v3348_v7, %v3348_v7  ;;  %v3378_v16 = vmul.f32 %v3362_v33, %v3362_v33 }
 0x34a   : > { %3369 = vst [vmem:[%s164_s26] sm:$0xff] %v3367_v19  ;;  %3372 = vadd.xlane.f32.xlu0 %v3371_v35  ;;  %v3381_v53 = vadd.f32 %v3378_v16, %v3377_v11 }
 0x34c   : > { %3382 = vadd.xlane.f32.xlu2 %v3381_v53 }
 0x34f   : > { %v3350_v8 = vpop.f32.mrf.mxu0  ;;  %v3364_v9 = vpop.f32.mrf.mxu1 }
 0x350   : > { %v3379_v13 = vmul.f32 %v3350_v8, %v3350_v8  ;;  %v3368_v26 = vpack.c.bf16 %v3364_v9, %v3350_v8  ;;  %v3380_v17 = vmul.f32 %v3364_v9, %v3364_v9  ;;  %v3374_v39 = vadd.f32 %v3364_v9, %v3350_v8 }
 0x352   : > { %3370 = vst [vmem:[%s164_s26 + $0x8] sm:$0xff] %v3368_v26  ;;  %3375 = vadd.xlane.f32.xlu1 %v3374_v39  ;;  %v3384_v10 = vadd.f32 %v3380_v17, %v3379_v13 }
 0x353   : > { %4179 = shalt.err (!%p4176_p3)
}
 0x354   : > { %s4227_s17 = smov 128   ;;  %s4228_s19 = smov 8   ;;  %3385 = vadd.xlane.f32.xlu2 %v3384_v10  ;;  %vm3387_vm12 = vcmask 7168  }
 0x355   : > { %3545 = dma.vmem_to_hbm [thread:$0]  (%p4287_p5), %s6997_s30, 256, %s3413_s4, %s3393_s16, %s4227_s17, %s4227_s17, %s4228_s19  }
 0x356   : > { %s3522_s20 = sshll.u32 %s4299_s24, 5 }
 0x357   : > { %s181_s27 = scalar_lea.vmem %s7034_s3, %s3522_s20 }
 0x3bd   : > { %v3373_v60 = vpop.xlane.xlu0 %3372 }
 0x3be   : > { %3388 = vst.msk [vmem:[%s181_s27] sm:$0xff] %vm3387_vm12, %v3373_v60 }
 0x3bf   : > { %v3383_v4 = vpop.xlane.xlu2 %3382 }
 0x3c0   : > { %3390 = vst.msk [vmem:[%s181_s27 + $0x10] sm:$0xff] %vm3387_vm12, %v3383_v4 }
 0x3c5   : > { %v3376_v54 = vpop.xlane.xlu1 %3375 }
 0x3c6   : > { %3389 = vst.msk [vmem:[%s181_s27 + $0x8] sm:$0xff] %vm3387_vm12, %v3376_v54 }
 0x3c7   : > { %v3386_v28 = vpop.xlane.xlu2 %3385 }
 0x3c8   : > { %3391 = vst.msk [vmem:[%s181_s27 + $0x18] sm:$0xff] %vm3387_vm12, %v3386_v28 }
 0x3c9 PF: > { %p3551_p4 = scmp.ge.s32.totalorder %s4214_s15, 2  ;;  %s3430_s22 = sand.u32 1, %s4202_s12  }
 0x3ca   : > { %s3431_s24 = scalar_lea.sflag [#allocation3], %s3430_s22 }
 0x3cb   : > { %p3548_p5 = pnand %p3551_p4, %p4291_p6 }
 0x3cd   : > { %p3549_p7 = pneg %p3548_p5 }
 0x3cf   : > { %4197 = dma.done.wait (%p3549_p7), %s3431_s24, 256  }
 0x3d0   : > { %4199 = vsyncadd (%p3549_p7), %s3431_s24, 4294967040  ;;  %p14_p8 = scmp.ge.s32.totalorder %s4274_s18, 4   ;;  %s7413_s12 = smov %s4206_s13 }
 0x3d1   : > { %s7414_s13 = smov %s4210_s14  ;;  %s7415_s14 = smov %s4285_s21 }
 0x3d2   : > { %s7416_s15 = smov %s4274_s18  ;;  %16 = sbr.rel (!%p14_p8) target bundleno = 3 (0x3), region = 75 }
 0x3d7   :  { %3445 = vsyncpa [#allocation3], 1 }
 0x3d8   :  { %3447 = vsyncpa [#allocation3 + $0x1], 1 }

</bundles_post_ra>
